<compile_context>
chip_gen: v5e
topology: v5e:2x2
jax: 0.10.0
libtpu: 0.0.40
codegen_flags: <defaults>
</compile_context>

<pallas_src>
import math
from functools import partial

import numpy as np
import jax
import jax.numpy as jnp
from jax.experimental import pallas as pl
from jax.experimental.pallas import tpu as pltpu

_LOG_GAUSS = float(np.log(1.0 / np.sqrt(2.0 * np.pi)))
_HALO = 8              # left/right zero halo (max dilation = 8)
_LN_EPS = 1e-8


def _block_cfgs(nf, gc, times, L):
    """(nf_b, gc_b, no_b, L_in, L_out) per ResidualDenseBlock, as in the PyTorch model."""
    cfgs, L_cur = [], L
    for t in range(times):
        if t == times - 2:
            bnf, bgc, bno = nf, gc, nf * 2
        elif t == times - 1:
            bnf, bgc, bno = nf * 2, gc * 2, nf * 6
        else:
            bnf, bgc, bno = nf, gc, nf
        assert L_cur % 8 == 0 and L_cur >= 16, "length must stay divisible by 8"
        L_out = (L_cur + 2 * 4 - 16) // 8 + 1          # conv6: k=16, stride=8, pad=4
        cfgs.append((bnf, bgc, bno, L_cur, L_out))
        L_cur = L_out
    return cfgs


# ----------------------------- fused kernel --------------------------------

def _make_fused_kernel(in_nc, nf, L, M, normalize, blocks):
    f32 = jnp.float32
    H = _HALO

    def kernel(*refs):
        x_ref, noise_ref, wf_ref = refs[0:3]
        pos = 3
        blk_in = []
        for _ in blocks:
            blk_in.append(refs[pos:pos + 4])
            pos += 4
        pooled_ref, ap_ref, dyn_ref = refs[pos:pos + 3]
        pos += 3
        xpad_s = refs[pos]
        pos += 1
        blk_scr = []
        for _ in blocks:
            blk_scr.append(refs[pos:pos + 2])
            pos += 2

        def lrelu(v):
            return jnp.where(v >= 0.0, v, 0.2 * v)

        # ---- conv_first: k=3, pad=1 (no activation in the reference) ----
        xpad_s[:, 0:H] = jnp.zeros((in_nc, H), f32)
        xpad_s[:, H + L:H + L + H] = jnp.zeros((in_nc, H), f32)
        xpad_s[:, H:H + L] = x_ref[0]
        fea = jnp.zeros((nf, L), f32)
        for k in range(3):
            wk = wf_ref[:, k * in_nc:(k + 1) * in_nc]
            c0 = H + k - 1
            fea = fea + jnp.dot(wk, xpad_s[:, c0:c0 + L], preferred_element_type=f32)
        fea = fea + wf_ref[:, 3 * in_nc:3 * in_nc + 1]

        cur = fea

        # ---- residual dense blocks (everything stays in VMEM) ----
        for bi, (bnf, bgc, bno, L_in, L_out) in enumerate(blocks):
            wcat_r, w5b_r, w6_r, dec_r = blk_in[bi]
            dense_s, stage_s = blk_scr[bi]
            c_all = bnf + 4 * bgc

            # zero only the halo columns that the dilated taps actually read
            dense_s[:, 0:H] = jnp.zeros((c_all, H), f32)
            dense_s[:, H + L_in:H + L_in + H] = jnp.zeros((c_all, H), f32)
            dense_s[0:bnf, H:H + L_in] = cur

            # conv1..conv4: k=3, dilation = padding = 1,2,4,8, fused LeakyReLU(0.2).
            # Each tap contracts only over the torch.cat channel prefix written so
            # far, so no zero-padded weight rows (and no stale-row reads) exist.
            bias_base = 3 * (4 * bnf + 6 * bgc)
            off = 0
            for j in range(4):
                cin = bnf + j * bgc
                dil = 1 << j
                acc = jnp.zeros((bgc, L_in), f32)
                for k in range(3):
                    w = wcat_r[:, off:off + cin]
                    off += cin
                    c0 = H + (k - 1) * dil
                    acc = acc + jnp.dot(w, dense_s[0:cin, c0:c0 + L_in],
                                        preferred_element_type=f32)
                b = wcat_r[:, bias_base + j:bias_base + j + 1]
                dense_s[bnf + j * bgc:bnf + (j + 1) * bgc, H:H + L_in] = lrelu(acc + b)

            # conv5 + 1x1 shortcut (pre-summed host-side into one weight)
            w5 = w5b_r[:, 0:c_all]
            b5 = w5b_r[:, c_all:c_all + 1]
            x5 = jnp.dot(w5, dense_s[0:c_all, H:H + L_in],
                         preferred_element_type=f32) + b5

            # conv6: k=16, stride=8, pad=4.  Write x5 into 8 shifted row-blocks of
            # `stage`, one MXU dot against the host-built 0/1 decimation matrix
            # folds the length axis by 8, then two (no, 8*bnf) dots finish conv6.
            W = L_in + 8
            stage_s[:, 0:8] = jnp.zeros((8 * bnf, 8), f32)
            stage_s[:, L_in:W] = jnp.zeros((8 * bnf, 8), f32)
            for r in range(8):
                stage_s[r * bnf:(r + 1) * bnf, 8 - r:8 - r + L_in] = x5
            full_p = jnp.dot(stage_s[...], dec_r[...], preferred_element_type=f32)

            w6a = w6_r[:, 0:8 * bnf]
            w6b = w6_r[:, 8 * bnf:16 * bnf]
            b6 = w6_r[:, 16 * bnf:16 * bnf + 1]
            x6 = (jnp.dot(w6a, full_p[:, 0:L_out], preferred_element_type=f32)
                  + jnp.dot(w6b, full_p[:, 1:1 + L_out], preferred_element_type=f32)
                  + b6)

            if normalize:              # custom LayerNorm: unbiased std, eps on std
                g = w6_r[:, 16 * bnf + 1:16 * bnf + 2]
                bt = w6_r[:, 16 * bnf + 2:16 * bnf + 3]
                mean = jnp.mean(x6, axis=-1, keepdims=True)
                cen = x6 - mean
                var = jnp.sum(cen * cen, axis=-1, keepdims=True) / (L_out - 1)
                x6 = g * cen / (jnp.sqrt(var) + _LN_EPS) + bt
            cur = lrelu(x6)

        # ---- AdaptiveAvgPool1d(1) + reparameterised head ----
        # Channels of the last block were pre-permuted to [mu (tap-major) | logvar],
        # so mu / logvar are contiguous slices here.
        pooled = jnp.mean(cur, axis=-1, keepdims=True)        # (no_last, 1)
        pooled_ref[0] = pooled
        mu = pooled[0:M, :]
        lv = jnp.clip(pooled[M:2 * M, :], -10.0, 10.0)
        std = jnp.exp(0.5 * lv)
        delta = std * noise_ref[0]
        actionn = mu + delta
        ap_ref[0] = _LOG_GAUSS - 0.5 * lv - 0.5 * (delta * delta) / jnp.exp(lv)

        # ---- per-sample dynamic conv1d(fea, action, padding=1) on the VPU ----
        fea_pad = blk_scr[0][0][0:nf, H - 1:H + L + 1]        # (nf, L + 2)
        acc = jnp.zeros((nf, L), f32)
        for t in range(3):                 # tap t weights are a contiguous slice
            acc = acc + actionn[t * nf:(t + 1) * nf, :] * fea_pad[:, t:t + L]
        dyn_ref[0] = jnp.sum(acc, axis=0, keepdims=True)

    return kernel


# --------------------------- host-side plumbing ----------------------------

def _const_spec(a):
    nd = a.ndim
    return pl.BlockSpec(a.shape, lambda i, _nd=nd: (0,) * _nd)


def _prep_block(p, bnf, bgc, bno, L_in, L_out, normalize, perm=None):
    """Repack one ResidualDenseBlock's PyTorch-layout params for the fused kernel."""
    c_all = bnf + 4 * bgc

    # conv1..conv4 taps (natural prefix widths) + 4 bias columns -> one 2-D array
    parts = []
    for j in range(4):
        w = p[f"conv{j + 1}"]["w"]                     # (bgc, bnf + j*bgc, 3)
        for k in range(3):
            parts.append(w[:, :, k])
    for j in range(4):
        parts.append(p[f"conv{j + 1}"]["b"].reshape(bgc, 1))
    wcat = jnp.concatenate(parts, axis=1)

    # conv5 + 1x1 shortcut fused (shortcut only touches the first bnf channels)
    w5 = p["conv5"]["w"][:, :, 0]
    w5 = w5.at[:, 0:bnf].add(p["shortcut"]["w"][:, :, 0])
    b5 = (p["conv5"]["b"] + p["shortcut"]["b"]).reshape(bnf, 1)
    w5b = jnp.concatenate([w5, b5], axis=1)            # (bnf, c_all + 1)

    # conv6 split into two k-halves with rows ordered (tap-major, channel-minor)
    w6 = p["conv6"]["w"]                               # (bno, bnf, 16)
    w6a = jnp.transpose(w6[:, :, 0:8], (0, 2, 1)).reshape(bno, 8 * bnf)
    w6b = jnp.transpose(w6[:, :, 8:16], (0, 2, 1)).reshape(bno, 8 * bnf)
    cols = [w6a, w6b, p["conv6"]["b"].reshape(bno, 1)]
    if normalize:
        cols += [p["gamma"].reshape(bno, 1), p["beta"].reshape(bno, 1)]
    w6cat = jnp.concatenate(cols, axis=1)
    if perm is not None:               # permute conv6 / LN output channels (last block)
        w6cat = w6cat[jnp.asarray(perm)]

    # 0/1 decimation matrix: column t selects stage column 8t + 4
    dec = np.zeros((L_in + 8, L_out + 1), np.float32)
    dec[8 * np.arange(L_out + 1) + 4, np.arange(L_out + 1)] = 1.0
    del c_all
    return [wcat, w5b, w6cat, jnp.asarray(dec)]


def base_model_forward(params, x, noise, *, in_nc, nf, gc, times, normalize):
    """Fused Pallas forward of Base_model.  x: (B, in_nc, L), noise: (B, nf*3)."""
    B, _, L = x.shape
    M = nf * 3
    assert times >= 2
    blocks = _block_cfgs(nf, gc, times, L)
    no_last = blocks[-1][2]
    assert no_last == 2 * M, "last block must emit nf*6 channels"

    # Last-block channel permutation: [mu channels (tap-major) | logvar channels].
    mu_src = np.asarray([c * 3 + t for t in range(3) for c in range(nf)], np.int32)
    perm = np.concatenate([2 * mu_src, 2 * mu_src + 1])
    inv_mu = np.argsort(mu_src).astype(np.int32)

    wf = params["conv_first"]["w"]                      # (nf, in_nc, 3)
    wfcat = jnp.concatenate([wf[:, :, k] for k in range(3)]
                            + [params["conv_first"]["b"].reshape(nf, 1)], axis=1)
    noise_k = noise[:, mu_src].reshape(B, M, 1)

    inputs = [x, noise_k, wfcat]
    in_specs = [
        pl.BlockSpec((1, in_nc, L), lambda i: (i, 0, 0)),
        pl.BlockSpec((1, M, 1), lambda i: (i, 0, 0)),
        _const_spec(wfcat),
    ]
    scratch = [pltpu.VMEM((in_nc, L + 2 * _HALO), jnp.float32)]
    for t, (bnf, bgc, bno, L_in, L_out) in enumerate(blocks):
        arrs = _prep_block(params[f"b_{t}"], bnf, bgc, bno, L_in, L_out, normalize,
                           perm=perm if t == times - 1 else None)
        inputs.extend(arrs)
        in_specs.extend(_const_spec(a) for a in arrs)
        scratch.extend([
            pltpu.VMEM((bnf + 4 * bgc, L_in + 2 * _HALO), jnp.float32),  # x|x1..x4 slab
            pltpu.VMEM((8 * bnf, L_in + 8), jnp.float32),                # conv6 stage
        ])

    kernel = _make_fused_kernel(in_nc, nf, L, M, normalize, blocks)
    pooled_k, ap_k, outputs = pl.pallas_call(
        kernel,
        out_shape=(
            jax.ShapeDtypeStruct((B, no_last, 1), jnp.float32),
            jax.ShapeDtypeStruct((B, M, 1), jnp.float32),
            jax.ShapeDtypeStruct((B, 1, L), jnp.float32),
        ),
        grid=(B,),
        in_specs=in_specs,
        out_specs=(
            pl.BlockSpec((1, no_last, 1), lambda i: (i, 0, 0)),
            pl.BlockSpec((1, M, 1), lambda i: (i, 0, 0)),
            pl.BlockSpec((1, 1, L), lambda i: (i, 0, 0)),
        ),
        scratch_shapes=scratch,
        compiler_params=pltpu.CompilerParams(dimension_semantics=("parallel",)),
    )(*inputs)

    inv = jnp.asarray(inv_mu)
    out = jnp.stack([pooled_k[:, inv, 0], pooled_k[:, M + inv, 0]], axis=-1)
    action_prob = ap_k[:, inv, 0]
    return out, outputs, action_prob


# ---------------------------- parameter setup ------------------------------

def _conv_params(key, c_out, c_in, k, scale=1.0, default_init=False):
    kw, kb = jax.random.split(key)
    fan_in = c_in * k
    if default_init:          # conv6 keeps PyTorch default Conv1d init
        bound = 1.0 / math.sqrt(fan_in)
        w = jax.random.uniform(kw, (c_out, c_in, k), jnp.float32, -bound, bound)
        b = jax.random.uniform(kb, (c_out,), jnp.float32, -bound, bound)
    else:                     # kaiming_normal_(fan_in) * scale, bias zeroed
        std = math.sqrt(2.0 / fan_in)
        w = jax.random.normal(kw, (c_out, c_in, k), jnp.float32) * std * scale
        b = jnp.zeros((c_out,), jnp.float32)
    return {"w": w, "b": b}


def init_rdb_params(key, nf, gc, no, normalize):
    ks = jax.random.split(key, 7)
    p = {
        "conv1": _conv_params(ks[0], gc, nf, 3, 0.1),
        "conv2": _conv_params(ks[1], gc, nf + gc, 3, 0.1),
        "conv3": _conv_params(ks[2], gc, nf + 2 * gc, 3, 0.1),
        "conv4": _conv_params(ks[3], gc, nf + 3 * gc, 3, 0.1),
        "conv5": _conv_params(ks[4], nf, nf + 4 * gc, 1, 0.1),
        "conv6": _conv_params(ks[5], no, nf, 16, default_init=True),
        "shortcut": _conv_params(ks[6], nf, nf, 1, 0.1),
    }
    if normalize:
        p["gamma"] = jnp.ones((no, 1), jnp.float32)
        p["beta"] = jnp.zeros((no, 1), jnp.float32)
    return p


def init_base_model_params(key, in_nc, nf, gc, times, normalize):
    ks = jax.random.split(key, times + 1)
    params = {"conv_first": _conv_params(ks[0], nf, in_nc, 3, 1.0)}
    for t in range(times):
        if t == times - 2:
            params[f"b_{t}"] = init_rdb_params(ks[t + 1], nf, gc, nf * 2, normalize)
        elif t == times - 1:
            params[f"b_{t}"] = init_rdb_params(ks[t + 1], nf * 2, gc * 2, nf * 6, normalize)
        else:
            params[f"b_{t}"] = init_rdb_params(ks[t + 1], nf, gc, nf, normalize)
    return params


# ---------------------------------- main ------------------------------------

if __name__ == "__main__":
    B, in_nc, nf, gc, times, normalize, L = 2, 4, 8, 4, 2, 1, 512
    key = jax.random.PRNGKey(0)
    pkey, xkey, nkey = jax.random.split(key, 3)

    params = init_base_model_params(pkey, in_nc, nf, gc, times, normalize)
    x = jax.random.normal(xkey, (B, in_nc, L), jnp.float32)
    # TODO(synk): torch.randn uses PyTorch's global RNG; we use jax.random instead.
    noise = jax.random.normal(nkey, (B, nf * 3), jnp.float32)

    fwd = jax.jit(partial(base_model_forward, in_nc=in_nc, nf=nf, gc=gc,
                          times=times, normalize=normalize))
    out, outputs, action_prob = fwd(params, x, noise)
    jax.block_until_ready((out, outputs, action_prob))

    assert out.shape == (B, nf * 3, 2)
    assert outputs.shape == (B, 1, L)
    assert action_prob.shape == (B, nf * 3)
    assert bool(jnp.all(jnp.isfinite(out)))
    assert bool(jnp.all(jnp.isfinite(outputs)))
    assert bool(jnp.all(jnp.isfinite(action_prob)))
    print("KERNEL_OK")
</pallas_src>

<mosaic_0001>
module attributes {stable_mosaic.version = 11 : i64} {
  func.func @kernel(%arg0: i32, %arg1: memref<1x4x512xf32, #tpu.memory_space<vmem>>, %arg2: memref<1x24x1xf32, #tpu.memory_space<vmem>>, %arg3: memref<8x13xf32, #tpu.memory_space<vmem>>, %arg4: memref<4x172xf32, #tpu.memory_space<vmem>>, %arg5: memref<8x25xf32, #tpu.memory_space<vmem>>, %arg6: memref<16x131xf32, #tpu.memory_space<vmem>>, %arg7: memref<520x65xf32, #tpu.memory_space<vmem>>, %arg8: memref<8x340xf32, #tpu.memory_space<vmem>>, %arg9: memref<16x49xf32, #tpu.memory_space<vmem>>, %arg10: memref<48x259xf32, #tpu.memory_space<vmem>>, %arg11: memref<72x9xf32, #tpu.memory_space<vmem>>, %arg12: memref<1x48x1xf32, #tpu.memory_space<vmem>>, %arg13: memref<1x24x1xf32, #tpu.memory_space<vmem>>, %arg14: memref<1x1x512xf32, #tpu.memory_space<vmem>>, %arg15: memref<4x528xf32, #tpu.memory_space<vmem>>, %arg16: memref<24x528xf32, #tpu.memory_space<vmem>>, %arg17: memref<64x520xf32, #tpu.memory_space<vmem>>, %arg18: memref<48x80xf32, #tpu.memory_space<vmem>>, %arg19: memref<128x72xf32, #tpu.memory_space<vmem>>) attributes {dimension_semantics = [#tpu.dimension_semantics<parallel>], iteration_bounds = array<i64: 2>, scalar_prefetch = 0 : i64, scratch_operands = 5 : i64, tpu.core_type = #tpu.core_type<tc>, window_params = [{transform_indices = @transform_0, window_bounds = array<i64: 1, 4, 512>}, {transform_indices = @transform_1, window_bounds = array<i64: 1, 24, 1>}, {pipeline_mode = #tpu.pipeline_mode<synchronous>, transform_indices = @transform_2, window_bounds = array<i64: 8, 13>}, {pipeline_mode = #tpu.pipeline_mode<synchronous>, transform_indices = @transform_3, window_bounds = array<i64: 4, 172>}, {pipeline_mode = #tpu.pipeline_mode<synchronous>, transform_indices = @transform_4, window_bounds = array<i64: 8, 25>}, {pipeline_mode = #tpu.pipeline_mode<synchronous>, transform_indices = @transform_5, window_bounds = array<i64: 16, 131>}, {pipeline_mode = #tpu.pipeline_mode<synchronous>, transform_indices = @transform_6, window_bounds = array<i64: 520, 65>}, {pipeline_mode = #tpu.pipeline_mode<synchronous>, transform_indices = @transform_7, window_bounds = array<i64: 8, 340>}, {pipeline_mode = #tpu.pipeline_mode<synchronous>, transform_indices = @transform_8, window_bounds = array<i64: 16, 49>}, {pipeline_mode = #tpu.pipeline_mode<synchronous>, transform_indices = @transform_9, window_bounds = array<i64: 48, 259>}, {pipeline_mode = #tpu.pipeline_mode<synchronous>, transform_indices = @transform_10, window_bounds = array<i64: 72, 9>}, {transform_indices = @transform_11, window_bounds = array<i64: 1, 48, 1>}, {transform_indices = @transform_12, window_bounds = array<i64: 1, 24, 1>}, {transform_indices = @transform_13, window_bounds = array<i64: 1, 1, 512>}]} {
    %cst = arith.constant 0.000000e+00 : f32
    %0 = vector.broadcast %cst : f32 to vector<4x8xf32>
    %c0 = arith.constant 0 : index
    %c0_0 = arith.constant 0 : index
    %1 = vector.load %arg15[%c0, %c0_0] : memref<4x528xf32, #tpu.memory_space<vmem>>, vector<4x8xf32>
    tpu.vector_store %arg15[%c0, %c0_0], %0 {strides = array<i32>} : memref<4x528xf32, #tpu.memory_space<vmem>>, vector<4x8xf32>,
    %cst_1 = arith.constant 0.000000e+00 : f32
    %2 = vector.broadcast %cst_1 : f32 to vector<4x8xf32>
    %c0_2 = arith.constant 0 : index
    %c520 = arith.constant 520 : index
    %3 = vector.load %arg15[%c0_2, %c520] : memref<4x528xf32, #tpu.memory_space<vmem>>, vector<4x8xf32>
    tpu.vector_store %arg15[%c0_2, %c520], %2 {strides = array<i32>} : memref<4x528xf32, #tpu.memory_space<vmem>>, vector<4x8xf32>,
    %c0_3 = arith.constant 0 : index
    %c0_4 = arith.constant 0 : index
    %c0_5 = arith.constant 0 : index
    %4 = vector.load %arg1[%c0_3, %c0_4, %c0_5] : memref<1x4x512xf32, #tpu.memory_space<vmem>>, vector<1x4x512xf32>
    %5 = vector.shape_cast %4 : vector<1x4x512xf32> to vector<4x512xf32>
    %c0_6 = arith.constant 0 : index
    %c8 = arith.constant 8 : index
    %6 = vector.load %arg15[%c0_6, %c8] : memref<4x528xf32, #tpu.memory_space<vmem>>, vector<4x512xf32>
    tpu.vector_store %arg15[%c0_6, %c8], %5 {strides = array<i32>} : memref<4x528xf32, #tpu.memory_space<vmem>>, vector<4x512xf32>,
    %cst_7 = arith.constant 0.000000e+00 : f32
    %7 = vector.broadcast %cst_7 : f32 to vector<8x512xf32>
    %c0_8 = arith.constant 0 : index
    %c0_9 = arith.constant 0 : index
    %8 = vector.load %arg3[%c0_8, %c0_9] : memref<8x13xf32, #tpu.memory_space<vmem>>, vector<8x4xf32>
    %c0_10 = arith.constant 0 : index
    %c7 = arith.constant 7 : index
    %9 = vector.load %arg15[%c0_10, %c7] : memref<4x528xf32, #tpu.memory_space<vmem>>, vector<4x512xf32>
    %cst_11 = arith.constant dense<0.000000e+00> : vector<8x512xf32>
    %10 = tpu.matmul %8, %9, %cst_11 {dimension_numbers = #tpu.dot_dimension_numbers<[1], [0], [0], [1], [0, 0, 1, 1], [], []>} : vector<8x4xf32>, vector<4x512xf32>, vector<8x512xf32> -> vector<8x512xf32>
    %11 = arith.addf %7, %10 : vector<8x512xf32>
    %c0_12 = arith.constant 0 : index
    %c4 = arith.constant 4 : index
    %12 = vector.load %arg3[%c0_12, %c4] : memref<8x13xf32, #tpu.memory_space<vmem>>, vector<8x4xf32>
    %c0_13 = arith.constant 0 : index
    %c8_14 = arith.constant 8 : index
    %13 = vector.load %arg15[%c0_13, %c8_14] : memref<4x528xf32, #tpu.memory_space<vmem>>, vector<4x512xf32>
    %cst_15 = arith.constant dense<0.000000e+00> : vector<8x512xf32>
    %14 = tpu.matmul %12, %13, %cst_15 {dimension_numbers = #tpu.dot_dimension_numbers<[1], [0], [0], [1], [0, 0, 1, 1], [], []>} : vector<8x4xf32>, vector<4x512xf32>, vector<8x512xf32> -> vector<8x512xf32>
    %15 = arith.addf %11, %14 : vector<8x512xf32>
    %c0_16 = arith.constant 0 : index
    %c8_17 = arith.constant 8 : index
    %16 = vector.load %arg3[%c0_16, %c8_17] : memref<8x13xf32, #tpu.memory_space<vmem>>, vector<8x4xf32>
    %c0_18 = arith.constant 0 : index
    %c9 = arith.constant 9 : index
    %17 = vector.load %arg15[%c0_18, %c9] : memref<4x528xf32, #tpu.memory_space<vmem>>, vector<4x512xf32>
    %cst_19 = arith.constant dense<0.000000e+00> : vector<8x512xf32>
    %18 = tpu.matmul %16, %17, %cst_19 {dimension_numbers = #tpu.dot_dimension_numbers<[1], [0], [0], [1], [0, 0, 1, 1], [], []>} : vector<8x4xf32>, vector<4x512xf32>, vector<8x512xf32> -> vector<8x512xf32>
    %19 = arith.addf %15, %18 : vector<8x512xf32>
    %c0_20 = arith.constant 0 : index
    %c12 = arith.constant 12 : index
    %20 = vector.load %arg3[%c0_20, %c12] : memref<8x13xf32, #tpu.memory_space<vmem>>, vector<8x1xf32>
    %21 = vector.broadcast %20 : vector<8x1xf32> to vector<8x512xf32>
    %22 = arith.addf %19, %21 : vector<8x512xf32>
    %cst_21 = arith.constant 0.000000e+00 : f32
    %23 = vector.broadcast %cst_21 : f32 to vector<24x8xf32>
    %c0_22 = arith.constant 0 : index
    %c0_23 = arith.constant 0 : index
    %24 = vector.load %arg16[%c0_22, %c0_23] : memref<24x528xf32, #tpu.memory_space<vmem>>, vector<24x8xf32>
    tpu.vector_store %arg16[%c0_22, %c0_23], %23 {strides = array<i32>} : memref<24x528xf32, #tpu.memory_space<vmem>>, vector<24x8xf32>,
    %cst_24 = arith.constant 0.000000e+00 : f32
    %25 = vector.broadcast %cst_24 : f32 to vector<24x8xf32>
    %c0_25 = arith.constant 0 : index
    %c520_26 = arith.constant 520 : index
    %26 = vector.load %arg16[%c0_25, %c520_26] : memref<24x528xf32, #tpu.memory_space<vmem>>, vector<24x8xf32>
    tpu.vector_store %arg16[%c0_25, %c520_26], %25 {strides = array<i32>} : memref<24x528xf32, #tpu.memory_space<vmem>>, vector<24x8xf32>,
    %c0_27 = arith.constant 0 : index
    %c8_28 = arith.constant 8 : index
    %27 = vector.load %arg16[%c0_27, %c8_28] : memref<24x528xf32, #tpu.memory_space<vmem>>, vector<8x512xf32>
    tpu.vector_store %arg16[%c0_27, %c8_28], %22 {strides = array<i32>} : memref<24x528xf32, #tpu.memory_space<vmem>>, vector<8x512xf32>,
    %cst_29 = arith.constant 0.000000e+00 : f32
    %28 = vector.broadcast %cst_29 : f32 to vector<4x512xf32>
    %c0_30 = arith.constant 0 : index
    %c0_31 = arith.constant 0 : index
    %29 = vector.load %arg4[%c0_30, %c0_31] : memref<4x172xf32, #tpu.memory_space<vmem>>, vector<4x8xf32>
    %c0_32 = arith.constant 0 : index
    %c7_33 = arith.constant 7 : index
    %30 = vector.load %arg16[%c0_32, %c7_33] : memref<24x528xf32, #tpu.memory_space<vmem>>, vector<8x512xf32>
    %cst_34 = arith.constant dense<0.000000e+00> : vector<4x512xf32>
    %31 = tpu.matmul %29, %30, %cst_34 {dimension_numbers = #tpu.dot_dimension_numbers<[1], [0], [0], [1], [0, 0, 1, 1], [], []>} : vector<4x8xf32>, vector<8x512xf32>, vector<4x512xf32> -> vector<4x512xf32>
    %32 = arith.addf %28, %31 : vector<4x512xf32>
    %c0_35 = arith.constant 0 : index
    %c8_36 = arith.constant 8 : index
    %33 = vector.load %arg4[%c0_35, %c8_36] : memref<4x172xf32, #tpu.memory_space<vmem>>, vector<4x8xf32>
    %c0_37 = arith.constant 0 : index
    %c8_38 = arith.constant 8 : index
    %34 = vector.load %arg16[%c0_37, %c8_38] : memref<24x528xf32, #tpu.memory_space<vmem>>, vector<8x512xf32>
    %cst_39 = arith.constant dense<0.000000e+00> : vector<4x512xf32>
    %35 = tpu.matmul %33, %34, %cst_39 {dimension_numbers = #tpu.dot_dimension_numbers<[1], [0], [0], [1], [0, 0, 1, 1], [], []>} : vector<4x8xf32>, vector<8x512xf32>, vector<4x512xf32> -> vector<4x512xf32>
    %36 = arith.addf %32, %35 : vector<4x512xf32>
    %c0_40 = arith.constant 0 : index
    %c16 = arith.constant 16 : index
    %37 = vector.load %arg4[%c0_40, %c16] : memref<4x172xf32, #tpu.memory_space<vmem>>, vector<4x8xf32>
    %c0_41 = arith.constant 0 : index
    %c9_42 = arith.constant 9 : index
    %38 = vector.load %arg16[%c0_41, %c9_42] : memref<24x528xf32, #tpu.memory_space<vmem>>, vector<8x512xf32>
    %cst_43 = arith.constant dense<0.000000e+00> : vector<4x512xf32>
    %39 = tpu.matmul %37, %38, %cst_43 {dimension_numbers = #tpu.dot_dimension_numbers<[1], [0], [0], [1], [0, 0, 1, 1], [], []>} : vector<4x8xf32>, vector<8x512xf32>, vector<4x512xf32> -> vector<4x512xf32>
    %40 = arith.addf %36, %39 : vector<4x512xf32>
    %c0_44 = arith.constant 0 : index
    %c168 = arith.constant 168 : index
    %41 = vector.load %arg4[%c0_44, %c168] : memref<4x172xf32, #tpu.memory_space<vmem>>, vector<4x1xf32>
    %42 = vector.broadcast %41 : vector<4x1xf32> to vector<4x512xf32>
    %43 = arith.addf %40, %42 : vector<4x512xf32>
    %cst_45 = arith.constant 0.000000e+00 : f32
    %44 = vector.broadcast %cst_45 : f32 to vector<4x512xf32>
    %45 = arith.cmpf oge, %43, %44 : vector<4x512xf32>
    %cst_46 = arith.constant 2.000000e-01 : f32
    %46 = vector.broadcast %cst_46 : f32 to vector<4x512xf32>
    %47 = arith.mulf %46, %43 : vector<4x512xf32>
    %48 = arith.select %45, %43, %47 : vector<4x512xi1>, vector<4x512xf32>
    %c8_47 = arith.constant 8 : index
    %c8_48 = arith.constant 8 : index
    %49 = vector.load %arg16[%c8_47, %c8_48] : memref<24x528xf32, #tpu.memory_space<vmem>>, vector<4x512xf32>
    tpu.vector_store %arg16[%c8_47, %c8_48], %48 {strides = array<i32>} : memref<24x528xf32, #tpu.memory_space<vmem>>, vector<4x512xf32>,
    %cst_49 = arith.constant 0.000000e+00 : f32
    %50 = vector.broadcast %cst_49 : f32 to vector<4x512xf32>
    %c0_50 = arith.constant 0 : index
    %c24 = arith.constant 24 : index
    %51 = vector.load %arg4[%c0_50, %c24] : memref<4x172xf32, #tpu.memory_space<vmem>>, vector<4x12xf32>
    %c0_51 = arith.constant 0 : index
    %c6 = arith.constant 6 : index
    %52 = vector.load %arg16[%c0_51, %c6] : memref<24x528xf32, #tpu.memory_space<vmem>>, vector<12x512xf32>
    %cst_52 = arith.constant dense<0.000000e+00> : vector<4x512xf32>
    %53 = tpu.matmul %51, %52, %cst_52 {dimension_numbers = #tpu.dot_dimension_numbers<[1], [0], [0], [1], [0, 0, 1, 1], [], []>} : vector<4x12xf32>, vector<12x512xf32>, vector<4x512xf32> -> vector<4x512xf32>
    %54 = arith.addf %50, %53 : vector<4x512xf32>
    %c0_53 = arith.constant 0 : index
    %c36 = arith.constant 36 : index
    %55 = vector.load %arg4[%c0_53, %c36] : memref<4x172xf32, #tpu.memory_space<vmem>>, vector<4x12xf32>
    %c0_54 = arith.constant 0 : index
    %c8_55 = arith.constant 8 : index
    %56 = vector.load %arg16[%c0_54, %c8_55] : memref<24x528xf32, #tpu.memory_space<vmem>>, vector<12x512xf32>
    %cst_56 = arith.constant dense<0.000000e+00> : vector<4x512xf32>
    %57 = tpu.matmul %55, %56, %cst_56 {dimension_numbers = #tpu.dot_dimension_numbers<[1], [0], [0], [1], [0, 0, 1, 1], [], []>} : vector<4x12xf32>, vector<12x512xf32>, vector<4x512xf32> -> vector<4x512xf32>
    %58 = arith.addf %54, %57 : vector<4x512xf32>
    %c0_57 = arith.constant 0 : index
    %c48 = arith.constant 48 : index
    %59 = vector.load %arg4[%c0_57, %c48] : memref<4x172xf32, #tpu.memory_space<vmem>>, vector<4x12xf32>
    %c0_58 = arith.constant 0 : index
    %c10 = arith.constant 10 : index
    %60 = vector.load %arg16[%c0_58, %c10] : memref<24x528xf32, #tpu.memory_space<vmem>>, vector<12x512xf32>
    %cst_59 = arith.constant dense<0.000000e+00> : vector<4x512xf32>
    %61 = tpu.matmul %59, %60, %cst_59 {dimension_numbers = #tpu.dot_dimension_numbers<[1], [0], [0], [1], [0, 0, 1, 1], [], []>} : vector<4x12xf32>, vector<12x512xf32>, vector<4x512xf32> -> vector<4x512xf32>
    %62 = arith.addf %58, %61 : vector<4x512xf32>
    %c0_60 = arith.constant 0 : index
    %c169 = arith.constant 169 : index
    %63 = vector.load %arg4[%c0_60, %c169] : memref<4x172xf32, #tpu.memory_space<vmem>>, vector<4x1xf32>
    %64 = vector.broadcast %63 : vector<4x1xf32> to vector<4x512xf32>
    %65 = arith.addf %62, %64 : vector<4x512xf32>
    %cst_61 = arith.constant 0.000000e+00 : f32
    %66 = vector.broadcast %cst_61 : f32 to vector<4x512xf32>
    %67 = arith.cmpf oge, %65, %66 : vector<4x512xf32>
    %cst_62 = arith.constant 2.000000e-01 : f32
    %68 = vector.broadcast %cst_62 : f32 to vector<4x512xf32>
    %69 = arith.mulf %68, %65 : vector<4x512xf32>
    %70 = arith.select %67, %65, %69 : vector<4x512xi1>, vector<4x512xf32>
    %c12_63 = arith.constant 12 : index
    %c8_64 = arith.constant 8 : index
    %71 = vector.load %arg16[%c12_63, %c8_64] : memref<24x528xf32, #tpu.memory_space<vmem>>, vector<4x512xf32>
    tpu.vector_store %arg16[%c12_63, %c8_64], %70 {strides = array<i32>} : memref<24x528xf32, #tpu.memory_space<vmem>>, vector<4x512xf32>,
    %cst_65 = arith.constant 0.000000e+00 : f32
    %72 = vector.broadcast %cst_65 : f32 to vector<4x512xf32>
    %c0_66 = arith.constant 0 : index
    %c60 = arith.constant 60 : index
    %73 = vector.load %arg4[%c0_66, %c60] : memref<4x172xf32, #tpu.memory_space<vmem>>, vector<4x16xf32>
    %c0_67 = arith.constant 0 : index
    %c4_68 = arith.constant 4 : index
    %74 = vector.load %arg16[%c0_67, %c4_68] : memref<24x528xf32, #tpu.memory_space<vmem>>, vector<16x512xf32>
    %cst_69 = arith.constant dense<0.000000e+00> : vector<4x512xf32>
    %75 = tpu.matmul %73, %74, %cst_69 {dimension_numbers = #tpu.dot_dimension_numbers<[1], [0], [0], [1], [0, 0, 1, 1], [], []>} : vector<4x16xf32>, vector<16x512xf32>, vector<4x512xf32> -> vector<4x512xf32>
    %76 = arith.addf %72, %75 : vector<4x512xf32>
    %c0_70 = arith.constant 0 : index
    %c76 = arith.constant 76 : index
    %77 = vector.load %arg4[%c0_70, %c76] : memref<4x172xf32, #tpu.memory_space<vmem>>, vector<4x16xf32>
    %c0_71 = arith.constant 0 : index
    %c8_72 = arith.constant 8 : index
    %78 = vector.load %arg16[%c0_71, %c8_72] : memref<24x528xf32, #tpu.memory_space<vmem>>, vector<16x512xf32>
    %cst_73 = arith.constant dense<0.000000e+00> : vector<4x512xf32>
    %79 = tpu.matmul %77, %78, %cst_73 {dimension_numbers = #tpu.dot_dimension_numbers<[1], [0], [0], [1], [0, 0, 1, 1], [], []>} : vector<4x16xf32>, vector<16x512xf32>, vector<4x512xf32> -> vector<4x512xf32>
    %80 = arith.addf %76, %79 : vector<4x512xf32>
    %c0_74 = arith.constant 0 : index
    %c92 = arith.constant 92 : index
    %81 = vector.load %arg4[%c0_74, %c92] : memref<4x172xf32, #tpu.memory_space<vmem>>, vector<4x16xf32>
    %c0_75 = arith.constant 0 : index
    %c12_76 = arith.constant 12 : index
    %82 = vector.load %arg16[%c0_75, %c12_76] : memref<24x528xf32, #tpu.memory_space<vmem>>, vector<16x512xf32>
    %cst_77 = arith.constant dense<0.000000e+00> : vector<4x512xf32>
    %83 = tpu.matmul %81, %82, %cst_77 {dimension_numbers = #tpu.dot_dimension_numbers<[1], [0], [0], [1], [0, 0, 1, 1], [], []>} : vector<4x16xf32>, vector<16x512xf32>, vector<4x512xf32> -> vector<4x512xf32>
    %84 = arith.addf %80, %83 : vector<4x512xf32>
    %c0_78 = arith.constant 0 : index
    %c170 = arith.constant 170 : index
    %85 = vector.load %arg4[%c0_78, %c170] : memref<4x172xf32, #tpu.memory_space<vmem>>, vector<4x1xf32>
    %86 = vector.broadcast %85 : vector<4x1xf32> to vector<4x512xf32>
    %87 = arith.addf %84, %86 : vector<4x512xf32>
    %cst_79 = arith.constant 0.000000e+00 : f32
    %88 = vector.broadcast %cst_79 : f32 to vector<4x512xf32>
    %89 = arith.cmpf oge, %87, %88 : vector<4x512xf32>
    %cst_80 = arith.constant 2.000000e-01 : f32
    %90 = vector.broadcast %cst_80 : f32 to vector<4x512xf32>
    %91 = arith.mulf %90, %87 : vector<4x512xf32>
    %92 = arith.select %89, %87, %91 : vector<4x512xi1>, vector<4x512xf32>
    %c16_81 = arith.constant 16 : index
    %c8_82 = arith.constant 8 : index
    %93 = vector.load %arg16[%c16_81, %c8_82] : memref<24x528xf32, #tpu.memory_space<vmem>>, vector<4x512xf32>
    tpu.vector_store %arg16[%c16_81, %c8_82], %92 {strides = array<i32>} : memref<24x528xf32, #tpu.memory_space<vmem>>, vector<4x512xf32>,
    %cst_83 = arith.constant 0.000000e+00 : f32
    %94 = vector.broadcast %cst_83 : f32 to vector<4x512xf32>
    %c0_84 = arith.constant 0 : index
    %c108 = arith.constant 108 : index
    %95 = vector.load %arg4[%c0_84, %c108] : memref<4x172xf32, #tpu.memory_space<vmem>>, vector<4x20xf32>
    %c0_85 = arith.constant 0 : index
    %c0_86 = arith.constant 0 : index
    %96 = vector.load %arg16[%c0_85, %c0_86] : memref<24x528xf32, #tpu.memory_space<vmem>>, vector<20x512xf32>
    %cst_87 = arith.constant dense<0.000000e+00> : vector<4x512xf32>
    %97 = tpu.matmul %95, %96, %cst_87 {dimension_numbers = #tpu.dot_dimension_numbers<[1], [0], [0], [1], [0, 0, 1, 1], [], []>} : vector<4x20xf32>, vector<20x512xf32>, vector<4x512xf32> -> vector<4x512xf32>
    %98 = arith.addf %94, %97 : vector<4x512xf32>
    %c0_88 = arith.constant 0 : index
    %c128 = arith.constant 128 : index
    %99 = vector.load %arg4[%c0_88, %c128] : memref<4x172xf32, #tpu.memory_space<vmem>>, vector<4x20xf32>
    %c0_89 = arith.constant 0 : index
    %c8_90 = arith.constant 8 : index
    %100 = vector.load %arg16[%c0_89, %c8_90] : memref<24x528xf32, #tpu.memory_space<vmem>>, vector<20x512xf32>
    %cst_91 = arith.constant dense<0.000000e+00> : vector<4x512xf32>
    %101 = tpu.matmul %99, %100, %cst_91 {dimension_numbers = #tpu.dot_dimension_numbers<[1], [0], [0], [1], [0, 0, 1, 1], [], []>} : vector<4x20xf32>, vector<20x512xf32>, vector<4x512xf32> -> vector<4x512xf32>
    %102 = arith.addf %98, %101 : vector<4x512xf32>
    %c0_92 = arith.constant 0 : index
    %c148 = arith.constant 148 : index
    %103 = vector.load %arg4[%c0_92, %c148] : memref<4x172xf32, #tpu.memory_space<vmem>>, vector<4x20xf32>
    %c0_93 = arith.constant 0 : index
    %c16_94 = arith.constant 16 : index
    %104 = vector.load %arg16[%c0_93, %c16_94] : memref<24x528xf32, #tpu.memory_space<vmem>>, vector<20x512xf32>
    %cst_95 = arith.constant dense<0.000000e+00> : vector<4x512xf32>
    %105 = tpu.matmul %103, %104, %cst_95 {dimension_numbers = #tpu.dot_dimension_numbers<[1], [0], [0], [1], [0, 0, 1, 1], [], []>} : vector<4x20xf32>, vector<20x512xf32>, vector<4x512xf32> -> vector<4x512xf32>
    %106 = arith.addf %102, %105 : vector<4x512xf32>
    %c0_96 = arith.constant 0 : index
    %c171 = arith.constant 171 : index
    %107 = vector.load %arg4[%c0_96, %c171] : memref<4x172xf32, #tpu.memory_space<vmem>>, vector<4x1xf32>
    %108 = vector.broadcast %107 : vector<4x1xf32> to vector<4x512xf32>
    %109 = arith.addf %106, %108 : vector<4x512xf32>
    %cst_97 = arith.constant 0.000000e+00 : f32
    %110 = vector.broadcast %cst_97 : f32 to vector<4x512xf32>
    %111 = arith.cmpf oge, %109, %110 : vector<4x512xf32>
    %cst_98 = arith.constant 2.000000e-01 : f32
    %112 = vector.broadcast %cst_98 : f32 to vector<4x512xf32>
    %113 = arith.mulf %112, %109 : vector<4x512xf32>
    %114 = arith.select %111, %109, %113 : vector<4x512xi1>, vector<4x512xf32>
    %c20 = arith.constant 20 : index
    %c8_99 = arith.constant 8 : index
    %115 = vector.load %arg16[%c20, %c8_99] : memref<24x528xf32, #tpu.memory_space<vmem>>, vector<4x512xf32>
    tpu.vector_store %arg16[%c20, %c8_99], %114 {strides = array<i32>} : memref<24x528xf32, #tpu.memory_space<vmem>>, vector<4x512xf32>,
    %c0_100 = arith.constant 0 : index
    %c0_101 = arith.constant 0 : index
    %116 = vector.load %arg5[%c0_100, %c0_101] : memref<8x25xf32, #tpu.memory_space<vmem>>, vector<8x24xf32>
    %c0_102 = arith.constant 0 : index
    %c24_103 = arith.constant 24 : index
    %117 = vector.load %arg5[%c0_102, %c24_103] : memref<8x25xf32, #tpu.memory_space<vmem>>, vector<8x1xf32>
    %c0_104 = arith.constant 0 : index
    %c8_105 = arith.constant 8 : index
    %118 = vector.load %arg16[%c0_104, %c8_105] : memref<24x528xf32, #tpu.memory_space<vmem>>, vector<24x512xf32>
    %cst_106 = arith.constant dense<0.000000e+00> : vector<8x512xf32>
    %119 = tpu.matmul %116, %118, %cst_106 {dimension_numbers = #tpu.dot_dimension_numbers<[1], [0], [0], [1], [0, 0, 1, 1], [], []>} : vector<8x24xf32>, vector<24x512xf32>, vector<8x512xf32> -> vector<8x512xf32>
    %120 = vector.broadcast %117 : vector<8x1xf32> to vector<8x512xf32>
    %121 = arith.addf %119, %120 : vector<8x512xf32>
    %cst_107 = arith.constant 0.000000e+00 : f32
    %122 = vector.broadcast %cst_107 : f32 to vector<64x8xf32>
    %c0_108 = arith.constant 0 : index
    %c0_109 = arith.constant 0 : index
    %123 = vector.load %arg17[%c0_108, %c0_109] : memref<64x520xf32, #tpu.memory_space<vmem>>, vector<64x8xf32>
    tpu.vector_store %arg17[%c0_108, %c0_109], %122 {strides = array<i32>} : memref<64x520xf32, #tpu.memory_space<vmem>>, vector<64x8xf32>,
    %cst_110 = arith.constant 0.000000e+00 : f32
    %124 = vector.broadcast %cst_110 : f32 to vector<64x8xf32>
    %c0_111 = arith.constant 0 : index
    %c512 = arith.constant 512 : index
    %125 = vector.load %arg17[%c0_111, %c512] : memref<64x520xf32, #tpu.memory_space<vmem>>, vector<64x8xf32>
    tpu.vector_store %arg17[%c0_111, %c512], %124 {strides = array<i32>} : memref<64x520xf32, #tpu.memory_space<vmem>>, vector<64x8xf32>,
    %c0_112 = arith.constant 0 : index
    %c8_113 = arith.constant 8 : index
    %126 = vector.load %arg17[%c0_112, %c8_113] : memref<64x520xf32, #tpu.memory_space<vmem>>, vector<8x512xf32>
    tpu.vector_store %arg17[%c0_112, %c8_113], %121 {strides = array<i32>} : memref<64x520xf32, #tpu.memory_space<vmem>>, vector<8x512xf32>,
    %c8_114 = arith.constant 8 : index
    %c7_115 = arith.constant 7 : index
    %127 = vector.load %arg17[%c8_114, %c7_115] : memref<64x520xf32, #tpu.memory_space<vmem>>, vector<8x512xf32>
    tpu.vector_store %arg17[%c8_114, %c7_115], %121 {strides = array<i32>} : memref<64x520xf32, #tpu.memory_space<vmem>>, vector<8x512xf32>,
    %c16_116 = arith.constant 16 : index
    %c6_117 = arith.constant 6 : index
    %128 = vector.load %arg17[%c16_116, %c6_117] : memref<64x520xf32, #tpu.memory_space<vmem>>, vector<8x512xf32>
    tpu.vector_store %arg17[%c16_116, %c6_117], %121 {strides = array<i32>} : memref<64x520xf32, #tpu.memory_space<vmem>>, vector<8x512xf32>,
    %c24_118 = arith.constant 24 : index
    %c5 = arith.constant 5 : index
    %129 = vector.load %arg17[%c24_118, %c5] : memref<64x520xf32, #tpu.memory_space<vmem>>, vector<8x512xf32>
    tpu.vector_store %arg17[%c24_118, %c5], %121 {strides = array<i32>} : memref<64x520xf32, #tpu.memory_space<vmem>>, vector<8x512xf32>,
    %c32 = arith.constant 32 : index
    %c4_119 = arith.constant 4 : index
    %130 = vector.load %arg17[%c32, %c4_119] : memref<64x520xf32, #tpu.memory_space<vmem>>, vector<8x512xf32>
    tpu.vector_store %arg17[%c32, %c4_119], %121 {strides = array<i32>} : memref<64x520xf32, #tpu.memory_space<vmem>>, vector<8x512xf32>,
    %c40 = arith.constant 40 : index
    %c3 = arith.constant 3 : index
    %131 = vector.load %arg17[%c40, %c3] : memref<64x520xf32, #tpu.memory_space<vmem>>, vector<8x512xf32>
    tpu.vector_store %arg17[%c40, %c3], %121 {strides = array<i32>} : memref<64x520xf32, #tpu.memory_space<vmem>>, vector<8x512xf32>,
    %c48_120 = arith.constant 48 : index
    %c2 = arith.constant 2 : index
    %132 = vector.load %arg17[%c48_120, %c2] : memref<64x520xf32, #tpu.memory_space<vmem>>, vector<8x512xf32>
    tpu.vector_store %arg17[%c48_120, %c2], %121 {strides = array<i32>} : memref<64x520xf32, #tpu.memory_space<vmem>>, vector<8x512xf32>,
    %c56 = arith.constant 56 : index
    %c1 = arith.constant 1 : index
    %133 = vector.load %arg17[%c56, %c1] : memref<64x520xf32, #tpu.memory_space<vmem>>, vector<8x512xf32>
    tpu.vector_store %arg17[%c56, %c1], %121 {strides = array<i32>} : memref<64x520xf32, #tpu.memory_space<vmem>>, vector<8x512xf32>,
    %c0_121 = arith.constant 0 : index
    %c0_122 = arith.constant 0 : index
    %134 = vector.load %arg17[%c0_121, %c0_122] : memref<64x520xf32, #tpu.memory_space<vmem>>, vector<64x520xf32>
    %c0_123 = arith.constant 0 : index
    %c0_124 = arith.constant 0 : index
    %135 = vector.load %arg7[%c0_123, %c0_124] : memref<520x65xf32, #tpu.memory_space<vmem>>, vector<520x65xf32>
    %cst_125 = arith.constant dense<0.000000e+00> : vector<64x65xf32>
    %136 = tpu.matmul %134, %135, %cst_125 {dimension_numbers = #tpu.dot_dimension_numbers<[1], [0], [0], [1], [0, 0, 1, 1], [], []>} : vector<64x520xf32>, vector<520x65xf32>, vector<64x65xf32> -> vector<64x65xf32>
    %c0_126 = arith.constant 0 : index
    %c0_127 = arith.constant 0 : index
    %137 = vector.load %arg6[%c0_126, %c0_127] : memref<16x131xf32, #tpu.memory_space<vmem>>, vector<16x64xf32>
    %c0_128 = arith.constant 0 : index
    %c64 = arith.constant 64 : index
    %138 = vector.load %arg6[%c0_128, %c64] : memref<16x131xf32, #tpu.memory_space<vmem>>, vector<16x64xf32>
    %c0_129 = arith.constant 0 : index
    %c128_130 = arith.constant 128 : index
    %139 = vector.load %arg6[%c0_129, %c128_130] : memref<16x131xf32, #tpu.memory_space<vmem>>, vector<16x1xf32>
    %140 = vector.extract_strided_slice %136 {offsets = [0, 0], sizes = [64, 64], strides = [1, 1]} : vector<64x65xf32> to vector<64x64xf32>
    %cst_131 = arith.constant dense<0.000000e+00> : vector<16x64xf32>
    %141 = tpu.matmul %137, %140, %cst_131 {dimension_numbers = #tpu.dot_dimension_numbers<[1], [0], [0], [1], [0, 0, 1, 1], [], []>} : vector<16x64xf32>, vector<64x64xf32>, vector<16x64xf32> -> vector<16x64xf32>
    %142 = vector.extract_strided_slice %136 {offsets = [0, 1], sizes = [64, 64], strides = [1, 1]} : vector<64x65xf32> to vector<64x64xf32>
    %cst_132 = arith.constant dense<0.000000e+00> : vector<16x64xf32>
    %143 = tpu.matmul %138, %142, %cst_132 {dimension_numbers = #tpu.dot_dimension_numbers<[1], [0], [0], [1], [0, 0, 1, 1], [], []>} : vector<16x64xf32>, vector<64x64xf32>, vector<16x64xf32> -> vector<16x64xf32>
    %144 = arith.addf %141, %143 : vector<16x64xf32>
    %145 = vector.broadcast %139 : vector<16x1xf32> to vector<16x64xf32>
    %146 = arith.addf %144, %145 : vector<16x64xf32>
    %c0_133 = arith.constant 0 : index
    %c129 = arith.constant 129 : index
    %147 = vector.load %arg6[%c0_133, %c129] : memref<16x131xf32, #tpu.memory_space<vmem>>, vector<16x1xf32>
    %c0_134 = arith.constant 0 : index
    %c130 = arith.constant 130 : index
    %148 = vector.load %arg6[%c0_134, %c130] : memref<16x131xf32, #tpu.memory_space<vmem>>, vector<16x1xf32>
    %cst_135 = arith.constant dense<0.000000e+00> : vector<16xf32>
    %149 = vector.multi_reduction <add>, %146, %cst_135 [1] : vector<16x64xf32> to vector<16xf32>
    %150 = vector.shape_cast %149 : vector<16xf32> to vector<16x1xf32>
    %cst_136 = arith.constant 6.400000e+01 : f32
    %151 = vector.broadcast %cst_136 : f32 to vector<16x1xf32>
    %152 = arith.divf %150, %151 : vector<16x1xf32>
    %153 = vector.broadcast %152 : vector<16x1xf32> to vector<16x64xf32>
    %154 = arith.subf %146, %153 : vector<16x64xf32>
    %155 = arith.mulf %154, %154 : vector<16x64xf32>
    %cst_137 = arith.constant dense<0.000000e+00> : vector<16xf32>
    %156 = vector.multi_reduction <add>, %155, %cst_137 [1] : vector<16x64xf32> to vector<16xf32>
    %157 = vector.shape_cast %156 : vector<16xf32> to vector<16x1xf32>
    %cst_138 = arith.constant 6.300000e+01 : f32
    %158 = vector.broadcast %cst_138 : f32 to vector<16x1xf32>
    %159 = arith.divf %157, %158 : vector<16x1xf32>
    %160 = vector.broadcast %147 : vector<16x1xf32> to vector<16x64xf32>
    %161 = arith.mulf %160, %154 : vector<16x64xf32>
    %162 = math.sqrt %159 : vector<16x1xf32>
    %cst_139 = arith.constant 9.99999993E-9 : f32
    %163 = vector.broadcast %cst_139 : f32 to vector<16x1xf32>
    %164 = arith.addf %162, %163 : vector<16x1xf32>
    %165 = vector.broadcast %164 : vector<16x1xf32> to vector<16x64xf32>
    %166 = arith.divf %161, %165 : vector<16x64xf32>
    %167 = vector.broadcast %148 : vector<16x1xf32> to vector<16x64xf32>
    %168 = arith.addf %166, %167 : vector<16x64xf32>
    %cst_140 = arith.constant 0.000000e+00 : f32
    %169 = vector.broadcast %cst_140 : f32 to vector<16x64xf32>
    %170 = arith.cmpf oge, %168, %169 : vector<16x64xf32>
    %cst_141 = arith.constant 2.000000e-01 : f32
    %171 = vector.broadcast %cst_141 : f32 to vector<16x64xf32>
    %172 = arith.mulf %171, %168 : vector<16x64xf32>
    %173 = arith.select %170, %168, %172 : vector<16x64xi1>, vector<16x64xf32>
    %cst_142 = arith.constant 0.000000e+00 : f32
    %174 = vector.broadcast %cst_142 : f32 to vector<48x8xf32>
    %c0_143 = arith.constant 0 : index
    %c0_144 = arith.constant 0 : index
    %175 = vector.load %arg18[%c0_143, %c0_144] : memref<48x80xf32, #tpu.memory_space<vmem>>, vector<48x8xf32>
    tpu.vector_store %arg18[%c0_143, %c0_144], %174 {strides = array<i32>} : memref<48x80xf32, #tpu.memory_space<vmem>>, vector<48x8xf32>,
    %cst_145 = arith.constant 0.000000e+00 : f32
    %176 = vector.broadcast %cst_145 : f32 to vector<48x8xf32>
    %c0_146 = arith.constant 0 : index
    %c72 = arith.constant 72 : index
    %177 = vector.load %arg18[%c0_146, %c72] : memref<48x80xf32, #tpu.memory_space<vmem>>, vector<48x8xf32>
    tpu.vector_store %arg18[%c0_146, %c72], %176 {strides = array<i32>} : memref<48x80xf32, #tpu.memory_space<vmem>>, vector<48x8xf32>,
    %c0_147 = arith.constant 0 : index
    %c8_148 = arith.constant 8 : index
    %178 = vector.load %arg18[%c0_147, %c8_148] : memref<48x80xf32, #tpu.memory_space<vmem>>, vector<16x64xf32>
    tpu.vector_store %arg18[%c0_147, %c8_148], %173 {strides = array<i32>} : memref<48x80xf32, #tpu.memory_space<vmem>>, vector<16x64xf32>,
    %cst_149 = arith.constant 0.000000e+00 : f32
    %179 = vector.broadcast %cst_149 : f32 to vector<8x64xf32>
    %c0_150 = arith.constant 0 : index
    %c0_151 = arith.constant 0 : index
    %180 = vector.load %arg8[%c0_150, %c0_151] : memref<8x340xf32, #tpu.memory_space<vmem>>, vector<8x16xf32>
    %c0_152 = arith.constant 0 : index
    %c7_153 = arith.constant 7 : index
    %181 = vector.load %arg18[%c0_152, %c7_153] : memref<48x80xf32, #tpu.memory_space<vmem>>, vector<16x64xf32>
    %cst_154 = arith.constant dense<0.000000e+00> : vector<8x64xf32>
    %182 = tpu.matmul %180, %181, %cst_154 {dimension_numbers = #tpu.dot_dimension_numbers<[1], [0], [0], [1], [0, 0, 1, 1], [], []>} : vector<8x16xf32>, vector<16x64xf32>, vector<8x64xf32> -> vector<8x64xf32>
    %183 = arith.addf %179, %182 : vector<8x64xf32>
    %c0_155 = arith.constant 0 : index
    %c16_156 = arith.constant 16 : index
    %184 = vector.load %arg8[%c0_155, %c16_156] : memref<8x340xf32, #tpu.memory_space<vmem>>, vector<8x16xf32>
    %c0_157 = arith.constant 0 : index
    %c8_158 = arith.constant 8 : index
    %185 = vector.load %arg18[%c0_157, %c8_158] : memref<48x80xf32, #tpu.memory_space<vmem>>, vector<16x64xf32>
    %cst_159 = arith.constant dense<0.000000e+00> : vector<8x64xf32>
    %186 = tpu.matmul %184, %185, %cst_159 {dimension_numbers = #tpu.dot_dimension_numbers<[1], [0], [0], [1], [0, 0, 1, 1], [], []>} : vector<8x16xf32>, vector<16x64xf32>, vector<8x64xf32> -> vector<8x64xf32>
    %187 = arith.addf %183, %186 : vector<8x64xf32>
    %c0_160 = arith.constant 0 : index
    %c32_161 = arith.constant 32 : index
    %188 = vector.load %arg8[%c0_160, %c32_161] : memref<8x340xf32, #tpu.memory_space<vmem>>, vector<8x16xf32>
    %c0_162 = arith.constant 0 : index
    %c9_163 = arith.constant 9 : index
    %189 = vector.load %arg18[%c0_162, %c9_163] : memref<48x80xf32, #tpu.memory_space<vmem>>, vector<16x64xf32>
    %cst_164 = arith.constant dense<0.000000e+00> : vector<8x64xf32>
    %190 = tpu.matmul %188, %189, %cst_164 {dimension_numbers = #tpu.dot_dimension_numbers<[1], [0], [0], [1], [0, 0, 1, 1], [], []>} : vector<8x16xf32>, vector<16x64xf32>, vector<8x64xf32> -> vector<8x64xf32>
    %191 = arith.addf %187, %190 : vector<8x64xf32>
    %c0_165 = arith.constant 0 : index
    %c336 = arith.constant 336 : index
    %192 = vector.load %arg8[%c0_165, %c336] : memref<8x340xf32, #tpu.memory_space<vmem>>, vector<8x1xf32>
    %193 = vector.broadcast %192 : vector<8x1xf32> to vector<8x64xf32>
    %194 = arith.addf %191, %193 : vector<8x64xf32>
    %cst_166 = arith.constant 0.000000e+00 : f32
    %195 = vector.broadcast %cst_166 : f32 to vector<8x64xf32>
    %196 = arith.cmpf oge, %194, %195 : vector<8x64xf32>
    %cst_167 = arith.constant 2.000000e-01 : f32
    %197 = vector.broadcast %cst_167 : f32 to vector<8x64xf32>
    %198 = arith.mulf %197, %194 : vector<8x64xf32>
    %199 = arith.select %196, %194, %198 : vector<8x64xi1>, vector<8x64xf32>
    %c16_168 = arith.constant 16 : index
    %c8_169 = arith.constant 8 : index
    %200 = vector.load %arg18[%c16_168, %c8_169] : memref<48x80xf32, #tpu.memory_space<vmem>>, vector<8x64xf32>
    tpu.vector_store %arg18[%c16_168, %c8_169], %199 {strides = array<i32>} : memref<48x80xf32, #tpu.memory_space<vmem>>, vector<8x64xf32>,
    %cst_170 = arith.constant 0.000000e+00 : f32
    %201 = vector.broadcast %cst_170 : f32 to vector<8x64xf32>
    %c0_171 = arith.constant 0 : index
    %c48_172 = arith.constant 48 : index
    %202 = vector.load %arg8[%c0_171, %c48_172] : memref<8x340xf32, #tpu.memory_space<vmem>>, vector<8x24xf32>
    %c0_173 = arith.constant 0 : index
    %c6_174 = arith.constant 6 : index
    %203 = vector.load %arg18[%c0_173, %c6_174] : memref<48x80xf32, #tpu.memory_space<vmem>>, vector<24x64xf32>
    %cst_175 = arith.constant dense<0.000000e+00> : vector<8x64xf32>
    %204 = tpu.matmul %202, %203, %cst_175 {dimension_numbers = #tpu.dot_dimension_numbers<[1], [0], [0], [1], [0, 0, 1, 1], [], []>} : vector<8x24xf32>, vector<24x64xf32>, vector<8x64xf32> -> vector<8x64xf32>
    %205 = arith.addf %201, %204 : vector<8x64xf32>
    %c0_176 = arith.constant 0 : index
    %c72_177 = arith.constant 72 : index
    %206 = vector.load %arg8[%c0_176, %c72_177] : memref<8x340xf32, #tpu.memory_space<vmem>>, vector<8x24xf32>
    %c0_178 = arith.constant 0 : index
    %c8_179 = arith.constant 8 : index
    %207 = vector.load %arg18[%c0_178, %c8_179] : memref<48x80xf32, #tpu.memory_space<vmem>>, vector<24x64xf32>
    %cst_180 = arith.constant dense<0.000000e+00> : vector<8x64xf32>
    %208 = tpu.matmul %206, %207, %cst_180 {dimension_numbers = #tpu.dot_dimension_numbers<[1], [0], [0], [1], [0, 0, 1, 1], [], []>} : vector<8x24xf32>, vector<24x64xf32>, vector<8x64xf32> -> vector<8x64xf32>
    %209 = arith.addf %205, %208 : vector<8x64xf32>
    %c0_181 = arith.constant 0 : index
    %c96 = arith.constant 96 : index
    %210 = vector.load %arg8[%c0_181, %c96] : memref<8x340xf32, #tpu.memory_space<vmem>>, vector<8x24xf32>
    %c0_182 = arith.constant 0 : index
    %c10_183 = arith.constant 10 : index
    %211 = vector.load %arg18[%c0_182, %c10_183] : memref<48x80xf32, #tpu.memory_space<vmem>>, vector<24x64xf32>
    %cst_184 = arith.constant dense<0.000000e+00> : vector<8x64xf32>
    %212 = tpu.matmul %210, %211, %cst_184 {dimension_numbers = #tpu.dot_dimension_numbers<[1], [0], [0], [1], [0, 0, 1, 1], [], []>} : vector<8x24xf32>, vector<24x64xf32>, vector<8x64xf32> -> vector<8x64xf32>
    %213 = arith.addf %209, %212 : vector<8x64xf32>
    %c0_185 = arith.constant 0 : index
    %c337 = arith.constant 337 : index
    %214 = vector.load %arg8[%c0_185, %c337] : memref<8x340xf32, #tpu.memory_space<vmem>>, vector<8x1xf32>
    %215 = vector.broadcast %214 : vector<8x1xf32> to vector<8x64xf32>
    %216 = arith.addf %213, %215 : vector<8x64xf32>
    %cst_186 = arith.constant 0.000000e+00 : f32
    %217 = vector.broadcast %cst_186 : f32 to vector<8x64xf32>
    %218 = arith.cmpf oge, %216, %217 : vector<8x64xf32>
    %cst_187 = arith.constant 2.000000e-01 : f32
    %219 = vector.broadcast %cst_187 : f32 to vector<8x64xf32>
    %220 = arith.mulf %219, %216 : vector<8x64xf32>
    %221 = arith.select %218, %216, %220 : vector<8x64xi1>, vector<8x64xf32>
    %c24_188 = arith.constant 24 : index
    %c8_189 = arith.constant 8 : index
    %222 = vector.load %arg18[%c24_188, %c8_189] : memref<48x80xf32, #tpu.memory_space<vmem>>, vector<8x64xf32>
    tpu.vector_store %arg18[%c24_188, %c8_189], %221 {strides = array<i32>} : memref<48x80xf32, #tpu.memory_space<vmem>>, vector<8x64xf32>,
    %cst_190 = arith.constant 0.000000e+00 : f32
    %223 = vector.broadcast %cst_190 : f32 to vector<8x64xf32>
    %c0_191 = arith.constant 0 : index
    %c120 = arith.constant 120 : index
    %224 = vector.load %arg8[%c0_191, %c120] : memref<8x340xf32, #tpu.memory_space<vmem>>, vector<8x32xf32>
    %c0_192 = arith.constant 0 : index
    %c4_193 = arith.constant 4 : index
    %225 = vector.load %arg18[%c0_192, %c4_193] : memref<48x80xf32, #tpu.memory_space<vmem>>, vector<32x64xf32>
    %cst_194 = arith.constant dense<0.000000e+00> : vector<8x64xf32>
    %226 = tpu.matmul %224, %225, %cst_194 {dimension_numbers = #tpu.dot_dimension_numbers<[1], [0], [0], [1], [0, 0, 1, 1], [], []>} : vector<8x32xf32>, vector<32x64xf32>, vector<8x64xf32> -> vector<8x64xf32>
    %227 = arith.addf %223, %226 : vector<8x64xf32>
    %c0_195 = arith.constant 0 : index
    %c152 = arith.constant 152 : index
    %228 = vector.load %arg8[%c0_195, %c152] : memref<8x340xf32, #tpu.memory_space<vmem>>, vector<8x32xf32>
    %c0_196 = arith.constant 0 : index
    %c8_197 = arith.constant 8 : index
    %229 = vector.load %arg18[%c0_196, %c8_197] : memref<48x80xf32, #tpu.memory_space<vmem>>, vector<32x64xf32>
    %cst_198 = arith.constant dense<0.000000e+00> : vector<8x64xf32>
    %230 = tpu.matmul %228, %229, %cst_198 {dimension_numbers = #tpu.dot_dimension_numbers<[1], [0], [0], [1], [0, 0, 1, 1], [], []>} : vector<8x32xf32>, vector<32x64xf32>, vector<8x64xf32> -> vector<8x64xf32>
    %231 = arith.addf %227, %230 : vector<8x64xf32>
    %c0_199 = arith.constant 0 : index
    %c184 = arith.constant 184 : index
    %232 = vector.load %arg8[%c0_199, %c184] : memref<8x340xf32, #tpu.memory_space<vmem>>, vector<8x32xf32>
    %c0_200 = arith.constant 0 : index
    %c12_201 = arith.constant 12 : index
    %233 = vector.load %arg18[%c0_200, %c12_201] : memref<48x80xf32, #tpu.memory_space<vmem>>, vector<32x64xf32>
    %cst_202 = arith.constant dense<0.000000e+00> : vector<8x64xf32>
    %234 = tpu.matmul %232, %233, %cst_202 {dimension_numbers = #tpu.dot_dimension_numbers<[1], [0], [0], [1], [0, 0, 1, 1], [], []>} : vector<8x32xf32>, vector<32x64xf32>, vector<8x64xf32> -> vector<8x64xf32>
    %235 = arith.addf %231, %234 : vector<8x64xf32>
    %c0_203 = arith.constant 0 : index
    %c338 = arith.constant 338 : index
    %236 = vector.load %arg8[%c0_203, %c338] : memref<8x340xf32, #tpu.memory_space<vmem>>, vector<8x1xf32>
    %237 = vector.broadcast %236 : vector<8x1xf32> to vector<8x64xf32>
    %238 = arith.addf %235, %237 : vector<8x64xf32>
    %cst_204 = arith.constant 0.000000e+00 : f32
    %239 = vector.broadcast %cst_204 : f32 to vector<8x64xf32>
    %240 = arith.cmpf oge, %238, %239 : vector<8x64xf32>
    %cst_205 = arith.constant 2.000000e-01 : f32
    %241 = vector.broadcast %cst_205 : f32 to vector<8x64xf32>
    %242 = arith.mulf %241, %238 : vector<8x64xf32>
    %243 = arith.select %240, %238, %242 : vector<8x64xi1>, vector<8x64xf32>
    %c32_206 = arith.constant 32 : index
    %c8_207 = arith.constant 8 : index
    %244 = vector.load %arg18[%c32_206, %c8_207] : memref<48x80xf32, #tpu.memory_space<vmem>>, vector<8x64xf32>
    tpu.vector_store %arg18[%c32_206, %c8_207], %243 {strides = array<i32>} : memref<48x80xf32, #tpu.memory_space<vmem>>, vector<8x64xf32>,
    %cst_208 = arith.constant 0.000000e+00 : f32
    %245 = vector.broadcast %cst_208 : f32 to vector<8x64xf32>
    %c0_209 = arith.constant 0 : index
    %c216 = arith.constant 216 : index
    %246 = vector.load %arg8[%c0_209, %c216] : memref<8x340xf32, #tpu.memory_space<vmem>>, vector<8x40xf32>
    %c0_210 = arith.constant 0 : index
    %c0_211 = arith.constant 0 : index
    %247 = vector.load %arg18[%c0_210, %c0_211] : memref<48x80xf32, #tpu.memory_space<vmem>>, vector<40x64xf32>
    %cst_212 = arith.constant dense<0.000000e+00> : vector<8x64xf32>
    %248 = tpu.matmul %246, %247, %cst_212 {dimension_numbers = #tpu.dot_dimension_numbers<[1], [0], [0], [1], [0, 0, 1, 1], [], []>} : vector<8x40xf32>, vector<40x64xf32>, vector<8x64xf32> -> vector<8x64xf32>
    %249 = arith.addf %245, %248 : vector<8x64xf32>
    %c0_213 = arith.constant 0 : index
    %c256 = arith.constant 256 : index
    %250 = vector.load %arg8[%c0_213, %c256] : memref<8x340xf32, #tpu.memory_space<vmem>>, vector<8x40xf32>
    %c0_214 = arith.constant 0 : index
    %c8_215 = arith.constant 8 : index
    %251 = vector.load %arg18[%c0_214, %c8_215] : memref<48x80xf32, #tpu.memory_space<vmem>>, vector<40x64xf32>
    %cst_216 = arith.constant dense<0.000000e+00> : vector<8x64xf32>
    %252 = tpu.matmul %250, %251, %cst_216 {dimension_numbers = #tpu.dot_dimension_numbers<[1], [0], [0], [1], [0, 0, 1, 1], [], []>} : vector<8x40xf32>, vector<40x64xf32>, vector<8x64xf32> -> vector<8x64xf32>
    %253 = arith.addf %249, %252 : vector<8x64xf32>
    %c0_217 = arith.constant 0 : index
    %c296 = arith.constant 296 : index
    %254 = vector.load %arg8[%c0_217, %c296] : memref<8x340xf32, #tpu.memory_space<vmem>>, vector<8x40xf32>
    %c0_218 = arith.constant 0 : index
    %c16_219 = arith.constant 16 : index
    %255 = vector.load %arg18[%c0_218, %c16_219] : memref<48x80xf32, #tpu.memory_space<vmem>>, vector<40x64xf32>
    %cst_220 = arith.constant dense<0.000000e+00> : vector<8x64xf32>
    %256 = tpu.matmul %254, %255, %cst_220 {dimension_numbers = #tpu.dot_dimension_numbers<[1], [0], [0], [1], [0, 0, 1, 1], [], []>} : vector<8x40xf32>, vector<40x64xf32>, vector<8x64xf32> -> vector<8x64xf32>
    %257 = arith.addf %253, %256 : vector<8x64xf32>
    %c0_221 = arith.constant 0 : index
    %c339 = arith.constant 339 : index
    %258 = vector.load %arg8[%c0_221, %c339] : memref<8x340xf32, #tpu.memory_space<vmem>>, vector<8x1xf32>
    %259 = vector.broadcast %258 : vector<8x1xf32> to vector<8x64xf32>
    %260 = arith.addf %257, %259 : vector<8x64xf32>
    %cst_222 = arith.constant 0.000000e+00 : f32
    %261 = vector.broadcast %cst_222 : f32 to vector<8x64xf32>
    %262 = arith.cmpf oge, %260, %261 : vector<8x64xf32>
    %cst_223 = arith.constant 2.000000e-01 : f32
    %263 = vector.broadcast %cst_223 : f32 to vector<8x64xf32>
    %264 = arith.mulf %263, %260 : vector<8x64xf32>
    %265 = arith.select %262, %260, %264 : vector<8x64xi1>, vector<8x64xf32>
    %c40_224 = arith.constant 40 : index
    %c8_225 = arith.constant 8 : index
    %266 = vector.load %arg18[%c40_224, %c8_225] : memref<48x80xf32, #tpu.memory_space<vmem>>, vector<8x64xf32>
    tpu.vector_store %arg18[%c40_224, %c8_225], %265 {strides = array<i32>} : memref<48x80xf32, #tpu.memory_space<vmem>>, vector<8x64xf32>,
    %c0_226 = arith.constant 0 : index
    %c0_227 = arith.constant 0 : index
    %267 = vector.load %arg9[%c0_226, %c0_227] : memref<16x49xf32, #tpu.memory_space<vmem>>, vector<16x48xf32>
    %c0_228 = arith.constant 0 : index
    %c48_229 = arith.constant 48 : index
    %268 = vector.load %arg9[%c0_228, %c48_229] : memref<16x49xf32, #tpu.memory_space<vmem>>, vector<16x1xf32>
    %c0_230 = arith.constant 0 : index
    %c8_231 = arith.constant 8 : index
    %269 = vector.load %arg18[%c0_230, %c8_231] : memref<48x80xf32, #tpu.memory_space<vmem>>, vector<48x64xf32>
    %cst_232 = arith.constant dense<0.000000e+00> : vector<16x64xf32>
    %270 = tpu.matmul %267, %269, %cst_232 {dimension_numbers = #tpu.dot_dimension_numbers<[1], [0], [0], [1], [0, 0, 1, 1], [], []>} : vector<16x48xf32>, vector<48x64xf32>, vector<16x64xf32> -> vector<16x64xf32>
    %271 = vector.broadcast %268 : vector<16x1xf32> to vector<16x64xf32>
    %272 = arith.addf %270, %271 : vector<16x64xf32>
    %cst_233 = arith.constant 0.000000e+00 : f32
    %273 = vector.broadcast %cst_233 : f32 to vector<128x8xf32>
    %c0_234 = arith.constant 0 : index
    %c0_235 = arith.constant 0 : index
    %274 = vector.load %arg19[%c0_234, %c0_235] : memref<128x72xf32, #tpu.memory_space<vmem>>, vector<128x8xf32>
    tpu.vector_store %arg19[%c0_234, %c0_235], %273 {strides = array<i32>} : memref<128x72xf32, #tpu.memory_space<vmem>>, vector<128x8xf32>,
    %cst_236 = arith.constant 0.000000e+00 : f32
    %275 = vector.broadcast %cst_236 : f32 to vector<128x8xf32>
    %c0_237 = arith.constant 0 : index
    %c64_238 = arith.constant 64 : index
    %276 = vector.load %arg19[%c0_237, %c64_238] : memref<128x72xf32, #tpu.memory_space<vmem>>, vector<128x8xf32>
    tpu.vector_store %arg19[%c0_237, %c64_238], %275 {strides = array<i32>} : memref<128x72xf32, #tpu.memory_space<vmem>>, vector<128x8xf32>,
    %c0_239 = arith.constant 0 : index
    %c8_240 = arith.constant 8 : index
    %277 = vector.load %arg19[%c0_239, %c8_240] : memref<128x72xf32, #tpu.memory_space<vmem>>, vector<16x64xf32>
    tpu.vector_store %arg19[%c0_239, %c8_240], %272 {strides = array<i32>} : memref<128x72xf32, #tpu.memory_space<vmem>>, vector<16x64xf32>,
    %c16_241 = arith.constant 16 : index
    %c7_242 = arith.constant 7 : index
    %278 = vector.load %arg19[%c16_241, %c7_242] : memref<128x72xf32, #tpu.memory_space<vmem>>, vector<16x64xf32>
    tpu.vector_store %arg19[%c16_241, %c7_242], %272 {strides = array<i32>} : memref<128x72xf32, #tpu.memory_space<vmem>>, vector<16x64xf32>,
    %c32_243 = arith.constant 32 : index
    %c6_244 = arith.constant 6 : index
    %279 = vector.load %arg19[%c32_243, %c6_244] : memref<128x72xf32, #tpu.memory_space<vmem>>, vector<16x64xf32>
    tpu.vector_store %arg19[%c32_243, %c6_244], %272 {strides = array<i32>} : memref<128x72xf32, #tpu.memory_space<vmem>>, vector<16x64xf32>,
    %c48_245 = arith.constant 48 : index
    %c5_246 = arith.constant 5 : index
    %280 = vector.load %arg19[%c48_245, %c5_246] : memref<128x72xf32, #tpu.memory_space<vmem>>, vector<16x64xf32>
    tpu.vector_store %arg19[%c48_245, %c5_246], %272 {strides = array<i32>} : memref<128x72xf32, #tpu.memory_space<vmem>>, vector<16x64xf32>,
    %c64_247 = arith.constant 64 : index
    %c4_248 = arith.constant 4 : index
    %281 = vector.load %arg19[%c64_247, %c4_248] : memref<128x72xf32, #tpu.memory_space<vmem>>, vector<16x64xf32>
    tpu.vector_store %arg19[%c64_247, %c4_248], %272 {strides = array<i32>} : memref<128x72xf32, #tpu.memory_space<vmem>>, vector<16x64xf32>,
    %c80 = arith.constant 80 : index
    %c3_249 = arith.constant 3 : index
    %282 = vector.load %arg19[%c80, %c3_249] : memref<128x72xf32, #tpu.memory_space<vmem>>, vector<16x64xf32>
    tpu.vector_store %arg19[%c80, %c3_249], %272 {strides = array<i32>} : memref<128x72xf32, #tpu.memory_space<vmem>>, vector<16x64xf32>,
    %c96_250 = arith.constant 96 : index
    %c2_251 = arith.constant 2 : index
    %283 = vector.load %arg19[%c96_250, %c2_251] : memref<128x72xf32, #tpu.memory_space<vmem>>, vector<16x64xf32>
    tpu.vector_store %arg19[%c96_250, %c2_251], %272 {strides = array<i32>} : memref<128x72xf32, #tpu.memory_space<vmem>>, vector<16x64xf32>,
    %c112 = arith.constant 112 : index
    %c1_252 = arith.constant 1 : index
    %284 = vector.load %arg19[%c112, %c1_252] : memref<128x72xf32, #tpu.memory_space<vmem>>, vector<16x64xf32>
    tpu.vector_store %arg19[%c112, %c1_252], %272 {strides = array<i32>} : memref<128x72xf32, #tpu.memory_space<vmem>>, vector<16x64xf32>,
    %c0_253 = arith.constant 0 : index
    %c0_254 = arith.constant 0 : index
    %285 = vector.load %arg19[%c0_253, %c0_254] : memref<128x72xf32, #tpu.memory_space<vmem>>, vector<128x72xf32>
    %c0_255 = arith.constant 0 : index
    %c0_256 = arith.constant 0 : index
    %286 = vector.load %arg11[%c0_255, %c0_256] : memref<72x9xf32, #tpu.memory_space<vmem>>, vector<72x9xf32>
    %cst_257 = arith.constant dense<0.000000e+00> : vector<128x9xf32>
    %287 = tpu.matmul %285, %286, %cst_257 {dimension_numbers = #tpu.dot_dimension_numbers<[1], [0], [0], [1], [0, 0, 1, 1], [], []>} : vector<128x72xf32>, vector<72x9xf32>, vector<128x9xf32> -> vector<128x9xf32>
    %c0_258 = arith.constant 0 : index
    %c0_259 = arith.constant 0 : index
    %288 = vector.load %arg10[%c0_258, %c0_259] : memref<48x259xf32, #tpu.memory_space<vmem>>, vector<48x128xf32>
    %c0_260 = arith.constant 0 : index
    %c128_261 = arith.constant 128 : index
    %289 = vector.load %arg10[%c0_260, %c128_261] : memref<48x259xf32, #tpu.memory_space<vmem>>, vector<48x128xf32>
    %c0_262 = arith.constant 0 : index
    %c256_263 = arith.constant 256 : index
    %290 = vector.load %arg10[%c0_262, %c256_263] : memref<48x259xf32, #tpu.memory_space<vmem>>, vector<48x1xf32>
    %291 = vector.extract_strided_slice %287 {offsets = [0, 0], sizes = [128, 8], strides = [1, 1]} : vector<128x9xf32> to vector<128x8xf32>
    %cst_264 = arith.constant dense<0.000000e+00> : vector<48x8xf32>
    %292 = tpu.matmul %288, %291, %cst_264 {dimension_numbers = #tpu.dot_dimension_numbers<[1], [0], [0], [1], [0, 0, 1, 1], [], []>} : vector<48x128xf32>, vector<128x8xf32>, vector<48x8xf32> -> vector<48x8xf32>
    %293 = vector.extract_strided_slice %287 {offsets = [0, 1], sizes = [128, 8], strides = [1, 1]} : vector<128x9xf32> to vector<128x8xf32>
    %cst_265 = arith.constant dense<0.000000e+00> : vector<48x8xf32>
    %294 = tpu.matmul %289, %293, %cst_265 {dimension_numbers = #tpu.dot_dimension_numbers<[1], [0], [0], [1], [0, 0, 1, 1], [], []>} : vector<48x128xf32>, vector<128x8xf32>, vector<48x8xf32> -> vector<48x8xf32>
    %295 = arith.addf %292, %294 : vector<48x8xf32>
    %296 = vector.broadcast %290 : vector<48x1xf32> to vector<48x8xf32>
    %297 = arith.addf %295, %296 : vector<48x8xf32>
    %c0_266 = arith.constant 0 : index
    %c257 = arith.constant 257 : index
    %298 = vector.load %arg10[%c0_266, %c257] : memref<48x259xf32, #tpu.memory_space<vmem>>, vector<48x1xf32>
    %c0_267 = arith.constant 0 : index
    %c258 = arith.constant 258 : index
    %299 = vector.load %arg10[%c0_267, %c258] : memref<48x259xf32, #tpu.memory_space<vmem>>, vector<48x1xf32>
    %cst_268 = arith.constant dense<0.000000e+00> : vector<48xf32>
    %300 = vector.multi_reduction <add>, %297, %cst_268 [1] : vector<48x8xf32> to vector<48xf32>
    %301 = vector.shape_cast %300 : vector<48xf32> to vector<48x1xf32>
    %cst_269 = arith.constant 8.000000e+00 : f32
    %302 = vector.broadcast %cst_269 : f32 to vector<48x1xf32>
    %303 = arith.divf %301, %302 : vector<48x1xf32>
    %304 = vector.broadcast %303 : vector<48x1xf32> to vector<48x8xf32>
    %305 = arith.subf %297, %304 : vector<48x8xf32>
    %306 = arith.mulf %305, %305 : vector<48x8xf32>
    %cst_270 = arith.constant dense<0.000000e+00> : vector<48xf32>
    %307 = vector.multi_reduction <add>, %306, %cst_270 [1] : vector<48x8xf32> to vector<48xf32>
    %308 = vector.shape_cast %307 : vector<48xf32> to vector<48x1xf32>
    %cst_271 = arith.constant 7.000000e+00 : f32
    %309 = vector.broadcast %cst_271 : f32 to vector<48x1xf32>
    %310 = arith.divf %308, %309 : vector<48x1xf32>
    %311 = vector.broadcast %298 : vector<48x1xf32> to vector<48x8xf32>
    %312 = arith.mulf %311, %305 : vector<48x8xf32>
    %313 = math.sqrt %310 : vector<48x1xf32>
    %cst_272 = arith.constant 9.99999993E-9 : f32
    %314 = vector.broadcast %cst_272 : f32 to vector<48x1xf32>
    %315 = arith.addf %313, %314 : vector<48x1xf32>
    %316 = vector.broadcast %315 : vector<48x1xf32> to vector<48x8xf32>
    %317 = arith.divf %312, %316 : vector<48x8xf32>
    %318 = vector.broadcast %299 : vector<48x1xf32> to vector<48x8xf32>
    %319 = arith.addf %317, %318 : vector<48x8xf32>
    %cst_273 = arith.constant 0.000000e+00 : f32
    %320 = vector.broadcast %cst_273 : f32 to vector<48x8xf32>
    %321 = arith.cmpf oge, %319, %320 : vector<48x8xf32>
    %cst_274 = arith.constant 2.000000e-01 : f32
    %322 = vector.broadcast %cst_274 : f32 to vector<48x8xf32>
    %323 = arith.mulf %322, %319 : vector<48x8xf32>
    %324 = arith.select %321, %319, %323 : vector<48x8xi1>, vector<48x8xf32>
    %cst_275 = arith.constant dense<0.000000e+00> : vector<48xf32>
    %325 = vector.multi_reduction <add>, %324, %cst_275 [1] : vector<48x8xf32> to vector<48xf32>
    %326 = vector.shape_cast %325 : vector<48xf32> to vector<48x1xf32>
    %cst_276 = arith.constant 8.000000e+00 : f32
    %327 = vector.broadcast %cst_276 : f32 to vector<48x1xf32>
    %328 = arith.divf %326, %327 : vector<48x1xf32>
    %c0_277 = arith.constant 0 : index
    %c0_278 = arith.constant 0 : index
    %c0_279 = arith.constant 0 : index
    %329 = vector.load %arg12[%c0_277, %c0_278, %c0_279] : memref<1x48x1xf32, #tpu.memory_space<vmem>>, vector<1x48x1xf32>
    %330 = vector.shape_cast %329 : vector<1x48x1xf32> to vector<48x1xf32>
    %331 = vector.shape_cast %328 : vector<48x1xf32> to vector<1x48x1xf32>
    tpu.vector_store %arg12[%c0_277, %c0_278, %c0_279], %331 {strides = array<i32>} : memref<1x48x1xf32, #tpu.memory_space<vmem>>, vector<1x48x1xf32>,
    %332 = vector.extract_strided_slice %328 {offsets = [0, 0], sizes = [24, 1], strides = [1, 1]} : vector<48x1xf32> to vector<24x1xf32>
    %333 = vector.extract_strided_slice %328 {offsets = [24, 0], sizes = [24, 1], strides = [1, 1]} : vector<48x1xf32> to vector<24x1xf32>
    %cst_280 = arith.constant -1.000000e+01 : f32
    %cst_281 = arith.constant 1.000000e+01 : f32
    %334 = vector.broadcast %cst_280 : f32 to vector<24x1xf32>
    %335 = arith.maximumf %334, %333 : vector<24x1xf32>
    %336 = vector.broadcast %cst_281 : f32 to vector<24x1xf32>
    %337 = arith.minimumf %336, %335 : vector<24x1xf32>
    %cst_282 = arith.constant 5.000000e-01 : f32
    %338 = vector.broadcast %cst_282 : f32 to vector<24x1xf32>
    %339 = arith.mulf %338, %337 : vector<24x1xf32>
    %340 = math.exp %339 : vector<24x1xf32>
    %c0_283 = arith.constant 0 : index
    %c0_284 = arith.constant 0 : index
    %c0_285 = arith.constant 0 : index
    %341 = vector.load %arg2[%c0_283, %c0_284, %c0_285] : memref<1x24x1xf32, #tpu.memory_space<vmem>>, vector<1x24x1xf32>
    %342 = vector.shape_cast %341 : vector<1x24x1xf32> to vector<24x1xf32>
    %343 = arith.mulf %340, %342 : vector<24x1xf32>
    %344 = arith.addf %332, %343 : vector<24x1xf32>
    %cst_286 = arith.constant 5.000000e-01 : f32
    %345 = vector.broadcast %cst_286 : f32 to vector<24x1xf32>
    %346 = arith.mulf %345, %337 : vector<24x1xf32>
    %cst_287 = arith.constant -0.918938517 : f32
    %347 = vector.broadcast %cst_287 : f32 to vector<24x1xf32>
    %348 = arith.subf %347, %346 : vector<24x1xf32>
    %349 = arith.mulf %343, %343 : vector<24x1xf32>
    %cst_288 = arith.constant 5.000000e-01 : f32
    %350 = vector.broadcast %cst_288 : f32 to vector<24x1xf32>
    %351 = arith.mulf %350, %349 : vector<24x1xf32>
    %352 = math.exp %337 : vector<24x1xf32>
    %353 = arith.divf %351, %352 : vector<24x1xf32>
    %354 = arith.subf %348, %353 : vector<24x1xf32>
    %c0_289 = arith.constant 0 : index
    %c0_290 = arith.constant 0 : index
    %c0_291 = arith.constant 0 : index
    %355 = vector.load %arg13[%c0_289, %c0_290, %c0_291] : memref<1x24x1xf32, #tpu.memory_space<vmem>>, vector<1x24x1xf32>
    %356 = vector.shape_cast %355 : vector<1x24x1xf32> to vector<24x1xf32>
    %357 = vector.shape_cast %354 : vector<24x1xf32> to vector<1x24x1xf32>
    tpu.vector_store %arg13[%c0_289, %c0_290, %c0_291], %357 {strides = array<i32>} : memref<1x24x1xf32, #tpu.memory_space<vmem>>, vector<1x24x1xf32>,
    %c0_292 = arith.constant 0 : index
    %c7_293 = arith.constant 7 : index
    %358 = vector.load %arg16[%c0_292, %c7_293] : memref<24x528xf32, #tpu.memory_space<vmem>>, vector<8x514xf32>
    %cst_294 = arith.constant 0.000000e+00 : f32
    %359 = vector.broadcast %cst_294 : f32 to vector<8x512xf32>
    %360 = vector.extract_strided_slice %344 {offsets = [0, 0], sizes = [8, 1], strides = [1, 1]} : vector<24x1xf32> to vector<8x1xf32>
    %361 = vector.extract_strided_slice %358 {offsets = [0, 0], sizes = [8, 512], strides = [1, 1]} : vector<8x514xf32> to vector<8x512xf32>
    %362 = vector.broadcast %360 : vector<8x1xf32> to vector<8x512xf32>
    %363 = arith.mulf %362, %361 : vector<8x512xf32>
    %364 = arith.addf %359, %363 : vector<8x512xf32>
    %365 = vector.extract_strided_slice %344 {offsets = [8, 0], sizes = [8, 1], strides = [1, 1]} : vector<24x1xf32> to vector<8x1xf32>
    %366 = vector.extract_strided_slice %358 {offsets = [0, 1], sizes = [8, 512], strides = [1, 1]} : vector<8x514xf32> to vector<8x512xf32>
    %367 = vector.broadcast %365 : vector<8x1xf32> to vector<8x512xf32>
    %368 = arith.mulf %367, %366 : vector<8x512xf32>
    %369 = arith.addf %364, %368 : vector<8x512xf32>
    %370 = vector.extract_strided_slice %344 {offsets = [16, 0], sizes = [8, 1], strides = [1, 1]} : vector<24x1xf32> to vector<8x1xf32>
    %371 = vector.extract_strided_slice %358 {offsets = [0, 2], sizes = [8, 512], strides = [1, 1]} : vector<8x514xf32> to vector<8x512xf32>
    %372 = vector.broadcast %370 : vector<8x1xf32> to vector<8x512xf32>
    %373 = arith.mulf %372, %371 : vector<8x512xf32>
    %374 = arith.addf %369, %373 : vector<8x512xf32>
    %cst_295 = arith.constant dense<0.000000e+00> : vector<512xf32>
    %375 = vector.multi_reduction <add>, %374, %cst_295 [0] : vector<8x512xf32> to vector<512xf32>
    %376 = vector.shape_cast %375 : vector<512xf32> to vector<1x512xf32>
    %c0_296 = arith.constant 0 : index
    %c0_297 = arith.constant 0 : index
    %c0_298 = arith.constant 0 : index
    %377 = vector.load %arg14[%c0_296, %c0_297, %c0_298] : memref<1x1x512xf32, #tpu.memory_space<vmem>>, vector<1x1x512xf32>
    %378 = vector.shape_cast %377 : vector<1x1x512xf32> to vector<1x512xf32>
    %379 = vector.shape_cast %376 : vector<1x512xf32> to vector<1x1x512xf32>
    tpu.vector_store %arg14[%c0_296, %c0_297, %c0_298], %379 {strides = array<i32>} : memref<1x1x512xf32, #tpu.memory_space<vmem>>, vector<1x1x512xf32>,
    return
  }
  func.func @transform_0(%arg0: i32) -> (i32, i32, i32) {
    %c0_i32 = arith.constant 0 : i32
    %c0_i32_0 = arith.constant 0 : i32
    %c0_i32_1 = arith.constant 0 : i32
    return %arg0, %c0_i32, %c0_i32_0 : i32, i32, i32
  }
  func.func @transform_1(%arg0: i32) -> (i32, i32, i32) {
    %c0_i32 = arith.constant 0 : i32
    %c0_i32_0 = arith.constant 0 : i32
    %c0_i32_1 = arith.constant 0 : i32
    return %arg0, %c0_i32, %c0_i32_0 : i32, i32, i32
  }
  func.func @transform_2(%arg0: i32) -> (i32, i32) {
    %c0_i32 = arith.constant 0 : i32
    %c0_i32_0 = arith.constant 0 : i32
    %c0_i32_1 = arith.constant 0 : i32
    return %c0_i32, %c0_i32_0 : i32, i32
  }
  func.func @transform_3(%arg0: i32) -> (i32, i32) {
    %c0_i32 = arith.constant 0 : i32
    %c0_i32_0 = arith.constant 0 : i32
    %c0_i32_1 = arith.constant 0 : i32
    return %c0_i32, %c0_i32_0 : i32, i32
  }
  func.func @transform_4(%arg0: i32) -> (i32, i32) {
    %c0_i32 = arith.constant 0 : i32
    %c0_i32_0 = arith.constant 0 : i32
    %c0_i32_1 = arith.constant 0 : i32
    return %c0_i32, %c0_i32_0 : i32, i32
  }
  func.func @transform_5(%arg0: i32) -> (i32, i32) {
    %c0_i32 = arith.constant 0 : i32
    %c0_i32_0 = arith.constant 0 : i32
    %c0_i32_1 = arith.constant 0 : i32
    return %c0_i32, %c0_i32_0 : i32, i32
  }
  func.func @transform_6(%arg0: i32) -> (i32, i32) {
    %c0_i32 = arith.constant 0 : i32
    %c0_i32_0 = arith.constant 0 : i32
    %c0_i32_1 = arith.constant 0 : i32
    return %c0_i32, %c0_i32_0 : i32, i32
  }
  func.func @transform_7(%arg0: i32) -> (i32, i32) {
    %c0_i32 = arith.constant 0 : i32
    %c0_i32_0 = arith.constant 0 : i32
    %c0_i32_1 = arith.constant 0 : i32
    return %c0_i32, %c0_i32_0 : i32, i32
  }
  func.func @transform_8(%arg0: i32) -> (i32, i32) {
    %c0_i32 = arith.constant 0 : i32
    %c0_i32_0 = arith.constant 0 : i32
    %c0_i32_1 = arith.constant 0 : i32
    return %c0_i32, %c0_i32_0 : i32, i32
  }
  func.func @transform_9(%arg0: i32) -> (i32, i32) {
    %c0_i32 = arith.constant 0 : i32
    %c0_i32_0 = arith.constant 0 : i32
    %c0_i32_1 = arith.constant 0 : i32
    return %c0_i32, %c0_i32_0 : i32, i32
  }
  func.func @transform_10(%arg0: i32) -> (i32, i32) {
    %c0_i32 = arith.constant 0 : i32
    %c0_i32_0 = arith.constant 0 : i32
    %c0_i32_1 = arith.constant 0 : i32
    return %c0_i32, %c0_i32_0 : i32, i32
  }
  func.func @transform_11(%arg0: i32) -> (i32, i32, i32) {
    %c0_i32 = arith.constant 0 : i32
    %c0_i32_0 = arith.constant 0 : i32
    %c0_i32_1 = arith.constant 0 : i32
    return %arg0, %c0_i32, %c0_i32_0 : i32, i32, i32
  }
  func.func @transform_12(%arg0: i32) -> (i32, i32, i32) {
    %c0_i32 = arith.constant 0 : i32
    %c0_i32_0 = arith.constant 0 : i32
    %c0_i32_1 = arith.constant 0 : i32
    return %arg0, %c0_i32, %c0_i32_0 : i32, i32, i32
  }
  func.func @transform_13(%arg0: i32) -> (i32, i32, i32) {
    %c0_i32 = arith.constant 0 : i32
    %c0_i32_0 = arith.constant 0 : i32
    %c0_i32_1 = arith.constant 0 : i32
    return %arg0, %c0_i32, %c0_i32_0 : i32, i32, i32
  }
}

</mosaic_0001>

<bundles_post_ra>
// kernel: base_model_forward.1
= control target key start
LH: loop header
LB: loop body
LE: loop exit
PB: predicated region body
PF: predicated region fallthrough
CT: control target
= control target key end

     0   :  { %s8099_s0 = inlined_call_operand.vmem [shape: f32[2,4,512], index: 0, kind: input, shape index: {}]   ;;  %s8100_s1 = inlined_call_operand.vmem [shape: f32[2,24,1], index: 1, kind: input, shape index: {}]   ;;  %s8101_s2 = inlined_call_operand.vmem [shape: f32[8,13], index: 2, kind: input, shape index: {}]   ;;  %s8102_s3 = inlined_call_operand.vmem [shape: f32[4,172], index: 3, kind: input, shape index: {}]   ;;  %s8103_s4 = inlined_call_operand.vmem [shape: f32[8,25], index: 4, kind: input, shape index: {}]   ;;  %s8104_s5 = inlined_call_operand.vmem [shape: f32[16,131], index: 5, kind: input, shape index: {}]   ;;  %s8105_s6 = inlined_call_operand.vmem [shape: f32[520,65], index: 6, kind: input, shape index: {}]   ;;  %s8106_s7 = inlined_call_operand.vmem [shape: f32[8,340], index: 7, kind: input, shape index: {}]   ;;  %s8107_s8 = inlined_call_operand.vmem [shape: f32[16,49], index: 8, kind: input, shape index: {}]   ;;  %s8108_s9 = inlined_call_operand.vmem [shape: f32[48,259], index: 9, kind: input, shape index: {}]   ;;  %s8109_s10 = inlined_call_operand.vmem [shape: f32[72,9], index: 10, kind: input, shape index: {}]   ;;  %s8110_s11 = inlined_call_operand.vmem [shape: f32[2,48,1], index: 11, kind: output, shape index: {0}]   ;;  %s8111_s12 = inlined_call_operand.vmem [shape: f32[2,24,1], index: 12, kind: output, shape index: {1}]   ;;  %s8112_s13 = inlined_call_operand.hbm [shape: f32[2,1,512], index: 13, kind: output, shape index: {2}]  }
   0x1   :  { %8157 = sst [smem:[#allocation19_spill]] %s8099_s0 }
   0x2   :  { %8158 = sst [smem:[#allocation20_spill]] %s8100_s1 }
   0x3   :  { %8159 = sst [smem:[#allocation21_spill]] %s8101_s2 }
   0x4   :  { %8160 = sst [smem:[#allocation22_spill]] %s8102_s3 }
   0x5   :  { %8161 = sst [smem:[#allocation23_spill]] %s8103_s4 }
   0x6   :  { %8162 = sst [smem:[#allocation24_spill]] %s8111_s12 }
   0x7   :  { %8163 = sst [smem:[#allocation25_spill]] %s8112_s13 }
   0x8   :  { %19 = vsyncpa [#allocation8], 0 }
   0x9   :  { %21 = vsyncpa [#allocation8 + $0x1], 0  ;;  %s6448_s25 = smov 0   ;;  %s6450_s26 = smov 0  }
   0xa   :  { %s6452_s27 = smov 0   ;;  %s6454_s28 = smov 0  }
   0xb LB: > { %8164 = sst [smem:[#allocation10_spill]] %s6311_s25  ;;  %s6469_s29 = sadd.s32 4294967295, %s6323_s28   ;;  %s6323_s28 = sphi %s6454_s28, %s8208_s28   ;;  %s6319_s27 = sphi %s6452_s27, %s8211_s27   ;;  %s6315_s26 = sphi %s6450_s26, %s8210_s26   ;;  %s6311_s25 = sphi %s6448_s25, %s8209_s25  }
   0xc   : > { %8165 = sst [smem:[#allocation11_spill]] %s6315_s26  ;;  %s5533_s30 = sadd.s32 4294967294, %s6323_s28  }
   0xd   : > { %8166 = sst [smem:[#allocation12_spill]] %s6319_s27  ;;  %s6473_s14 = sadd.s32 1, %s6323_s28  }
   0xe   : > { %8167 = sst [smem:[#allocation13_spill]] %s6323_s28  ;;  %s327_s15 = sadd.s32 1, %s6319_s27 }
   0xf   : > { %8168 = sst [smem:[#allocation14_spill]] %s6469_s29  ;;  %s324_s16 = ssub.s32 %s6323_s28, %s6473_s14 }
  0x10   : > { %8169 = sst [smem:[#allocation15_spill]] %s6473_s14  ;;  %p337_p0 = scmp.ne.s32.totalorder %s6319_s27, %s6315_s26 }
  0x11   : > { %p325_p1 = scmp.eq.s32.totalorder %s324_s16, 0  ;;  %p338_p2 = scmp.eq.s32.totalorder %s6469_s29, 1 }
  0x12   : > { %p343_p3 = scmp.ne.s32.totalorder %s6315_s26, %s6311_s25  ;;  %p344_p4 = scmp.eq.s32.totalorder %s5533_s30, 1 }
  0x13   : > { %s6484_s17 = scalar_select %p325_p1, %s6319_s27, %s327_s15  }
  0x14   : > { %p6486_p5 = por %p338_p2, %p337_p0  ;;  %p6490_p6 = por %p344_p4, %p343_p3 }
  0x15   : > { %8170 = sst [smem:[#allocation16_spill]] %s6484_s17  ;;  %p5536_p7 = scmp.ge.s32.totalorder %s6323_s28, 1 }
  0x16   : > { %s8171_s18 = scalar_select %p6486_p5, 1, 0 }
  0x17   : > { %s8173_s19 = scalar_select %p6490_p6, 1, 0 }
  0x18   : > { %8172 = sst [smem:[#allocation17_spill]] %s8171_s18  ;;  %p405_p8 = scmp.lt.s32.totalorder %s6323_s28, 3 }
  0x19   : > { %8174 = sst [smem:[#allocation18_spill]] %s8173_s19 }
  0x1a   : > { %p406_p9 = pnand %p5536_p7, %p405_p8 }
  0x1b   : > { %p464_p10 = scmp.lt.s32.totalorder (!%p406_p9), %s6469_s29, 1  ;;  %s8175_s0 = sld [smem:[#allocation19_spill]] (!%p406_p9) }
  0x1c   : > { %409 = sbr.rel (%p406_p9) target bundleno = 6859 (0x1acb), region = 64  ;;  %s8120_s30 = smov (!%p406_p9), 8  }
  0x1d   : > { %s8176_s2 = sld [smem:[#allocation21_spill]] (!%p406_p9)  ;;  %s8128_s22 = smov (!%p406_p9), 120  }
  0x1e   : > { %s8115_s23 = smov (!%p406_p9), 121   ;;  %s8177_s3 = sld [smem:[#allocation22_spill]] (!%p406_p9) }
  0x1f   : > { %s6335_s15 = smov (!%p406_p9), 92   ;;  %s8122_s16 = smov (!%p406_p9), 122  }
  0x20   : > { %s8182_s17 = smov (!%p406_p9), 120   ;;  %s8184_s4 = sld [smem:[#allocation23_spill]] (!%p406_p9) }
  0x21   : > { %vm484_vm0 = vcmask 60416   ;;  %v6325_v0 = vmov 0.0   ;;  %vm498_vm1 = vcmask 64512   ;;  %s6500_s20 = scalar_select %p464_p10, %s6469_s29, 1  ;;  %vm486_vm2 = vcmask 126016  }
  0x22   : > { %485 = vst.msk [vmem:[#allocation2] sm:$0xf] %vm484_vm0, %v6325_v0  ;;  %vm506_vm3 = vcmask 1043520   ;;  %vm507_vm4 = vcmask 1047556   ;;  %vm500_vm6 = vcmask 1043456   ;;  %vm542_vm7 = vcmask 982016  }
  0x23   : > { %892 = vst.msk [vmem:[#allocation3] sm:$0xff] %vm498_vm1, %v6325_v0  ;;  %s5692_s21 = sshll.u32 %s6500_s20, 4  ;;  %v6594_v3 = vld [vmem:[%s8176_s2] sm:$0xff]  ;;  %vm508_vm5 = vmor %vm507_vm4, %vm506_vm3  ;;  %vm547_vm8 = vcmask 31744   ;;  %vm658_vm9 = vcmask 990208   ;;  %v6331_v40 = vmov 12  }
  0x24   : > { %893 = vst.msk [vmem:[#allocation3 + $0x28] sm:$0xff] %vm498_vm1, %v6325_v0  ;;  %s468_s24 = scalar_lea.vmem %s8175_s0, %s5692_s21  ;;  %s8113_s21 = smov 124   ;;  %5803 = vset.pattern.permute.xlu1 %v6331_v40  ;;  %vm783_vm10 = vcmask 973824   ;;  %vm895_vm11 = vcmask 130112   ;;  %vm919_vm12 = vcmask 1047616   ;;  %vm1382_vm4 = vcmask 97280  }
  0x25   : > { %894 = vst.msk [vmem:[#allocation3 + $0x50] sm:$0xff] %vm498_vm1, %v6325_v0  ;;  %v488_v1 = vld [vmem:[%s468_s24] sm:$0xff]  ;;  %v489_v2 = vld [vmem:[%s468_s24 + $0x8] sm:$0xff]  ;;  %517 = vrot.lane.b32.xlu2 %v6594_v3, %s8113_s21  ;;  %s8117_s24 = smov 119   ;;  %s8118_s21 = smov 112  }
  0x26   : > { %2992 = vst.msk [vmem:[#allocation4] sm:$0xff] %vm498_vm1, %v6325_v0  ;;  %492 = vrot.lane.b32.xlu0 %v488_v1, %s8120_s30  ;;  %s6341_s0 = smov 52   ;;  %s8132_s2 = smov 7  }
  0x27   : > { %2993 = vst.msk [vmem:[#allocation4 + $0x28] sm:$0xff] %vm498_vm1, %v6325_v0  ;;  %s8149_s27 = smov 1   ;;  %s8185_s25 = smov 6  }
  0x28   : > { %2994 = vst.msk [vmem:[#allocation4 + $0x50] sm:$0xff] %vm498_vm1, %v6325_v0  ;;  %s8187_s28 = smov 3   ;;  %s8190_s13 = smov 1  }
  0x29   : > { %2995 = vst.msk [vmem:[#allocation4 + $0x78] sm:$0xff] %vm498_vm1, %v6325_v0  ;;  %s6358_s12 = smov 64   ;;  %s8192_s14 = smov 119  }
  0x2a   : > { %2996 = vst.msk [vmem:[#allocation4 + $0xa0] sm:$0xff] %vm498_vm1, %v6325_v0  ;;  %s6367_s26 = smov 56   ;;  %s8194_s29 = smov 80  }
  0x2b   : > { %2997 = vst.msk [vmem:[#allocation4 + $0xc8] sm:$0xff] %vm498_vm1, %v6325_v0  ;;  %s6368_s19 = smov 32   ;;  %s6370_s18 = smov 72  }
  0x2c   : > { %2998 = vst.msk [vmem:[#allocation4 + $0xf0] sm:$0xff] %vm498_vm1, %v6325_v0 }
  0x2d   : > { %2999 = vst.msk [vmem:[#allocation4 + $0x118] sm:$0xff] %vm498_vm1, %v6325_v0 }
  0x2e   : > { %3000 = vst.msk [vmem:[#allocation4 + $0x20] sm:$0xff] %vm498_vm1, %v6325_v0  ;;  %494 = vrot.lane.b32.xlu0 %v489_v2, %s8120_s30 }
  0x2f   : > { %3001 = vst.msk [vmem:[#allocation4 + $0x48] sm:$0xff] %vm498_vm1, %v6325_v0 }
  0x30   : > { %3002 = vst.msk [vmem:[#allocation4 + $0x70] sm:$0xff] %vm498_vm1, %v6325_v0 }
  0x31   : > { %3003 = vst.msk [vmem:[#allocation4 + $0x98] sm:$0xff] %vm498_vm1, %v6325_v0 }
  0x32   : > { %3004 = vst.msk [vmem:[#allocation4 + $0xc0] sm:$0xff] %vm498_vm1, %v6325_v0 }
  0x33   : > { %3005 = vst.msk [vmem:[#allocation4 + $0xe8] sm:$0xff] %vm498_vm1, %v6325_v0 }
  0x34   : > { %3006 = vst.msk [vmem:[#allocation4 + $0x110] sm:$0xff] %vm498_vm1, %v6325_v0 }
  0x35   : > { %3007 = vst.msk [vmem:[#allocation4 + $0x138] sm:$0xff] %vm498_vm1, %v6325_v0 }
  0x36   : > { %3752 = vst.msk [vmem:[#allocation5] sm:$0xff] %vm498_vm1, %v6325_v0 }
  0x37   : > { %3753 = vst.msk [vmem:[#allocation5 + $0x8] sm:$0xff] %vm498_vm1, %v6325_v0 }
  0x38   : > { %3754 = vst.msk [vmem:[#allocation5 + $0x10] sm:$0xff] %vm498_vm1, %v6325_v0 }
  0x39   : > { %3755 = vst.msk [vmem:[#allocation5 + $0x18] sm:$0xff] %vm498_vm1, %v6325_v0 }
  0x3a   : > { %3756 = vst.msk [vmem:[#allocation5 + $0x20] sm:$0xff] %vm498_vm1, %v6325_v0 }
  0x3b   : > { %3757 = vst.msk [vmem:[#allocation5 + $0x28] sm:$0xff] %vm498_vm1, %v6325_v0 }
  0x3c   : > { %4348 = vst.msk [vmem:[#allocation6] sm:$0xff] %vm498_vm1, %v6325_v0 }
  0x3d   : > { %4349 = vst.msk [vmem:[#allocation6 + $0x8] sm:$0xff] %vm498_vm1, %v6325_v0 }
  0x3e   : > { %4350 = vst.msk [vmem:[#allocation6 + $0x10] sm:$0xff] %vm498_vm1, %v6325_v0 }
  0x3f   : > { %4351 = vst.msk [vmem:[#allocation6 + $0x18] sm:$0xff] %vm498_vm1, %v6325_v0 }
  0x40   : > { %4352 = vst.msk [vmem:[#allocation6 + $0x20] sm:$0xff] %vm498_vm1, %v6325_v0 }
  0x41   : > { %4353 = vst.msk [vmem:[#allocation6 + $0x28] sm:$0xff] %vm498_vm1, %v6325_v0 }
  0x42   : > { %4354 = vst.msk [vmem:[#allocation6 + $0x30] sm:$0xff] %vm498_vm1, %v6325_v0 }
  0x43   : > { %4355 = vst.msk [vmem:[#allocation6 + $0x38] sm:$0xff] %vm498_vm1, %v6325_v0 }
  0x44   : > { %4356 = vst.msk [vmem:[#allocation6 + $0x40] sm:$0xff] %vm498_vm1, %v6325_v0 }
  0x45   : > { %4357 = vst.msk [vmem:[#allocation6 + $0x48] sm:$0xff] %vm498_vm1, %v6325_v0 }
  0x46   : > { %4358 = vst.msk [vmem:[#allocation6 + $0x50] sm:$0xff] %vm498_vm1, %v6325_v0 }
  0x47   : > { %4359 = vst.msk [vmem:[#allocation6 + $0x58] sm:$0xff] %vm498_vm1, %v6325_v0 }
  0x48   : > { %4360 = vst.msk [vmem:[#allocation6 + $0x60] sm:$0xff] %vm498_vm1, %v6325_v0 }
  0x49   : > { %4361 = vst.msk [vmem:[#allocation6 + $0x68] sm:$0xff] %vm498_vm1, %v6325_v0 }
  0x4a   : > { %4362 = vst.msk [vmem:[#allocation6 + $0x70] sm:$0xff] %vm498_vm1, %v6325_v0 }
  0x4b   : > { %4363 = vst.msk [vmem:[#allocation6 + $0x78] sm:$0xff] %vm498_vm1, %v6325_v0 }
  0x4c   : > { %487 = vst.msk [vmem:[#allocation2 + $0x10] sm:$0xf] %vm486_vm2, %v6325_v0 }
  0x4d   : > { %896 = vst.msk [vmem:[#allocation3 + $0x20] sm:$0xff] %vm895_vm11, %v6325_v0 }
  0x4e   : > { %897 = vst.msk [vmem:[#allocation3 + $0x48] sm:$0xff] %vm895_vm11, %v6325_v0 }
  0x4f   : > { %898 = vst.msk [vmem:[#allocation3 + $0x70] sm:$0xff] %vm895_vm11, %v6325_v0 }
  0x7f   : > { %v518_v29 = vpop.permute.xlu2 %517 }
  0x98   : > { %v493_v4 = vpop.permute.xlu0 %492 }
  0x99   : > { %v496_v5 = vrot.slane %v493_v4, 4 }
  0x9b   : > { %v499_v6 = vsel %vm498_vm1, %v496_v5, %v493_v4 }
  0x9c   : > { %509 = vst.msk [vmem:[#allocation2] sm:$0xff] %vm508_vm5, %v499_v6  ;;  %vm1497_vm5 = vcmask 998400  }
  0xa0   : > { %v495_v7 = vpop.permute.xlu0 %494 }
  0xa1   : > { %v497_v8 = vrot.slane %v495_v7, 4 }
  0xa3   : > { %v513_v9 = vld [vmem:[#allocation2] sm:$0xff]  ;;  %v501_v10 = vsel %vm500_vm6, %v496_v5, %v497_v8  ;;  %511 = vst.msk [vmem:[#allocation2 + $0x10] sm:$0xf] %vm484_vm0, %v497_v8 }
  0xa4   : > { %522 = vst [vmem:[#allocation1] ss:$2 sm:$0xff] %v513_v9  ;;  %v502_v11 = vsel %vm498_vm1, %v501_v10, %v495_v7 }
  0xa5   : > { %524 = vst [vmem:[#allocation1 + $0x10] ss:$2 sm:$0xff] %v502_v11 }
  0xaa   : > { %v515_v12 = vld [vmem:[#allocation2 + $0x10] sm:$0xf] }
  0xab   : > { %v527_v13 = vld.sshfl [vmem:[#allocation1] sm:$0xff pattern:$0x75316420]  ;;  %v528_v14 = vld.sshfl [vmem:[#allocation1 + $0x8] sm:$0xff pattern:$0x75316420] }
  0xac   : > { %638 = vst [vmem:[#allocation1] ss:$2 sm:$0xff] %v513_v9  ;;  %534 = vrot.lane.b32.xlu0 %v528_v14, %s8128_s22  ;;  %532 = vrot.lane.b32.xlu2 %v527_v13, %s8128_s22  ;;  %v529_v15 = vld.sshfl [vmem:[#allocation1 + $0x10] sm:$0xff pattern:$0x75316420] }
  0xad   : > { %526 = vst [vmem:[#allocation1 + $0x20] ss:$2 sm:$0xff] %v515_v12  ;;  %v530_v16 = vld.sshfl [vmem:[#allocation1 + $0x18] sm:$0xff pattern:$0x75316420] }
  0xae   : > { %640 = vst [vmem:[#allocation1 + $0x10] ss:$2 sm:$0xff] %v502_v11  ;;  %v756_v23 = vld [vmem:[#allocation2 + $0x10] sm:$0xf] }
  0xb3   : > { %v643_v17 = vld.sshfl [vmem:[#allocation1] sm:$0xff pattern:$0x75316420]  ;;  %v644_v18 = vld.sshfl [vmem:[#allocation1 + $0x8] sm:$0xff pattern:$0x75316420] }
  0xb4   : > { %763 = vst [vmem:[#allocation1] ss:$2 sm:$0xff] %v513_v9  ;;  %v531_v19 = vld.sshfl [vmem:[#allocation1 + $0x20] sm:$0xff pattern:$0x75316420]  ;;  %650 = vrot.lane.b32.xlu2 %v644_v18, %s8115_s23 }
  0xb5   : > { %540 = vrot.lane.b32.xlu1 %v531_v19, %s8128_s22  ;;  %642 = vst [vmem:[#allocation1 + $0x20] ss:$2 sm:$0xff] %v515_v12  ;;  %v646_v20 = vld.sshfl [vmem:[#allocation1 + $0x18] sm:$0xff pattern:$0x75316420] }
  0xb6   : > { %v645_v21 = vld.sshfl [vmem:[#allocation1 + $0x10] sm:$0xff pattern:$0x75316420] }
  0xb7   : > { %765 = vst [vmem:[#allocation1 + $0x10] ss:$2 sm:$0xff] %v502_v11 }
  0xbb   : > { %v769_v26 = vld.sshfl [vmem:[#allocation1 + $0x8] sm:$0xff pattern:$0x75316420]  ;;  %v768_v28 = vld.sshfl [vmem:[#allocation1] sm:$0xff pattern:$0x75316420] }
  0xbc   : > { %v647_v22 = vld.sshfl [vmem:[#allocation1 + $0x20] sm:$0xff pattern:$0x75316420]  ;;  %654 = vrot.lane.b32.xlu2 %v646_v20, %s8115_s23 }
  0xbd   : > { %656 = vrot.lane.b32.xlu0 %v647_v22, %s8115_s23  ;;  %767 = vst [vmem:[#allocation1 + $0x20] ss:$2 sm:$0xff] %v756_v23  ;;  %536 = vrot.lane.b32.xlu1 %v529_v15, %s8128_s22  ;;  %v1141_v23 = vld [vmem:[%s8177_s3] sm:$0xf] }
  0xbe   : > { %v770_v25 = vld.sshfl [vmem:[#allocation1 + $0x10] sm:$0xff pattern:$0x75316420]  ;;  %v771_v27 = vld.sshfl [vmem:[#allocation1 + $0x18] sm:$0xff pattern:$0x75316420] }
  0xc4   : > { %v772_v24 = vld.sshfl [vmem:[#allocation1 + $0x20] sm:$0xff pattern:$0x75316420] }
  0xc5   : > { %538 = vrot.lane.b32.xlu1 %v530_v16, %s8128_s22  ;;  %781 = vrot.lane.b32.xlu2 %v772_v24, %s8117_s24 }
  0xc6   : > { %777 = vrot.lane.b32.xlu0 %v770_v25, %s8117_s24 }
  0xcd   : > { %652 = vrot.lane.b32.xlu1 %v645_v21, %s8115_s23  ;;  %775 = vrot.lane.b32.xlu2 %v769_v26, %s8117_s24  ;;  %v6668_v21 = vld [vmem:[%s8177_s3] sm:$0xf] }
  0xce   : > { %758 = vrot.lane.b32.xlu0 %v6594_v3, %s8128_s22  ;;  %932 = vst [vmem:[#allocation1] ss:$2 sm:$0xff] %v6668_v21 }
  0xd5   : > { %779 = vrot.lane.b32.xlu1 %v771_v27, %s8117_s24  ;;  %v933_v22 = vld.sshfl [vmem:[#allocation1] sm:$0xff pattern:$0x75316420] }
  0xd6   : > { %773 = vrot.lane.b32.xlu0 %v768_v28, %s8117_s24  ;;  %1148 = vst [vmem:[#allocation1] ss:$2 sm:$0xff] %v1141_v23 }
  0xdd   : > { %648 = vrot.lane.b32.xlu1 %v643_v17, %s8115_s23  ;;  %s8178_s23 = smov 121  }
  0xe5   : > { %885 = vperm.xlu1 %5803, %v6594_v3  }
 0x106   : > { %v533_v30 = vpop.permute.xlu2 %532 }
 0x10e   : > { %v651_v33 = vpop.permute.xlu2 %650 }
 0x116   : > { %v655_v35 = vpop.permute.xlu2 %654 }
 0x11e   : > { %v535_v31 = vpop.permute.xlu0 %534 }
 0x11f   : > { %v543_v32 = vsel %vm542_vm7, %v533_v30, %v535_v31  ;;  %v782_v41 = vpop.permute.xlu2 %781 }
 0x120   : > { %5543 = vmatpush.msk.msra.mxu0 %vm500_vm6, %v543_v32 }
 0x121   : > { %5544 = vmatmul.msk.f32.vlgmr.msra.gmra.mxu0 %vm547_vm8, %v518_v29 }
 0x127   : > { %v541_v34 = vpop.permute.xlu1 %540  ;;  %v776_v49 = vpop.permute.xlu2 %775 }
 0x12f   : > { %v537_v36 = vpop.permute.xlu1 %536  ;;  %v657_v37 = vpop.permute.xlu0 %656 }
 0x130   : > { %v544_v38 = vsel %vm542_vm7, %v535_v31, %v537_v36  ;;  %v662_v39 = vsel %vm658_vm9, %v655_v35, %v657_v37  ;;  %v1261_v37 = vld [vmem:[%s8177_s3 + $0x4] sm:$0xf] }
 0x131   : > { %5545 = vmatpush.msk.msra.mxu1 %vm500_vm6, %v544_v38  ;;  %5557 = vmatpush.msk.msra.mxu3 %vm500_vm6, %v662_v39 }
 0x132   : > { %5546 = vmatmul.msk.f32.vlgmr.msra.gmra.mxu1 %vm547_vm8, %v518_v29  ;;  %5558 = vmatmul.msk.f32.vlgmr.msra.gmra.mxu3 %vm547_vm8, %v6594_v3 }
 0x137   : > { %v539_v42 = vpop.permute.xlu1 %538 }
 0x138   : > { %v545_v43 = vsel %vm542_vm7, %v537_v36, %v539_v42  ;;  %v546_v44 = vsel %vm542_vm7, %v539_v42, %v541_v34  ;;  %v778_v45 = vpop.permute.xlu0 %777  ;;  %v6333_v34 = vmov 40  }
 0x139   : > { %5547 = vmatpush.msk.msra.mxu2 %vm500_vm6, %v545_v43  ;;  %5549 = vmatpush.msk.msrb.mxu0 %vm500_vm6, %v546_v44  ;;  %v785_v50 = vsel %vm783_vm10, %v776_v49, %v778_v45 }
 0x13a   : > { %5548 = vmatmul.msk.f32.vlgmr.msra.gmra.mxu2 %vm547_vm8, %v518_v29  ;;  %5550 = vmatmul.msk.f32.vlgmr.msrb.gmra.mxu0 %vm547_vm8, %v518_v29  ;;  %v1149_v29 = vld.sshfl [vmem:[#allocation1] sm:$0xff pattern:$0x75316420] }
 0x13b   : > { %5829 = vset.pattern.permute.xlu0 %v6333_v34 }
 0x13f   : > { %v653_v46 = vpop.permute.xlu1 %652 }
 0x140   : > { %v660_v47 = vsel %vm658_vm9, %v651_v33, %v653_v46  ;;  %v661_v48 = vsel %vm658_vm9, %v653_v46, %v655_v35  ;;  %v759_v51 = vpop.permute.xlu0 %758 }
 0x141   : > { %5553 = vmatpush.msk.msrb.mxu1 %vm500_vm6, %v660_v47  ;;  %5555 = vmatpush.msk.msrb.mxu2 %vm500_vm6, %v661_v48 }
 0x142   : > { %5554 = vmatmul.msk.f32.vlgmr.msrb.gmra.mxu1 %vm547_vm8, %v6594_v3  ;;  %5556 = vmatmul.msk.f32.vlgmr.msrb.gmra.mxu2 %vm547_vm8, %v6594_v3 }
 0x143   : > { %5561 = vmatpush.msk.msra.mxu1 %vm500_vm6, %v785_v50 }
 0x147   : > { %v780_v52 = vpop.permute.xlu1 %779 }
 0x148   : > { %v786_v53 = vsel %vm783_vm10, %v778_v45, %v780_v52  ;;  %v787_v54 = vsel %vm783_vm10, %v780_v52, %v782_v41  ;;  %v774_v55 = vpop.permute.xlu0 %773 }
 0x149   : > { %5563 = vmatpush.msk.msra.mxu2 %vm500_vm6, %v786_v53  ;;  %5565 = vmatpush.msk.msrb.mxu3 %vm500_vm6, %v787_v54  ;;  %v784_v58 = vsel %vm783_vm10, %v774_v55, %v776_v49 }
 0x14a   : > { %5562 = vmatmul.msk.f32.vlgmr.msra.gmra.mxu1 %vm547_vm8, %v759_v51  ;;  %5564 = vmatmul.msk.f32.vlgmr.msra.gmra.mxu2 %vm547_vm8, %v759_v51 }
 0x14b   : > { %5566 = vmatmul.msk.f32.vlgmr.msrb.gmra.mxu3 %vm547_vm8, %v759_v51 }
 0x14f   : > { %v649_v56 = vpop.permute.xlu1 %648 }
 0x150   : > { %v659_v57 = vsel %vm658_vm9, %v649_v56, %v651_v33 }
 0x151   : > { %5551 = vmatpush.msk.msra.mxu0 %vm500_vm6, %v659_v57 }
 0x152   : > { %5552 = vmatmul.msk.f32.vlgmr.msra.gmra.mxu0 %vm547_vm8, %v6594_v3 }
 0x153   : > { %5559 = vmatpush.msk.msrb.mxu0 %vm500_vm6, %v784_v58 }
 0x157   : > { %v886_v4 = vpop.permute.xlu1 %885 }
 0x15a   : > { %5560 = vmatmul.msk.f32.vlgmr.msrb.gmra.mxu0 %vm547_vm8, %v759_v51 }
 0x19e   : > { %v575_v61 = vpop.f32.mrf.mxu0 }
 0x1af   : > { %v595_v59 = vpop.f32.mrf.mxu1 }
 0x1b5   : > { %v750_v1 = vpop.f32.mrf.mxu3 }
 0x1b7   : > { %v635_v5 = vpop.f32.mrf.mxu0 }
 0x1b8   : > { %v751_v3 = vadd.f32 %v750_v1, %v635_v5 }
 0x1bd   : > { %v615_v60 = vpop.f32.mrf.mxu2 }
 0x1bf   : > { %v710_v62 = vpop.f32.mrf.mxu1 }
 0x1c0   : > { %v711_v2 = vadd.f32 %v710_v62, %v595_v59 }
 0x1c5   : > { %v730_v63 = vpop.f32.mrf.mxu2 }
 0x1c6   : > { %v731_v9 = vadd.f32 %v730_v63, %v615_v60 }
 0x1c7   : > { %v835_v6 = vpop.f32.mrf.mxu1 }
 0x1c8   : > { %v879_v7 = vadd.f32 %v835_v6, %v711_v2  ;;  %v6334_v6 = vmov 839922192  }
 0x1ca   : > { %v889_v8 = vadd.f32 %v886_v4, %v879_v7  ;;  %v1268_v7 = vunpack.c.l.s4 %v6334_v6 }
 0x1cc   : > { %905 = vrot.lane.b32.xlu2 %v889_v8, %s8120_s30  ;;  %v6754_v8 = vunpack.c.0.s8 %v1268_v7 }
 0x1cd   : > { %v855_v10 = vpop.f32.mrf.mxu2 }
 0x1ce   : > { %v880_v11 = vadd.f32 %v855_v10, %v731_v9  ;;  %v875_v12 = vpop.f32.mrf.mxu3 }
 0x1cf   : > { %v881_v13 = vadd.f32 %v875_v12, %v751_v3  ;;  %v690_v14 = vpop.f32.mrf.mxu0 }
 0x1d0   : > { %v890_v15 = vadd.f32 %v886_v4, %v880_v11  ;;  %v691_v17 = vadd.f32 %v690_v14, %v575_v61 }
 0x1d1   : > { %v891_v16 = vadd.f32 %v886_v4, %v881_v13 }
 0x1d2   : > { %907 = vrot.lane.b32.xlu0 %v890_v15, %s8120_s30 }
 0x1d3   : > { %909 = vrot.lane.b32.xlu1 %v891_v16, %s8120_s30 }
 0x1d7   : > { %v815_v18 = vpop.f32.mrf.mxu0 }
 0x1d8   : > { %v878_v19 = vadd.f32 %v815_v18, %v691_v17  ;;  %v1324_v17 = vld [vmem:[%s8177_s3] sm:$0xf] }
 0x1da   : > { %v888_v20 = vadd.f32 %v886_v4, %v878_v19 }
 0x1dc   : > { %903 = vrot.lane.b32.xlu2 %v888_v20, %s8120_s30 }
 0x1e4   : > { %934 = vrot.lane.b32.xlu2 %v933_v22, %s8128_s22 }
 0x226   : > { %v906_v24 = vpop.permute.xlu2 %905 }
 0x236   : > { %v904_v25 = vpop.permute.xlu2 %903 }
 0x237   : > { %v6679_v26 = vsel %vm498_vm1, %v904_v25, %v906_v24  ;;  %920 = vst.msk [vmem:[#allocation3] sm:$0xff] %vm919_vm12, %v904_v25 }
 0x238   : > { %921 = vst [vmem:[#allocation3 + $0x8] sm:$0xff] %v6679_v26 }
 0x23e   : > { %v6683_v27 = vld [vmem:[#allocation3] sm:$0xff]  ;;  %v935_v38 = vpop.permute.xlu2 %934 }
 0x23f   : > { %941 = vrot.lane.b32.xlu2 %v6683_v27, %s8128_s22 }
 0x244   : > { %v908_v28 = vpop.permute.xlu0 %907 }
 0x245   : > { %v910_v30 = vpop.permute.xlu1 %909  ;;  %v6688_v31 = vsel %vm498_vm1, %v906_v24, %v908_v28 }
 0x246   : > { %924 = vst.msk [vmem:[#allocation3 + $0x20] sm:$0xff] %vm498_vm1, %v910_v30  ;;  %v6692_v32 = vsel %vm498_vm1, %v908_v28, %v910_v30 }
 0x247   : > { %922 = vst [vmem:[#allocation3 + $0x10] sm:$0xff] %v6688_v31  ;;  %1150 = vrot.lane.b32.xlu2 %v1149_v29, %s8118_s21  ;;  %v6698_v33 = vpack.i.bf16 %v6692_v32, %v6688_v31  ;;  %s8126_s21 = smov 118  }
 0x248   : > { %923 = vst [vmem:[#allocation3 + $0x18] sm:$0xff] %v6692_v32 }
 0x249   : > { %5805 = vrot.lane.b32.xlu0 %v6698_v33, %s8128_s22 }
 0x24d   : > { %v6703_v35 = vld [vmem:[#allocation3 + $0x20] sm:$0xff] }
 0x24e   : > { %v6707_v36 = vpack.i.bf16 %v6679_v26, %v6703_v35 }
 0x24f   : > { %1157 = vrot.lane.b32.xlu2 %v6683_v27, %s8117_s24 }
 0x250   : > { %5820 = vrot.lane.b32.xlu1 %v6707_v36, %s8128_s22 }
 0x251   : > { %5810 = vrot.lane.b32.xlu0 %v6698_v33, %s8178_s23 }
 0x258   : > { %5825 = vrot.lane.b32.xlu1 %v6707_v36, %s8178_s23 }
 0x259   : > { %5815 = vrot.lane.b32.xlu0 %v6698_v33, %s8117_s24 }
 0x260   : > { %1165 = vrot.lane.b32.xlu1 %v6703_v35, %s8117_s24 }
 0x261   : > { %1041 = vrot.lane.b32.xlu0 %v6683_v27, %s8178_s23 }
 0x268   : > { %1159 = vrot.lane.b32.xlu1 %v6679_v26, %s8117_s24  ;;  %s8124_s24 = smov 104  }
 0x269   : > { %1264 = vperm.xlu0 %5829, %v1261_v37  }
 0x271   : > { %5831 = vrot.lane.b32.xlu0 %v6698_v33, %s8128_s22 }
 0x299   : > { %v942_v47 = vpop.permute.xlu2 %941 }
 0x2a1   : > { %v1151_v63 = vpop.permute.xlu2 %1150 }
 0x2a9   : > { %v1158_v9 = vpop.permute.xlu2 %1157 }
 0x2bb   : > { %v5806_v39 = vpop.permute.xlu0 %5805 }
 0x2bc   : > { %v5808_v40 = vunpack.i.h.bf16 %v5806_v39  ;;  %v5807_v41 = vunpack.i.l.bf16 %v5806_v39 }
 0x2be   : > { %v953_v42 = vsel %vm542_vm7, %v5807_v41, %v5808_v40 }
 0x2bf   : > { %1016 = vmatpush.msrb.mxu2 %v953_v42 }
 0x2c0   : > { %5569 = vmatmul.msk.f32.vlgmr.msrb.gmra.mxu2 %vm498_vm1, %v935_v38 }
 0x2c2   : > { %v5821_v43 = vpop.permute.xlu1 %5820 }
 0x2c3   : > { %v5823_v44 = vunpack.i.h.bf16 %v5821_v43  ;;  %v5822_v45 = vunpack.i.l.bf16 %v5821_v43  ;;  %v5811_v46 = vpop.permute.xlu0 %5810 }
 0x2c4   : > { %v5813_v48 = vunpack.i.h.bf16 %v5811_v46  ;;  %v5812_v49 = vunpack.i.l.bf16 %v5811_v46 }
 0x2c5   : > { %v951_v50 = vsel %vm542_vm7, %v942_v47, %v5823_v44  ;;  %v952_v51 = vsel %vm542_vm7, %v5823_v44, %v5807_v41  ;;  %v954_v52 = vsel %vm542_vm7, %v5808_v40, %v5822_v45 }
 0x2c6   : > { %976 = vmatpush.msra.mxu0 %v951_v50  ;;  %996 = vmatpush.msrb.mxu1 %v952_v51  ;;  %v1053_v53 = vsel %vm658_vm9, %v5812_v49, %v5813_v48 }
 0x2c7   : > { %1036 = vmatpush.msra.mxu3 %v954_v52  ;;  %5568 = vmatmul.msk.f32.vlgmr.msrb.gmra.mxu1 %vm498_vm1, %v935_v38 }
 0x2c8   : > { %5570 = vmatmul.msk.f32.vlgmr.msra.gmra.mxu3 %vm498_vm1, %v935_v38  ;;  %5567 = vmatmul.msk.f32.vlgmr.msra.gmra.mxu0 %vm498_vm1, %v935_v38 }
 0x2c9   : > { %1116 = vmatpush.msra.mxu2 %v1053_v53 }
 0x2ca   : > { %v5826_v54 = vpop.permute.xlu1 %5825  ;;  %5573 = vmatmul.msk.f32.vlgmr.msra.gmra.mxu2 %vm498_vm1, %v6668_v21 }
 0x2cb   : > { %v5828_v55 = vunpack.i.h.bf16 %v5826_v54  ;;  %v5827_v56 = vunpack.i.l.bf16 %v5826_v54  ;;  %v5816_v57 = vpop.permute.xlu0 %5815 }
 0x2cc   : > { %v5818_v58 = vunpack.i.h.bf16 %v5816_v57  ;;  %v5817_v59 = vunpack.i.l.bf16 %v5816_v57 }
 0x2cd   : > { %v1052_v60 = vsel %vm658_vm9, %v5828_v55, %v5812_v49  ;;  %v1054_v61 = vsel %vm658_vm9, %v5813_v48, %v5827_v56 }
 0x2ce   : > { %1096 = vmatpush.msra.mxu1 %v1052_v60  ;;  %1136 = vmatpush.msrb.mxu3 %v1054_v61  ;;  %v1169_v62 = vsel %vm783_vm10, %v5817_v59, %v5818_v58  ;;  %v1600_v61 = vld [vmem:[%s8177_s3] sm:$0xf] }
 0x2cf   : > { %5572 = vmatmul.msk.f32.vlgmr.msra.gmra.mxu1 %vm498_vm1, %v6668_v21  ;;  %1232 = vmatpush.msrb.mxu2 %v1169_v62 }
 0x2d0   : > { %5574 = vmatmul.msk.f32.vlgmr.msrb.gmra.mxu3 %vm498_vm1, %v6668_v21 }
 0x2d2   : > { %v1166_v1 = vpop.permute.xlu1 %1165  ;;  %5577 = vmatmul.msk.f32.vlgmr.msrb.gmra.mxu2 %vm498_vm1, %v1151_v63 }
 0x2d3   : > { %v1170_v2 = vsel %vm783_vm10, %v5818_v58, %v1166_v1  ;;  %v1042_v4 = vpop.permute.xlu0 %1041 }
 0x2d4   : > { %1252 = vmatpush.msra.mxu3 %v1170_v2  ;;  %v1051_v5 = vsel %vm658_vm9, %v1042_v4, %v5828_v55 }
 0x2d5   : > { %1076 = vmatpush.msrb.mxu0 %v1051_v5 }
 0x2d6   : > { %5571 = vmatmul.msk.f32.vlgmr.msrb.gmra.mxu0 %vm498_vm1, %v6668_v21 }
 0x2d8   : > { %5578 = vmatmul.msk.f32.vlgmr.msra.gmra.mxu3 %vm498_vm1, %v1151_v63 }
 0x2da   : > { %v1160_v3 = vpop.permute.xlu1 %1159 }
 0x2db   : > { %v1168_v10 = vsel %vm783_vm10, %v1160_v3, %v5817_v59  ;;  %v1167_v11 = vsel %vm783_vm10, %v1158_v9, %v1160_v3  ;;  %v1265_v12 = vpop.permute.xlu0 %1264  ;;  %vm1646_vm10 = vcmask 965632  }
 0x2dc   : > { %1212 = vmatpush.msrb.mxu1 %v1168_v10  ;;  %1192 = vmatpush.msra.mxu0 %v1167_v11  ;;  %v1270_v13 = vperm.slane %v1265_v12, %v6754_v8 }
 0x2dd   : > { %5576 = vmatmul.msk.f32.vlgmr.msrb.gmra.mxu1 %vm498_vm1, %v1151_v63 }
 0x2de   : > { %1272 = vst [vmem:[#allocation1] ss:$2 sm:$0xff] %v1270_v13  ;;  %5575 = vmatmul.msk.f32.vlgmr.msra.gmra.mxu0 %vm498_vm1, %v1151_v63 }
 0x2df   : > { %1274 = vst [vmem:[#allocation1 + $0x10] ss:$2 sm:$0xff] %v1270_v13 }
 0x2e5   : > { %v1276_v15 = vld.sshfl [vmem:[#allocation1 + $0x8] sm:$0xff pattern:$0x75316420]  ;;  %v1275_v16 = vld.sshfl [vmem:[#allocation1] sm:$0xff pattern:$0x75316420] }
 0x2e6   : > { %1336 = vst [vmem:[#allocation1] ss:$2 sm:$0xff] %v1324_v17  ;;  %v1277_v30 = vld.sshfl [vmem:[#allocation1 + $0x10] sm:$0xff pattern:$0x75316420] }
 0x2e7   : > { %v1278_v50 = vld.sshfl [vmem:[#allocation1 + $0x18] sm:$0xff pattern:$0x75316420] }
 0x2ed   : > { %v1337_v21 = vld.sshfl [vmem:[#allocation1] sm:$0xff pattern:$0x75316420] }
 0x2ee   : > { %1473 = vst [vmem:[#allocation1] ss:$2 sm:$0xff] %v1324_v17 }
 0x2f5   : > { %v1474_v59 = vld.sshfl [vmem:[#allocation1] sm:$0xff pattern:$0x75316420] }
 0x2f6   : > { %1612 = vst [vmem:[#allocation1] ss:$2 sm:$0xff] %v1600_v61 }
 0x2fd   : > { %v1613_v62 = vld.sshfl [vmem:[#allocation1] sm:$0xff pattern:$0x75316420] }
 0x343   : > { %v1018_v14 = vpop.f32.mrf.mxu2 }
 0x344   : > { %v998_v18 = vpop.f32.mrf.mxu1 }
 0x345   : > { %v978_v19 = vpop.f32.mrf.mxu0 }
 0x34b   : > { %v1038_v20 = vpop.f32.mrf.mxu3 }
 0x34c   : > { %v1098_v23 = vpop.f32.mrf.mxu1 }
 0x34d   : > { %v1118_v22 = vpop.f32.mrf.mxu2  ;;  %v1099_v38 = vadd.f32 %v1098_v23, %v998_v18 }
 0x34e   : > { %v1119_v24 = vadd.f32 %v1118_v22, %v1018_v14 }
 0x353   : > { %v1138_v25 = vpop.f32.mrf.mxu3  ;;  %v1078_v28 = vpop.f32.mrf.mxu0 }
 0x354   : > { %v1079_v40 = vadd.f32 %v1078_v28, %v978_v19  ;;  %v1139_v42 = vadd.f32 %v1138_v25, %v1038_v20  ;;  %v5832_v20 = vpop.permute.xlu0 %5831 }
 0x355   : > { %v1234_v29 = vpop.f32.mrf.mxu2 }
 0x356   : > { %v1259_v34 = vadd.f32 %v1234_v29, %v1119_v24 }
 0x358   : > { %v1285_v37 = vadd.f32 %v1277_v30, %v1259_v34 }
 0x35a   : > { %v1214_v39 = vpop.f32.mrf.mxu1  ;;  %vm1289_vm13 = vcmp.ge.f32.partialorder %v1285_v37, 0.0  ;;  %v1293_v41 = vmul.f32 0.2, %v1285_v37 }
 0x35b   : > { %v1258_v43 = vadd.f32 %v1214_v39, %v1099_v38  ;;  %v1254_v44 = vpop.f32.mrf.mxu3  ;;  %v1194_v45 = vpop.f32.mrf.mxu0 }
 0x35c   : > { %v1257_v46 = vadd.f32 %v1194_v45, %v1079_v40  ;;  %v1297_v47 = vsel %vm1289_vm13, %v1285_v37, %v1293_v41  ;;  %v1260_v49 = vadd.f32 %v1254_v44, %v1139_v42  ;;  %v5834_v41 = vunpack.i.h.bf16 %v5832_v20  ;;  %v1753_v45 = vld [vmem:[%s8177_s3 + $0x4] sm:$0xf] }
 0x35d   : > { %v1284_v48 = vadd.f32 %v1276_v15, %v1258_v43  ;;  %1307 = vrot.lane.b32.xlu2 %v1297_v47, %s8120_s30  ;;  %v6340_v44 = vmov 41  }
 0x35e   : > { %v1283_v51 = vadd.f32 %v1275_v16, %v1257_v46  ;;  %v1286_v54 = vadd.f32 %v1278_v50, %v1260_v49  ;;  %5855 = vset.pattern.permute.xlu1 %v6340_v44 }
 0x35f   : > { %vm1288_vm14 = vcmp.ge.f32.partialorder %v1284_v48, 0.0  ;;  %v1292_v52 = vmul.f32 0.2, %v1284_v48 }
 0x360   : > { %vm1287_vm15 = vcmp.ge.f32.partialorder %v1283_v51, 0.0  ;;  %v1291_v53 = vmul.f32 0.2, %v1283_v51  ;;  %v1294_v57 = vmul.f32 0.2, %v1286_v54  ;;  %vm1290_vm2 = vcmp.ge.f32.partialorder %v1286_v54, 0.0 }
 0x361   : > { %v1296_v55 = vsel %vm1288_vm14, %v1284_v48, %v1292_v52 }
 0x362   : > { %1305 = vrot.lane.b32.xlu1 %v1296_v55, %s8120_s30  ;;  %v1295_v56 = vsel %vm1287_vm15, %v1283_v51, %v1291_v53  ;;  %v1298_v58 = vsel %vm1290_vm2, %v1286_v54, %v1294_v57  ;;  %v5833_v53 = vunpack.i.l.bf16 %v5832_v20  ;;  %vm1815_vm2 = vcmask 1047620  }
 0x365   : > { %1303 = vrot.lane.b32.xlu2 %v1295_v56, %s8120_s30 }
 0x36a   : > { %1309 = vrot.lane.b32.xlu1 %v1298_v58, %s8120_s30  ;;  %s8179_s30 = smov 122  }
 0x36d   : > { %1338 = vrot.lane.b32.xlu2 %v1337_v21, %s6335_s15  ;;  %s8181_s15 = smov 124  }
 0x372   : > { %5836 = vrot.lane.b32.xlu1 %v6707_v36, %s8128_s22 }
 0x375   : > { %5846 = vrot.lane.b32.xlu2 %v6707_v36, %s8122_s16 }
 0x37a   : > { %5841 = vrot.lane.b32.xlu1 %v6698_v33, %s8122_s16  ;;  %s8125_s16 = smov 80  }
 0x37d   : > { %1350 = vrot.lane.b32.xlu2 %v6683_v27, %s8128_s22 }
 0x382   : > { %1475 = vrot.lane.b32.xlu1 %v1474_v59, %s8124_s24  ;;  %s8180_s24 = smov 8  }
 0x38a   : > { %5851 = vrot.lane.b32.xlu1 %v6698_v33, %s8126_s21 }
 0x392   : > { %1614 = vrot.lane.b32.xlu1 %v1613_v62, %s8125_s16  ;;  %s8130_s16 = smov 116  }
 0x3b7   : > { %v1308_v60 = vpop.permute.xlu2 %1307 }
 0x3bf   : > { %v1304_v36 = vpop.permute.xlu2 %1303 }
 0x3c0   : > { %1319 = vst.msk [vmem:[#allocation3 + $0x28] sm:$0xf] %vm506_vm3, %v1304_v36 }
 0x3c7   : > { %v1330_v63 = vld [vmem:[#allocation3 + $0x28] sm:$0xf]  ;;  %v1339_v16 = vpop.permute.xlu2 %1338 }
 0x3c8   : > { %1360 = vrot.lane.b32.xlu0 %v1330_v63, %s8128_s22  ;;  %v1606_v13 = vld [vmem:[#allocation3 + $0x28] sm:$0xf] }
 0x3cf   : > { %v6813_v18 = vpop.permute.xlu2 %5846 }
 0x3d0   : > { %v5848_v49 = vunpack.i.l.bf16 %v6813_v18  ;;  %v5849_v61 = vunpack.i.h.bf16 %v6813_v18 }
 0x3d4   : > { %v1306_v1 = vpop.permute.xlu1 %1305 }
 0x3d5   : > { %v1311_v2 = vsel %vm498_vm1, %v1304_v36, %v1306_v1  ;;  %v1312_v33 = vsel %vm498_vm1, %v1306_v1, %v1308_v60 }
 0x3d6   : > { %1320 = vst [vmem:[#allocation3 + $0x30] sm:$0xf] %v1311_v2 }
 0x3d7   : > { %1321 = vst [vmem:[#allocation3 + $0x38] sm:$0xf] %v1312_v33  ;;  %v1351_v21 = vpop.permute.xlu2 %1350 }
 0x3dc   : > { %v1310_v4 = vpop.permute.xlu1 %1309 }
 0x3dd   : > { %v1313_v5 = vsel %vm498_vm1, %v1308_v60, %v1310_v4  ;;  %1323 = vst.msk [vmem:[#allocation3 + $0x48] sm:$0xf] %vm484_vm0, %v1310_v4  ;;  %v1331_v6 = vld [vmem:[#allocation3 + $0x30] sm:$0xf]  ;;  %v1372_v60 = vsel %vm542_vm7, %v5833_v53, %v5834_v41 }
 0x3de   : > { %1322 = vst [vmem:[#allocation3 + $0x40] sm:$0xf] %v1313_v5  ;;  %1362 = vrot.lane.b32.xlu0 %v1331_v6, %s8128_s22  ;;  %v1332_v3 = vld [vmem:[#allocation3 + $0x38] sm:$0xf]  ;;  %v1607_v14 = vld [vmem:[#allocation3 + $0x30] sm:$0xf] }
 0x3df   : > { %v1608_v10 = vld [vmem:[#allocation3 + $0x38] sm:$0xf] }
 0x3e4   : > { %v1334_v7 = vld [vmem:[#allocation3 + $0x48] sm:$0xf]  ;;  %v5837_v15 = vpop.permute.xlu1 %5836 }
 0x3e5   : > { %1368 = vrot.lane.b32.xlu2 %v1334_v7, %s8128_s22  ;;  %v1333_v9 = vld [vmem:[#allocation3 + $0x40] sm:$0xf]  ;;  %v1610_v12 = vld [vmem:[#allocation3 + $0x48] sm:$0xf]  ;;  %v5839_v28 = vunpack.i.h.bf16 %v5837_v15  ;;  %v5838_v38 = vunpack.i.l.bf16 %v5837_v15 }
 0x3e6   : > { %1489 = vrot.lane.b32.xlu0 %v1331_v6, %s8179_s30  ;;  %1366 = vrot.lane.b32.xlu1 %v1333_v9, %s8128_s22  ;;  %v1609_v11 = vld [vmem:[#allocation3 + $0x40] sm:$0xf] }
 0x3e7   : > { %v1370_v34 = vsel %vm542_vm7, %v1351_v21, %v5839_v28  ;;  %v1373_v43 = vsel %vm542_vm7, %v5834_v41, %v5838_v38  ;;  %v1371_v59 = vsel %vm542_vm7, %v5839_v28, %v5833_v53 }
 0x3ec   : > { %v6811_v17 = vpop.permute.xlu1 %5841 }
 0x3ed   : > { %1634 = vrot.lane.b32.xlu2 %v6703_v35, %s8126_s21  ;;  %v5844_v46 = vunpack.i.h.bf16 %v6811_v17  ;;  %v5843_v57 = vunpack.i.l.bf16 %v6811_v17 }
 0x3ee   : > { %1495 = vrot.lane.b32.xlu0 %v1334_v7, %s8179_s30  ;;  %1491 = vrot.lane.b32.xlu1 %v1332_v3, %s8179_s30 }
 0x3ef   : > { %v1501_v52 = vsel %vm1497_vm5, %v5844_v46, %v5848_v49  ;;  %v1499_v33 = vsel %vm1497_vm5, %v5849_v61, %v5843_v57  ;;  %v1500_v4 = vsel %vm1497_vm5, %v5843_v57, %v5844_v46 }
 0x3f4   : > { %v6815_v19 = vpop.permute.xlu1 %1475 }
 0x3f5   : > { %1493 = vrot.lane.b32.xlu2 %v1333_v9, %s8179_s30 }
 0x3f6   : > { %1364 = vrot.lane.b32.xlu0 %v1332_v3, %s8128_s22  ;;  %1640 = vrot.lane.b32.xlu1 %v1608_v10, %s8126_s21 }
 0x3fc   : > { %v6817_v22 = vpop.permute.xlu1 %5851 }
 0x3fd   : > { %1642 = vrot.lane.b32.xlu2 %v1609_v11, %s8126_s21  ;;  %v5854_v1 = vunpack.i.h.bf16 %v6817_v22  ;;  %v5853_v2 = vunpack.i.l.bf16 %v6817_v22 }
 0x3fe   : > { %1644 = vrot.lane.b32.xlu0 %v1610_v12, %s8126_s21  ;;  %1628 = vrot.lane.b32.xlu1 %v6679_v26, %s8126_s21 }
 0x3ff   : > { %v1649_v9 = vsel %vm1646_vm10, %v5853_v2, %v5854_v1 }
 0x404   : > { %v6819_v25 = vpop.permute.xlu1 %1614 }
 0x405   : > { %1477 = vrot.lane.b32.xlu2 %v6683_v27, %s8179_s30 }
 0x406   : > { %1487 = vrot.lane.b32.xlu0 %v1330_v63, %s8179_s30  ;;  %1756 = vperm.xlu1 %5855, %v1753_v45  }
 0x40d   : > { %1636 = vrot.lane.b32.xlu2 %v1606_v13, %s8126_s21 }
 0x40e   : > { %1638 = vrot.lane.b32.xlu0 %v1607_v14, %s8126_s21 }
 0x416   : > { %1626 = vrot.lane.b32.xlu0 %v6683_v27, %s8126_s21  ;;  %s6345_s21 = smov 36  }
 0x43a   : > { %v1361_v23 = vpop.permute.xlu0 %1360 }
 0x43f   : > { %v1369_v24 = vpop.permute.xlu2 %1368 }
 0x447   : > { %v1635_v37 = vpop.permute.xlu2 %1634 }
 0x448   : > { %v1650_v3 = vsel %vm1646_vm10, %v5854_v1, %v1635_v37 }
 0x44f   : > { %v1494_v47 = vpop.permute.xlu2 %1493 }
 0x450   : > { %v1363_v29 = vpop.permute.xlu0 %1362 }
 0x451   : > { %v1374_v30 = vsel %vm542_vm7, %v1361_v23, %v1363_v29 }
 0x452   : > { %5579 = vmatpush.msk.msrb.mxu0 %vm500_vm6, %v1374_v30 }
 0x454   : > { %1408 = vmatpush.msrb.mxu0 %v1370_v34 }
 0x455   : > { %5580 = vmatmul.msk.f32.vlgmr.msrb.gmra.mxu0 %vm1382_vm4, %v1339_v16 }
 0x457   : > { %v1643_v58 = vpop.permute.xlu2 %1642 }
 0x458   : > { %v6825_v39 = vpop.permute.xlu0 %1489  ;;  %v1367_v40 = vpop.permute.xlu1 %1366 }
 0x459   : > { %v1377_v42 = vsel %vm542_vm7, %v1367_v40, %v1369_v24 }
 0x45a   : > { %5585 = vmatpush.msk.msrb.mxu3 %vm500_vm6, %v1377_v42 }
 0x45c   : > { %1468 = vmatpush.msrb.mxu3 %v1373_v43 }
 0x45d   : > { %5586 = vmatmul.msk.f32.vlgmr.msrb.gmra.mxu3 %vm1382_vm4, %v1339_v16 }
 0x45f   : > { %v1478_v10 = vpop.permute.xlu2 %1477 }
 0x460   : > { %v1496_v48 = vpop.permute.xlu0 %1495  ;;  %v1492_v51 = vpop.permute.xlu1 %1491  ;;  %v1498_v13 = vsel %vm1497_vm5, %v1478_v10, %v5849_v61 }
 0x461   : > { %v1505_v50 = vsel %vm1497_vm5, %v1494_v47, %v1496_v48  ;;  %v1503_v36 = vsel %vm1497_vm5, %v6825_v39, %v1492_v51  ;;  %v1504_v62 = vsel %vm1497_vm5, %v1492_v51, %v1494_v47 }
 0x462   : > { %5593 = vmatpush.msk.msra.mxu3 %vm500_vm6, %v1505_v50 }
 0x464   : > { %1595 = vmatpush.msra.mxu3 %v1501_v52 }
 0x465   : > { %5594 = vmatmul.msk.f32.vlgmr.msra.gmra.mxu3 %vm1382_vm4, %v6815_v19 }
 0x467   : > { %v1637_v14 = vpop.permute.xlu2 %1636 }
 0x468   : > { %v1365_v54 = vpop.permute.xlu0 %1364  ;;  %v1641_v63 = vpop.permute.xlu1 %1640 }
 0x469   : > { %v1375_v55 = vsel %vm542_vm7, %v1363_v29, %v1365_v54  ;;  %v1376_v56 = vsel %vm542_vm7, %v1365_v54, %v1367_v40  ;;  %v1653_v5 = vsel %vm1646_vm10, %v1641_v63, %v1643_v58 }
 0x46a   : > { %5581 = vmatpush.msk.msra.mxu1 %vm500_vm6, %v1375_v55  ;;  %5583 = vmatpush.msk.msra.mxu2 %vm500_vm6, %v1376_v56 }
 0x46c   : > { %1428 = vmatpush.msra.mxu1 %v1371_v59  ;;  %1448 = vmatpush.msra.mxu2 %v1372_v60 }
 0x46d   : > { %5582 = vmatmul.msk.f32.vlgmr.msra.gmra.mxu1 %vm1382_vm4, %v1339_v16  ;;  %5584 = vmatmul.msk.f32.vlgmr.msra.gmra.mxu2 %vm1382_vm4, %v1339_v16 }
 0x46e   : > { %5589 = vmatpush.msk.msrb.mxu1 %vm500_vm6, %v1503_v36  ;;  %5591 = vmatpush.msk.msrb.mxu2 %vm500_vm6, %v1504_v62 }
 0x470   : > { %1555 = vmatpush.msrb.mxu1 %v1499_v33  ;;  %1575 = vmatpush.msrb.mxu2 %v1500_v4  ;;  %v1645_v6 = vpop.permute.xlu0 %1644  ;;  %v1629_v15 = vpop.permute.xlu1 %1628 }
 0x471   : > { %v1654_v7 = vsel %vm1646_vm10, %v1643_v58, %v1645_v6  ;;  %v1648_v20 = vsel %vm1646_vm10, %v1629_v15, %v5853_v2 }
 0x472   : > { %5599 = vmatpush.msk.msra.mxu2 %vm500_vm6, %v1653_v5  ;;  %5601 = vmatpush.msk.msrb.mxu3 %vm500_vm6, %v1654_v7 }
 0x474   : > { %1724 = vmatpush.msra.mxu2 %v1649_v9  ;;  %1744 = vmatpush.msrb.mxu3 %v1650_v3 }
 0x475   : > { %5590 = vmatmul.msk.f32.vlgmr.msrb.gmra.mxu1 %vm1382_vm4, %v6815_v19  ;;  %5592 = vmatmul.msk.f32.vlgmr.msrb.gmra.mxu2 %vm1382_vm4, %v6815_v19 }
 0x476   : > { %5602 = vmatmul.msk.f32.vlgmr.msrb.gmra.mxu3 %vm1382_vm4, %v6819_v25 }
 0x478   : > { %v1488_v11 = vpop.permute.xlu0 %1487  ;;  %v1757_v22 = vpop.permute.xlu1 %1756 }
 0x479   : > { %v1502_v12 = vsel %vm1497_vm5, %v1488_v11, %v6825_v39  ;;  %v1762_v23 = vperm.slane %v1757_v22, %v6754_v8  ;;  %vm1884_vm5 = vcmask 130048  }
 0x47a   : > { %5587 = vmatpush.msk.msra.mxu0 %vm500_vm6, %v1502_v12 }
 0x47b   : > { %1764 = vst [vmem:[#allocation1] ss:$2 sm:$0xff] %v1762_v23 }
 0x47c   : > { %1535 = vmatpush.msra.mxu0 %v1498_v13  ;;  %1766 = vst [vmem:[#allocation1 + $0x10] ss:$2 sm:$0xff] %v1762_v23 }
 0x47d   : > { %5588 = vmatmul.msk.f32.vlgmr.msra.gmra.mxu0 %vm1382_vm4, %v6815_v19  ;;  %5600 = vmatmul.msk.f32.vlgmr.msra.gmra.mxu2 %vm1382_vm4, %v6819_v25 }
 0x480   : > { %v1639_v16 = vpop.permute.xlu0 %1638 }
 0x481   : > { %v1651_v17 = vsel %vm1646_vm10, %v1637_v14, %v1639_v16  ;;  %v1652_v18 = vsel %vm1646_vm10, %v1639_v16, %v1641_v63  ;;  %v5861_v63 = vpack.i.bf16 %v6703_v35, %v6692_v32  ;;  %v1822_v32 = vld [vmem:[%s8177_s3] sm:$0xf] }
 0x482   : > { %5595 = vmatpush.msk.msrb.mxu0 %vm500_vm6, %v1651_v17  ;;  %5597 = vmatpush.msk.msra.mxu1 %vm500_vm6, %v1652_v18  ;;  %v1768_v55 = vld.sshfl [vmem:[#allocation1 + $0x8] sm:$0xff pattern:$0x75316420]  ;;  %v1767_v2 = vld.sshfl [vmem:[#allocation1] sm:$0xff pattern:$0x75316420] }
 0x483   : > { %v1770_v40 = vld.sshfl [vmem:[#allocation1 + $0x18] sm:$0xff pattern:$0x75316420]  ;;  %v1769_v51 = vld.sshfl [vmem:[#allocation1 + $0x10] sm:$0xff pattern:$0x75316420] }
 0x484   : > { %1704 = vmatpush.msra.mxu1 %v1648_v20  ;;  %1834 = vst [vmem:[#allocation1] ss:$2 sm:$0xff] %v1822_v32  ;;  %v2090_v17 = vld [vmem:[%s8177_s3] sm:$0xf] }
 0x485   : > { %5598 = vmatmul.msk.f32.vlgmr.msra.gmra.mxu1 %vm1382_vm4, %v6819_v25 }
 0x488   : > { %v1627_v19 = vpop.permute.xlu0 %1626 }
 0x489   : > { %v1647_v21 = vsel %vm1646_vm10, %v1627_v19, %v1629_v15  ;;  %vm1991_vm10 = vcmask 1014784  }
 0x48a   : > { %1684 = vmatpush.msrb.mxu0 %v1647_v21  ;;  %v6342_v21 = vmov 42  }
 0x48b   : > { %5596 = vmatmul.msk.f32.vlgmr.msrb.gmra.mxu0 %vm1382_vm4, %v6819_v25  ;;  %v1835_v35 = vld.sshfl [vmem:[#allocation1] sm:$0xff pattern:$0x75316420]  ;;  %vm1820_vm4 = vcmask 64516   ;;  %5931 = vset.pattern.permute.xlu0 %v6342_v21 }
 0x48c   : > { %1967 = vst [vmem:[#allocation1] ss:$2 sm:$0xff] %v1822_v32 }
 0x493   : > { %v1968_v16 = vld.sshfl [vmem:[#allocation1] sm:$0xff pattern:$0x75316420] }
 0x494   : > { %2102 = vst [vmem:[#allocation1] ss:$2 sm:$0xff] %v2090_v17 }
 0x4d2   : > { %v1410_v34 = vpop.f32.mrf.mxu0 }
 0x4e0   : > { %v1470_v24 = vpop.f32.mrf.mxu3 }
 0x4e8   : > { %v1597_v30 = vpop.f32.mrf.mxu3 }
 0x4e9   : > { %v1598_v37 = vadd.f32 %v1597_v30, %v1470_v24 }
 0x4ea   : > { %v1430_v28 = vpop.f32.mrf.mxu1 }
 0x4f0   : > { %v1450_v29 = vpop.f32.mrf.mxu2 }
 0x4f2   : > { %v1557_v41 = vpop.f32.mrf.mxu1 }
 0x4f3   : > { %v1558_v48 = vadd.f32 %v1557_v41, %v1430_v28  ;;  %v2239_v28 = vld [vmem:[%s8177_s3 + $0x4] sm:$0xf] }
 0x4f8   : > { %v1577_v38 = vpop.f32.mrf.mxu2 }
 0x4f9   : > { %v1746_v39 = vpop.f32.mrf.mxu3  ;;  %v1578_v25 = vadd.f32 %v1577_v38, %v1450_v29 }
 0x4fa   : > { %v1752_v42 = vadd.f32 %v1746_v39, %v1598_v37  ;;  %v1537_v45 = vpop.f32.mrf.mxu0 }
 0x4fb   : > { %v1538_v58 = vadd.f32 %v1537_v45, %v1410_v34 }
 0x4fc   : > { %v1778_v43 = vadd.f32 %v1770_v40, %v1752_v42 }
 0x4fe   : > { %v1786_v44 = vmul.f32 0.2, %v1778_v43  ;;  %vm1782_vm11 = vcmp.ge.f32.partialorder %v1778_v43, 0.0 }
 0x500   : > { %v1726_v46 = vpop.f32.mrf.mxu2  ;;  %v1790_v47 = vsel %vm1782_vm11, %v1778_v43, %v1786_v44  ;;  %vm2136_vm11 = vcmask 949248  }
 0x501   : > { %v1751_v49 = vadd.f32 %v1726_v46, %v1578_v25  ;;  %v1798_v50 = vrot.slane %v1790_v47, 4 }
 0x502   : > { %v1706_v52 = vpop.f32.mrf.mxu1 }
 0x503   : > { %v1777_v53 = vadd.f32 %v1769_v51, %v1751_v49  ;;  %v1750_v54 = vadd.f32 %v1706_v52, %v1558_v48  ;;  %1805 = vrot.lane.b32.xlu1 %v1798_v50, %s8180_s24 }
 0x505   : > { %v1785_v56 = vmul.f32 0.2, %v1777_v53  ;;  %v1776_v57 = vadd.f32 %v1768_v55, %v1750_v54  ;;  %vm1781_vm13 = vcmp.ge.f32.partialorder %v1777_v53, 0.0 }
 0x507   : > { %v1784_v59 = vmul.f32 0.2, %v1776_v57  ;;  %v1789_v60 = vsel %vm1781_vm13, %v1777_v53, %v1785_v56  ;;  %vm1780_vm14 = vcmp.ge.f32.partialorder %v1776_v57, 0.0 }
 0x508   : > { %v1686_v61 = vpop.f32.mrf.mxu0  ;;  %v1797_v36 = vrot.slane %v1789_v60, 4 }
 0x509   : > { %v1749_v62 = vadd.f32 %v1686_v61, %v1538_v58  ;;  %v1788_v1 = vsel %vm1780_vm14, %v1776_v57, %v1784_v59 }
 0x50a   : > { %1803 = vrot.lane.b32.xlu0 %v1797_v36, %s8180_s24  ;;  %v1796_v33 = vrot.slane %v1788_v1, 4 }
 0x50b   : > { %v1775_v4 = vadd.f32 %v1767_v2, %v1749_v62  ;;  %5862 = vrot.lane.b32.xlu1 %v5861_v63, %s8181_s15 }
 0x50c   : > { %1801 = vrot.lane.b32.xlu2 %v1796_v33, %s8180_s24 }
 0x50d   : > { %v1783_v5 = vmul.f32 0.2, %v1775_v4  ;;  %vm1779_vm15 = vcmp.ge.f32.partialorder %v1775_v4, 0.0 }
 0x50f   : > { %v1787_v6 = vsel %vm1779_vm15, %v1775_v4, %v1783_v5 }
 0x510   : > { %v1795_v7 = vrot.slane %v1787_v6, 4 }
 0x512   : > { %1836 = vrot.lane.b32.xlu0 %v1835_v35, %s6341_s0  ;;  %s6344_s0 = smov 68  }
 0x514   : > { %1799 = vrot.lane.b32.xlu2 %v1795_v7, %s8180_s24 }
 0x51c   : > { %5857 = vrot.lane.b32.xlu2 %v5861_v63, %s8128_s22 }
 0x566   : > { %v1802_v9 = vpop.permute.xlu2 %1801 }
 0x56e   : > { %v1800_v3 = vpop.permute.xlu2 %1799 }
 0x56f   : > { %v1807_v10 = vsel %vm498_vm1, %v1800_v3, %v1802_v9  ;;  %1816 = vst.msk [vmem:[#allocation3 + $0x28] sm:$0xf0] %vm1815_vm2, %v1800_v3 }
 0x570   : > { %1817 = vst [vmem:[#allocation3 + $0x30] sm:$0xf0] %v1807_v10 }
 0x575   : > { %v1806_v11 = vpop.permute.xlu1 %1805 }
 0x576   : > { %1821 = vst.msk [vmem:[#allocation3 + $0x48] sm:$0xf0] %vm1820_vm4, %v1806_v11  ;;  %v6905_v12 = vld [vmem:[#allocation3 + $0x28] sm:$0xff]  ;;  %v5858_v29 = vpop.permute.xlu2 %5857 }
 0x577   : > { %v5866_v13 = vpack.i.bf16 %v6683_v27, %v6905_v12  ;;  %v6909_v14 = vld [vmem:[#allocation3 + $0x30] sm:$0xff]  ;;  %v5860_v55 = vunpack.i.h.bf16 %v5858_v29  ;;  %v5859_v56 = vunpack.i.l.bf16 %v5858_v29 }
 0x578   : > { %v5871_v15 = vpack.i.bf16 %v6679_v26, %v6909_v14 }
 0x579   : > { %5867 = vrot.lane.b32.xlu2 %v5866_v13, %s8128_s22  ;;  %v1871_v5 = vsel %vm542_vm7, %v5859_v56, %v5860_v55 }
 0x57a   : > { %5872 = vrot.lane.b32.xlu1 %v5871_v15, %s8128_s22 }
 0x57c   : > { %v1804_v18 = vpop.permute.xlu0 %1803 }
 0x57d   : > { %v1808_v20 = vsel %vm498_vm1, %v1802_v9, %v1804_v18  ;;  %v1809_v27 = vsel %vm498_vm1, %v1804_v18, %v1806_v11  ;;  %v6920_v19 = vld [vmem:[#allocation3 + $0x48] sm:$0xff]  ;;  %v6952_v34 = vpop.permute.xlu1 %5862 }
 0x57e   : > { %1818 = vst [vmem:[#allocation3 + $0x38] sm:$0xf0] %v1808_v20  ;;  %v5881_v26 = vpack.i.bf16 %v6688_v31, %v6920_v19  ;;  %v2103_v31 = vld.sshfl [vmem:[#allocation1] sm:$0xff pattern:$0x75316420]  ;;  %v5865_v7 = vunpack.i.h.bf16 %v6952_v34  ;;  %v5864_v32 = vunpack.i.l.bf16 %v6952_v34 }
 0x57f   : > { %1819 = vst [vmem:[#allocation3 + $0x40] sm:$0xf0] %v1809_v27 }
 0x580   : > { %5882 = vrot.lane.b32.xlu0 %v5881_v26, %s8181_s15  ;;  %v1995_v27 = vsel %vm1991_vm10, %v5864_v32, %v5865_v7 }
 0x582   : > { %5877 = vrot.lane.b32.xlu1 %v5881_v26, %s8128_s22 }
 0x584   : > { %v1837_v38 = vpop.permute.xlu0 %1836 }
 0x585   : > { %v6926_v22 = vld [vmem:[#allocation3 + $0x38] sm:$0xff] }
 0x586   : > { %v6928_v23 = vld [vmem:[#allocation3 + $0x40] sm:$0xff] }
 0x587   : > { %v6932_v24 = vpack.i.bf16 %v6928_v23, %v6926_v22 }
 0x589   : > { %5907 = vrot.lane.b32.xlu2 %v6932_v24, %s8181_s15  ;;  %5887 = vrot.lane.b32.xlu0 %v6932_v24, %s8128_s22  ;;  %s8183_s22 = smov 112  }
 0x58a   : > { %5892 = vrot.lane.b32.xlu1 %v5871_v15, %s8181_s15 }
 0x591   : > { %5912 = vrot.lane.b32.xlu2 %v6932_v24, %s8130_s16  ;;  %1969 = vrot.lane.b32.xlu0 %v1968_v16, %s6344_s0  ;;  %s6346_s0 = smov 20  }
 0x592   : > { %5902 = vrot.lane.b32.xlu1 %v5861_v63, %s8130_s16 }
 0x599   : > { %5917 = vrot.lane.b32.xlu2 %v5866_v13, %s8181_s15  ;;  %5897 = vrot.lane.b32.xlu0 %v5881_v26, %s8130_s16 }
 0x59a   : > { %5922 = vrot.lane.b32.xlu1 %v5871_v15, %s8130_s16 }
 0x5a1   : > { %5927 = vrot.lane.b32.xlu2 %v5866_v13, %s8130_s16  ;;  %2104 = vrot.lane.b32.xlu0 %v2103_v31, %s6345_s21  ;;  %s8136_s16 = smov 5   ;;  %s8138_s21 = smov 4  }
 0x5a9   : > { %2242 = vperm.xlu0 %5931, %v2239_v28  }
 0x5b1   : > { %5933 = vrot.lane.b32.xlu0 %v6932_v24, %s8182_s17 }
 0x5b9   : > { %5953 = vrot.lane.b32.xlu0 %v5866_v13, %s8182_s17 }
 0x5d3   : > { %v5868_v30 = vpop.permute.xlu2 %5867 }
 0x5d4   : > { %v5869_v40 = vunpack.i.l.bf16 %v5868_v30  ;;  %v5870_v43 = vunpack.i.h.bf16 %v5868_v30 }
 0x5e3   : > { %v5908_v37 = vpop.permute.xlu2 %5907 }
 0x5e4   : > { %v5910_v36 = vunpack.i.h.bf16 %v5908_v37  ;;  %v5909_v62 = vunpack.i.l.bf16 %v5908_v37 }
 0x5e6   : > { %v1998_v11 = vsel %vm1991_vm10, %v5909_v62, %v5910_v36 }
 0x5eb   : > { %v6955_v25 = vpop.permute.xlu2 %5912 }
 0x5ec   : > { %v5873_v39 = vpop.permute.xlu1 %5872  ;;  %v5915_v3 = vunpack.i.h.bf16 %v6955_v25  ;;  %v5914_v10 = vunpack.i.l.bf16 %v6955_v25 }
 0x5ed   : > { %v5875_v41 = vunpack.i.h.bf16 %v5873_v39  ;;  %v5874_v42 = vunpack.i.l.bf16 %v5873_v39 }
 0x5ee   : > { %v2143_v26 = vsel %vm2136_vm11, %v5914_v10, %v5915_v3 }
 0x5ef   : > { %v1872_v44 = vsel %vm542_vm7, %v5869_v40, %v5874_v42  ;;  %v1868_v45 = vsel %vm542_vm7, %v5870_v43, %v5875_v41 }
 0x5f0   : > { %1901 = vmatpush.msra.mxu0 %v1872_v44 }
 0x5f2   : > { %v5883_v46 = vpop.permute.xlu0 %5882  ;;  %1902 = vmatpush.msra.mxu0 %v1868_v45 }
 0x5f3   : > { %5603 = vmatmul.msk.f32.vlgmr.msra.gmra.mxu0 %vm1884_vm5, %v1837_v38  ;;  %v5918_v48 = vpop.permute.xlu2 %5917  ;;  %v5884_v1 = vunpack.i.l.bf16 %v5883_v46  ;;  %v5885_v35 = vunpack.i.h.bf16 %v5883_v46 }
 0x5f4   : > { %v5878_v47 = vpop.permute.xlu1 %5877  ;;  %v5919_v57 = vunpack.i.l.bf16 %v5918_v48  ;;  %v5920_v9 = vunpack.i.h.bf16 %v5918_v48 }
 0x5f5   : > { %v5880_v50 = vunpack.i.h.bf16 %v5878_v47  ;;  %v5879_v51 = vunpack.i.l.bf16 %v5878_v47  ;;  %v1999_v15 = vsel %vm1991_vm10, %v5910_v36, %v5884_v1  ;;  %v1994_v20 = vsel %vm1991_vm10, %v5885_v35, %v5864_v32 }
 0x5f7   : > { %v1869_v33 = vsel %vm542_vm7, %v5875_v41, %v5880_v50  ;;  %v1870_v4 = vsel %vm542_vm7, %v5880_v50, %v5859_v56 }
 0x5fb   : > { %v5888_v49 = vpop.permute.xlu0 %5887  ;;  %v5928_v21 = vpop.permute.xlu2 %5927 }
 0x5fc   : > { %v5890_v52 = vunpack.i.h.bf16 %v5888_v49  ;;  %v5889_v53 = vunpack.i.l.bf16 %v5888_v49  ;;  %v5893_v54 = vpop.permute.xlu1 %5892  ;;  %v5930_v43 = vunpack.i.h.bf16 %v5928_v21 }
 0x5fd   : > { %v5894_v58 = vunpack.i.l.bf16 %v5893_v54  ;;  %v5895_v2 = vunpack.i.h.bf16 %v5893_v54 }
 0x5fe   : > { %v1873_v59 = vsel %vm542_vm7, %v5874_v42, %v5889_v53  ;;  %v1874_v60 = vsel %vm542_vm7, %v5889_v53, %v5890_v52  ;;  %v1875_v61 = vsel %vm542_vm7, %v5890_v52, %v5879_v51 }
 0x5ff   : > { %1921 = vmatpush.msrb.mxu1 %v1873_v59  ;;  %1941 = vmatpush.msrb.mxu2 %v1874_v60  ;;  %v1996_v63 = vsel %vm1991_vm10, %v5919_v57, %v5894_v58  ;;  %v1997_v6 = vsel %vm1991_vm10, %v5894_v58, %v5909_v62  ;;  %v1992_v16 = vsel %vm1991_vm10, %v5920_v9, %v5895_v2 }
 0x600   : > { %1961 = vmatpush.msra.mxu3 %v1875_v61  ;;  %2024 = vmatpush.msrb.mxu0 %v1996_v63  ;;  %v1993_v18 = vsel %vm1991_vm10, %v5895_v2, %v5885_v35 }
 0x601   : > { %1922 = vmatpush.msrb.mxu1 %v1869_v33  ;;  %1942 = vmatpush.msrb.mxu2 %v1870_v4 }
 0x602   : > { %1962 = vmatpush.msra.mxu3 %v1871_v5  ;;  %5604 = vmatmul.msk.f32.vlgmr.msrb.gmra.mxu1 %vm1884_vm5, %v1837_v38 }
 0x603   : > { %5605 = vmatmul.msk.f32.vlgmr.msrb.gmra.mxu2 %vm1884_vm5, %v1837_v38  ;;  %5606 = vmatmul.msk.f32.vlgmr.msra.gmra.mxu3 %vm1884_vm5, %v1837_v38  ;;  %v1970_v13 = vpop.permute.xlu0 %1969  ;;  %v5929_v38 = vunpack.i.l.bf16 %v5928_v21  ;;  %v7000_v21 = vld [vmem:[#allocation3 + $0x10] sm:$0xff] }
 0x604   : > { %2044 = vmatpush.msra.mxu1 %v1997_v6  ;;  %2064 = vmatpush.msra.mxu2 %v1998_v11  ;;  %v5903_v17 = vpop.permute.xlu1 %5902 }
 0x605   : > { %2084 = vmatpush.msrb.mxu3 %v1999_v15  ;;  %2025 = vmatpush.msrb.mxu0 %v1992_v16  ;;  %v5905_v28 = vunpack.i.h.bf16 %v5903_v17  ;;  %v5904_v29 = vunpack.i.l.bf16 %v5903_v17 }
 0x606   : > { %5607 = vmatmul.msk.f32.vlgmr.msrb.gmra.mxu0 %vm1884_vm5, %v1970_v13  ;;  %2045 = vmatpush.msra.mxu1 %v1993_v18 }
 0x607   : > { %2065 = vmatpush.msra.mxu2 %v1994_v20  ;;  %2085 = vmatpush.msrb.mxu3 %v1995_v27  ;;  %v2140_v45 = vsel %vm2136_vm11, %v5904_v29, %v5905_v28  ;;  %v5937_v28 = vpack.i.bf16 %v7000_v21, %v6920_v19 }
 0x609   : > { %2209 = vmatpush.msrb.mxu2 %v2143_v26 }
 0x60a   : > { %5608 = vmatmul.msk.f32.vlgmr.msra.gmra.mxu1 %vm1884_vm5, %v1970_v13 }
 0x60b   : > { %5609 = vmatmul.msk.f32.vlgmr.msra.gmra.mxu2 %vm1884_vm5, %v1970_v13  ;;  %5610 = vmatmul.msk.f32.vlgmr.msrb.gmra.mxu3 %vm1884_vm5, %v1970_v13  ;;  %v5898_v31 = vpop.permute.xlu0 %5897 }
 0x60c   : > { %v5900_v30 = vunpack.i.h.bf16 %v5898_v31  ;;  %v5899_v34 = vunpack.i.l.bf16 %v5898_v31  ;;  %v5923_v37 = vpop.permute.xlu1 %5922 }
 0x60d   : > { %v5925_v39 = vunpack.i.h.bf16 %v5923_v37  ;;  %v5924_v40 = vunpack.i.l.bf16 %v5923_v37  ;;  %v7012_v37 = vld [vmem:[#allocation3 + $0x8] sm:$0xff] }
 0x60e   : > { %v2139_v41 = vsel %vm2136_vm11, %v5900_v30, %v5904_v29  ;;  %v2144_v42 = vsel %vm2136_vm11, %v5915_v3, %v5899_v34  ;;  %v7006_v29 = vld [vmem:[#allocation3 + $0x18] sm:$0xff] }
 0x60f   : > { %2210 = vmatpush.msrb.mxu2 %v2139_v41  ;;  %2229 = vmatpush.msra.mxu3 %v2144_v42  ;;  %v2141_v44 = vsel %vm2136_vm11, %v5929_v38, %v5924_v40  ;;  %v2142_v25 = vsel %vm2136_vm11, %v5924_v40, %v5914_v10  ;;  %v2137_v46 = vsel %vm2136_vm11, %v5930_v43, %v5925_v39 }
 0x610   : > { %2169 = vmatpush.msra.mxu0 %v2141_v44  ;;  %2189 = vmatpush.msrb.mxu1 %v2142_v25  ;;  %v2138_v47 = vsel %vm2136_vm11, %v5925_v39, %v5900_v30  ;;  %v7008_v30 = vld [vmem:[#allocation3 + $0x20] sm:$0xff]  ;;  %v5947_v38 = vpack.i.bf16 %v7012_v37, %v6909_v14 }
 0x611   : > { %2230 = vmatpush.msra.mxu3 %v2140_v45  ;;  %v5942_v34 = vpack.i.bf16 %v7008_v30, %v7006_v29  ;;  %v2302_v39 = vld [vmem:[%s8177_s3] sm:$0xf] }
 0x612   : > { %2170 = vmatpush.msra.mxu0 %v2137_v46  ;;  %2190 = vmatpush.msrb.mxu1 %v2138_v47  ;;  %v2571_v46 = vld [vmem:[%s8177_s3 + $0x4] sm:$0xf] }
 0x613   : > { %v2105_v48 = vpop.permute.xlu0 %2104 }
 0x614   : > { %5611 = vmatmul.msk.f32.vlgmr.msra.gmra.mxu0 %vm1884_vm5, %v2105_v48  ;;  %5612 = vmatmul.msk.f32.vlgmr.msrb.gmra.mxu1 %vm1884_vm5, %v2105_v48 }
 0x615   : > { %5613 = vmatmul.msk.f32.vlgmr.msrb.gmra.mxu2 %vm1884_vm5, %v2105_v48  ;;  %5614 = vmatmul.msk.f32.vlgmr.msra.gmra.mxu3 %vm1884_vm5, %v2105_v48 }
 0x61b   : > { %v2243_v49 = vpop.permute.xlu0 %2242 }
 0x61c   : > { %v2248_v50 = vperm.slane %v2243_v49, %v6754_v8 }
 0x61e   : > { %2250 = vst [vmem:[#allocation1] ss:$2 sm:$0xff] %v2248_v50 }
 0x61f   : > { %2252 = vst [vmem:[#allocation1 + $0x10] ss:$2 sm:$0xff] %v2248_v50 }
 0x625   : > { %v2254_v61 = vld.sshfl [vmem:[#allocation1 + $0x8] sm:$0xff pattern:$0x75316420]  ;;  %v2253_v15 = vld.sshfl [vmem:[#allocation1] sm:$0xff pattern:$0x75316420] }
 0x626   : > { %v2255_v9 = vld.sshfl [vmem:[#allocation1 + $0x10] sm:$0xff pattern:$0x75316420]  ;;  %v2256_v3 = vld.sshfl [vmem:[#allocation1 + $0x18] sm:$0xff pattern:$0x75316420] }
 0x627   : > { %2477 = vst [vmem:[#allocation1] ss:$2 sm:$0xff] %v2302_v39 }
 0x62e   : > { %v2478_v40 = vld.sshfl [vmem:[#allocation1] sm:$0xff pattern:$0x75316420] }
 0x62f   : > { %2588 = vst [vmem:[#allocation1] ss:$2 sm:$0xff] %v2571_v46 }
 0x670   : > { %v1904_v54 = vpop.f32.mrf.mxu0 }
 0x67f   : > { %v1924_v51 = vpop.f32.mrf.mxu1 }
 0x683   : > { %v2027_v56 = vpop.f32.mrf.mxu0 }
 0x684   : > { %v2028_v7 = vadd.f32 %v2027_v56, %v1904_v54  ;;  %v2589_v56 = vld.sshfl [vmem:[#allocation1] sm:$0xff pattern:$0x75316420] }
 0x686   : > { %v1944_v52 = vpop.f32.mrf.mxu2  ;;  %v1964_v53 = vpop.f32.mrf.mxu3 }
 0x687   : > { %v2047_v55 = vpop.f32.mrf.mxu1 }
 0x688   : > { %v2048_v57 = vadd.f32 %v2047_v55, %v1924_v51 }
 0x68e   : > { %v2067_v58 = vpop.f32.mrf.mxu2  ;;  %v2087_v59 = vpop.f32.mrf.mxu3 }
 0x68f   : > { %v2068_v1 = vadd.f32 %v2067_v58, %v1944_v52  ;;  %v2088_v2 = vadd.f32 %v2087_v59, %v1964_v53  ;;  %v7055_v58 = vld [vmem:[#allocation3] sm:$0xff] }
 0x691   : > { %v2192_v60 = vpop.f32.mrf.mxu1  ;;  %v2172_v33 = vpop.f32.mrf.mxu0 }
 0x692   : > { %v2236_v36 = vadd.f32 %v2192_v60, %v2048_v57  ;;  %v2235_v10 = vadd.f32 %v2172_v33, %v2028_v7  ;;  %v5977_v60 = vpack.i.bf16 %v7055_v58, %v6905_v12 }
 0x694   : > { %v2262_v62 = vadd.f32 %v2254_v61, %v2236_v36  ;;  %v2261_v18 = vadd.f32 %v2253_v15, %v2235_v10 }
 0x696   : > { %vm2266_vm13 = vcmp.ge.f32.partialorder %v2262_v62, 0.0  ;;  %v2270_v63 = vmul.f32 0.2, %v2262_v62  ;;  %v2269_v26 = vmul.f32 0.2, %v2261_v18  ;;  %vm2265_vm10 = vcmp.ge.f32.partialorder %v2261_v18, 0.0 }
 0x698   : > { %v2212_v4 = vpop.f32.mrf.mxu2  ;;  %v2232_v5 = vpop.f32.mrf.mxu3  ;;  %v2274_v6 = vsel %vm2266_vm13, %v2262_v62, %v2270_v63  ;;  %v2273_v31 = vsel %vm2265_vm10, %v2261_v18, %v2269_v26  ;;  %v2752_v26 = vld [vmem:[%s8177_s3 + $0x4] sm:$0xf]  ;;  %vm3096_vm10 = vcmask 1047592  }
 0x699   : > { %v2237_v32 = vadd.f32 %v2212_v4, %v2068_v1  ;;  %v2238_v35 = vadd.f32 %v2232_v5, %v2088_v2  ;;  %2283 = vrot.lane.b32.xlu1 %v2274_v6, %s8180_s24  ;;  %v5934_v62 = vpop.permute.xlu0 %5933 }
 0x69a   : > { %v5936_v15 = vunpack.i.h.bf16 %v5934_v62 }
 0x69b   : > { %v2263_v11 = vadd.f32 %v2255_v9, %v2237_v32  ;;  %v2264_v13 = vadd.f32 %v2256_v3, %v2238_v35 }
 0x69d   : > { %vm2267_vm14 = vcmp.ge.f32.partialorder %v2263_v11, 0.0  ;;  %v2271_v16 = vmul.f32 0.2, %v2263_v11  ;;  %vm2268_vm15 = vcmp.ge.f32.partialorder %v2264_v13, 0.0  ;;  %v2272_v17 = vmul.f32 0.2, %v2264_v13 }
 0x69f   : > { %v2275_v20 = vsel %vm2267_vm14, %v2263_v11, %v2271_v16  ;;  %v2276_v27 = vsel %vm2268_vm15, %v2264_v13, %v2272_v17  ;;  %v2315_v11 = vld [vmem:[%s8177_s3 + $0x4] sm:$0xf]  ;;  %v5935_v16 = vunpack.i.l.bf16 %v5934_v62  ;;  %s8188_s3 = smov 5   ;;  %vm3064_vm15 = vcmask 48128  }
 0x6a0   : > { %2285 = vrot.lane.b32.xlu2 %v2275_v20, %s8180_s24 }
 0x6a1   : > { %2287 = vrot.lane.b32.xlu1 %v2276_v27, %s8180_s24  ;;  %v5954_v33 = vpop.permute.xlu0 %5953  ;;  %v6348_v27 = vmov 43  }
 0x6a2   : > { %v5955_v7 = vunpack.i.l.bf16 %v5954_v33  ;;  %v5956_v3 = vunpack.i.h.bf16 %v5954_v33  ;;  %5982 = vset.pattern.permute.xlu1 %v6348_v27 }
 0x6a8   : > { %2281 = vrot.lane.b32.xlu2 %v2273_v31, %s8180_s24 }
 0x6a9   : > { %5938 = vrot.lane.b32.xlu1 %v5937_v28, %s8182_s17 }
 0x6b0   : > { %5943 = vrot.lane.b32.xlu2 %v5942_v34, %s8182_s17 }
 0x6b1   : > { %5948 = vrot.lane.b32.xlu1 %v5947_v38, %s8182_s17 }
 0x6b9   : > { %2479 = vrot.lane.b32.xlu1 %v2478_v40, %s6346_s0  ;;  %s6347_s0 = smov 108  }
 0x6fa   : > { %v2286_v41 = vpop.permute.xlu2 %2285 }
 0x702   : > { %v2282_v42 = vpop.permute.xlu2 %2281 }
 0x703   : > { %2297 = vst.msk [vmem:[#allocation3 + $0x50] sm:$0xf] %vm506_vm3, %v2282_v42  ;;  %vm2637_vm3 = vcmask 916480  }
 0x70a   : > { %v7022_v43 = vld [vmem:[#allocation3 + $0x50] sm:$0xf]  ;;  %v5944_v61 = vpop.permute.xlu2 %5943 }
 0x70b   : > { %2354 = vrot.lane.b32.xlu2 %v7022_v43, %s8182_s17  ;;  %v2284_v44 = vpop.permute.xlu1 %2283  ;;  %v2582_v59 = vld [vmem:[#allocation3 + $0x50] sm:$0xf]  ;;  %v5945_v39 = vunpack.i.l.bf16 %v5944_v61 }
 0x70c   : > { %v2289_v25 = vsel %vm498_vm1, %v2282_v42, %v2284_v44  ;;  %v2290_v45 = vsel %vm498_vm1, %v2284_v44, %v2286_v41  ;;  %v2370_v44 = vsel %vm542_vm7, %v5935_v16, %v5936_v15 }
 0x70d   : > { %2298 = vst [vmem:[#allocation3 + $0x58] sm:$0xf] %v2289_v25 }
 0x70e   : > { %2299 = vst [vmem:[#allocation3 + $0x60] sm:$0xf] %v2290_v45 }
 0x713   : > { %v2288_v47 = vpop.permute.xlu1 %2287 }
 0x714   : > { %v2291_v48 = vsel %vm498_vm1, %v2286_v41, %v2288_v47  ;;  %2301 = vst.msk [vmem:[#allocation3 + $0x70] sm:$0xf] %vm484_vm0, %v2288_v47  ;;  %v7033_v49 = vld [vmem:[#allocation3 + $0x58] sm:$0xf]  ;;  %vm2384_vm0 = vcmask 162816  }
 0x715   : > { %2300 = vst [vmem:[#allocation3 + $0x68] sm:$0xf] %v2291_v48  ;;  %2356 = vrot.lane.b32.xlu0 %v7033_v49, %s8182_s17  ;;  %v7040_v52 = vld [vmem:[#allocation3 + $0x60] sm:$0xf]  ;;  %v2583_v57 = vld [vmem:[#allocation3 + $0x58] sm:$0xf] }
 0x716   : > { %v2584_v54 = vld [vmem:[#allocation3 + $0x60] sm:$0xf] }
 0x71b   : > { %v2318_v50 = vld [vmem:[#allocation3 + $0x70] sm:$0xf]  ;;  %v5939_v36 = vpop.permute.xlu1 %5938 }
 0x71c   : > { %2362 = vrot.lane.b32.xlu2 %v2318_v50, %s8182_s17  ;;  %v7038_v51 = vld [vmem:[#allocation3 + $0x68] sm:$0xf]  ;;  %v2586_v53 = vld [vmem:[#allocation3 + $0x70] sm:$0xf]  ;;  %v5940_v17 = vunpack.i.l.bf16 %v5939_v36  ;;  %v5941_v40 = vunpack.i.h.bf16 %v5939_v36 }
 0x71d   : > { %2360 = vrot.lane.b32.xlu1 %v7038_v51, %s8182_s17  ;;  %2358 = vrot.lane.b32.xlu0 %v7040_v52, %s8182_s17  ;;  %v2585_v55 = vld [vmem:[#allocation3 + $0x68] sm:$0xf] }
 0x71e   : > { %v2371_v25 = vsel %vm542_vm7, %v5936_v15, %v5940_v17  ;;  %v2366_v46 = vsel %vm542_vm7, %v5941_v40, %v5945_v39 }
 0x723   : > { %v5949_v1 = vpop.permute.xlu1 %5948 }
 0x724   : > { %5958 = vrot.lane.b32.xlu2 %v6932_v24, %s8183_s22  ;;  %v5950_v5 = vunpack.i.l.bf16 %v5949_v1  ;;  %v5951_v32 = vunpack.i.h.bf16 %v5949_v1 }
 0x725   : > { %2635 = vrot.lane.b32.xlu1 %v2586_v53, %s8183_s22  ;;  %5963 = vrot.lane.b32.xlu0 %v5937_v28, %s8183_s22 }
 0x726   : > { %v2368_v10 = vsel %vm542_vm7, %v5955_v7, %v5950_v5  ;;  %v2364_v13 = vsel %vm542_vm7, %v5956_v3, %v5951_v32  ;;  %v2369_v42 = vsel %vm542_vm7, %v5950_v5, %v5935_v16  ;;  %v2365_v45 = vsel %vm542_vm7, %v5951_v32, %v5941_v40 }
 0x72b   : > { %v7061_v4 = vpop.permute.xlu1 %2479 }
 0x72c   : > { %2631 = vrot.lane.b32.xlu2 %v2584_v54, %s8183_s22 }
 0x72d   : > { %5968 = vrot.lane.b32.xlu1 %v5942_v34, %s8183_s22  ;;  %2633 = vrot.lane.b32.xlu0 %v2585_v55, %s8183_s22 }
 0x734   : > { %2590 = vrot.lane.b32.xlu2 %v2589_v56, %s6347_s0  ;;  %s8134_s0 = smov 6  }
 0x735   : > { %5973 = vrot.lane.b32.xlu1 %v5947_v38, %s8183_s22  ;;  %2629 = vrot.lane.b32.xlu0 %v2583_v57, %s8183_s22  ;;  %v5946_v38 = vunpack.i.h.bf16 %v5944_v61 }
 0x737   : > { %v2367_v47 = vsel %vm542_vm7, %v5945_v39, %v5946_v38 }
 0x73c   : > { %2627 = vrot.lane.b32.xlu2 %v2582_v59, %s8183_s22 }
 0x73d   : > { %5978 = vrot.lane.b32.xlu0 %v5977_v60, %s8183_s22  ;;  %2755 = vperm.xlu1 %5982, %v2752_v26  }
 0x765   : > { %v2355_v63 = vpop.permute.xlu2 %2354 }
 0x776   : > { %v2363_v2 = vpop.permute.xlu2 %2362 }
 0x77e   : > { %v7063_v35 = vpop.permute.xlu2 %5958 }
 0x77f   : > { %v5960_v54 = vunpack.i.l.bf16 %v7063_v35 }
 0x786   : > { %v7083_v41 = vpop.permute.xlu2 %2631 }
 0x787   : > { %v2357_v6 = vpop.permute.xlu0 %2356 }
 0x788   : > { %v2372_v9 = vsel %vm542_vm7, %v2355_v63, %v2357_v6 }
 0x789   : > { %5615 = vmatpush.msk.msrb.mxu0 %vm500_vm6, %v2372_v9 }
 0x78b   : > { %2410 = vmatpush.msrb.mxu0 %v2368_v10 }
 0x78d   : > { %2411 = vmatpush.msrb.mxu0 %v2364_v13 }
 0x78e   : > { %5616 = vmatmul.msk.f32.vlgmr.msrb.gmra.mxu0 %vm2384_vm0, %v2315_v11  ;;  %v2591_v53 = vpop.permute.xlu2 %2590 }
 0x78f   : > { %5623 = vmatpush.msk.msra.mxu0 %vm500_vm6, %v7022_v43  ;;  %v2361_v18 = vpop.permute.xlu1 %2360  ;;  %v2359_v20 = vpop.permute.xlu0 %2358  ;;  %v6260_v43 = vld [vmem:[#allocation3] sm:$0xff] }
 0x790   : > { %v2375_v31 = vsel %vm542_vm7, %v2361_v18, %v2363_v2  ;;  %v2373_v28 = vsel %vm542_vm7, %v2357_v6, %v2359_v20  ;;  %v2374_v34 = vsel %vm542_vm7, %v2359_v20, %v2361_v18 }
 0x791   : > { %2505 = vmatpush.msra.mxu0 %v6905_v12  ;;  %5617 = vmatpush.msk.msra.mxu1 %vm500_vm6, %v2373_v28 }
 0x792   : > { %5619 = vmatpush.msk.msra.mxu2 %vm500_vm6, %v2374_v34  ;;  %5621 = vmatpush.msk.msrb.mxu3 %vm500_vm6, %v2375_v31 }
 0x793   : > { %2506 = vmatpush.msra.mxu0 %v6260_v43  ;;  %2430 = vmatpush.msra.mxu1 %v2369_v42 }
 0x794   : > { %2450 = vmatpush.msra.mxu2 %v2370_v44  ;;  %2470 = vmatpush.msrb.mxu3 %v2371_v25 }
 0x795   : > { %2431 = vmatpush.msra.mxu1 %v2365_v45 }
 0x796   : > { %2451 = vmatpush.msra.mxu2 %v2366_v46  ;;  %2471 = vmatpush.msrb.mxu3 %v2367_v47  ;;  %v2628_v63 = vpop.permute.xlu2 %2627 }
 0x797   : > { %5618 = vmatmul.msk.f32.vlgmr.msra.gmra.mxu1 %vm2384_vm0, %v2315_v11  ;;  %5624 = vmatmul.msk.f32.vlgmr.msra.gmra.mxu0 %vm2384_vm0, %v7061_v4  ;;  %v2636_v48 = vpop.permute.xlu1 %2635  ;;  %v5964_v50 = vpop.permute.xlu0 %5963 }
 0x798   : > { %5625 = vmatpush.msk.msrb.mxu1 %vm500_vm6, %v7033_v49  ;;  %5620 = vmatmul.msk.f32.vlgmr.msra.gmra.mxu2 %vm2384_vm0, %v2315_v11  ;;  %v5961_v49 = vunpack.i.h.bf16 %v7063_v35  ;;  %v5966_v59 = vunpack.i.h.bf16 %v5964_v50 }
 0x799   : > { %5622 = vmatmul.msk.f32.vlgmr.msrb.gmra.mxu3 %vm2384_vm0, %v2315_v11  ;;  %5627 = vmatpush.msk.msrb.mxu2 %vm500_vm6, %v7040_v52  ;;  %v5965_v52 = vunpack.i.l.bf16 %v5964_v50 }
 0x79a   : > { %5629 = vmatpush.msk.msra.mxu3 %vm500_vm6, %v7038_v51  ;;  %2525 = vmatpush.msrb.mxu1 %v6909_v14  ;;  %v2644_v60 = vsel %vm2637_vm3, %v5960_v54, %v5961_v49 }
 0x79b   : > { %2545 = vmatpush.msrb.mxu2 %v6926_v22  ;;  %v2645_v61 = vsel %vm2637_vm3, %v5961_v49, %v5965_v52 }
 0x79c   : > { %2565 = vmatpush.msra.mxu3 %v6928_v23  ;;  %2526 = vmatpush.msrb.mxu1 %v7012_v37 }
 0x79d   : > { %2546 = vmatpush.msrb.mxu2 %v7000_v21 }
 0x79e   : > { %2566 = vmatpush.msra.mxu3 %v7006_v29 }
 0x79f   : > { %5626 = vmatmul.msk.f32.vlgmr.msrb.gmra.mxu1 %vm2384_vm0, %v7061_v4  ;;  %v5969_v51 = vpop.permute.xlu1 %5968  ;;  %v2634_v22 = vpop.permute.xlu0 %2633 }
 0x7a0   : > { %5628 = vmatmul.msk.f32.vlgmr.msrb.gmra.mxu2 %vm2384_vm0, %v7061_v4  ;;  %v5970_v23 = vunpack.i.l.bf16 %v5969_v51  ;;  %v2648_v55 = vsel %vm2637_vm3, %v7083_v41, %v2634_v22  ;;  %v2649_v56 = vsel %vm2637_vm3, %v2634_v22, %v2636_v48  ;;  %v5971_v57 = vunpack.i.h.bf16 %v5969_v51 }
 0x7a1   : > { %5630 = vmatmul.msk.f32.vlgmr.msra.gmra.mxu3 %vm2384_vm0, %v7061_v4  ;;  %5635 = vmatpush.msk.msra.mxu2 %vm500_vm6, %v2648_v55 }
 0x7a2   : > { %5637 = vmatpush.msk.msrb.mxu3 %vm500_vm6, %v2649_v56  ;;  %v2640_v36 = vsel %vm2637_vm3, %v5966_v59, %v5970_v23  ;;  %v2641_v62 = vsel %vm2637_vm3, %v5970_v23, %v5971_v57 }
 0x7a3   : > { %2722 = vmatpush.msra.mxu2 %v2644_v60 }
 0x7a4   : > { %2742 = vmatpush.msrb.mxu3 %v2645_v61 }
 0x7a5   : > { %2723 = vmatpush.msra.mxu2 %v2640_v36 }
 0x7a6   : > { %2743 = vmatpush.msrb.mxu3 %v2641_v62 }
 0x7a7   : > { %v5974_v1 = vpop.permute.xlu1 %5973  ;;  %v2630_v2 = vpop.permute.xlu0 %2629 }
 0x7a8   : > { %5636 = vmatmul.msk.f32.vlgmr.msra.gmra.mxu2 %vm2384_vm0, %v2591_v53  ;;  %v5975_v33 = vunpack.i.l.bf16 %v5974_v1  ;;  %v2646_v4 = vsel %vm2637_vm3, %v2628_v63, %v2630_v2  ;;  %v2647_v5 = vsel %vm2637_vm3, %v2630_v2, %v7083_v41  ;;  %v5976_v6 = vunpack.i.h.bf16 %v5974_v1 }
 0x7a9   : > { %5638 = vmatmul.msk.f32.vlgmr.msrb.gmra.mxu3 %vm2384_vm0, %v2591_v53  ;;  %5631 = vmatpush.msk.msrb.mxu0 %vm500_vm6, %v2646_v4  ;;  %v6003_v2 = vpack.i.bf16 %v6909_v14, %v6905_v12  ;;  %v6008_v4 = vpack.i.bf16 %v7012_v37, %v7055_v58 }
 0x7aa   : > { %5633 = vmatpush.msk.msra.mxu1 %vm500_vm6, %v2647_v5  ;;  %v2643_v7 = vsel %vm2637_vm3, %v5975_v33, %v5960_v54  ;;  %v2639_v32 = vsel %vm2637_vm3, %v5976_v6, %v5966_v59 }
 0x7ac   : > { %2702 = vmatpush.msra.mxu1 %v2643_v7 }
 0x7ae   : > { %2703 = vmatpush.msra.mxu1 %v2639_v32 }
 0x7af   : > { %5634 = vmatmul.msk.f32.vlgmr.msra.gmra.mxu1 %vm2384_vm0, %v2591_v53  ;;  %v5979_v35 = vpop.permute.xlu0 %5978  ;;  %v2756_v13 = vpop.permute.xlu1 %2755 }
 0x7b0   : > { %v5981_v9 = vunpack.i.h.bf16 %v5979_v35  ;;  %v5980_v3 = vunpack.i.l.bf16 %v5979_v35  ;;  %v2761_v15 = vperm.slane %v2756_v13, %v6754_v8 }
 0x7b2   : > { %v2642_v10 = vsel %vm2637_vm3, %v5980_v3, %v5975_v33  ;;  %v2638_v11 = vsel %vm2637_vm3, %v5981_v9, %v5976_v6  ;;  %2763 = vst [vmem:[#allocation1] ss:$2 sm:$0xff] %v2761_v15  ;;  %v5988_v33 = vpack.i.bf16 %v7006_v29, %v7000_v21  ;;  %vm3118_vm3 = vcmask 1047584  }
 0x7b3   : > { %2682 = vmatpush.msrb.mxu0 %v2642_v10  ;;  %2765 = vst [vmem:[#allocation1 + $0x10] ss:$2 sm:$0xff] %v2761_v15  ;;  %v2819_v10 = vld [vmem:[%s8184_s4] sm:$0xff]  ;;  %s8189_s4 = smov 4  }
 0x7b5   : > { %2683 = vmatpush.msrb.mxu0 %v2638_v11  ;;  %v6349_v11 = vmov 24  }
 0x7b6   : > { %5632 = vmatmul.msk.f32.vlgmr.msrb.gmra.mxu0 %vm2384_vm0, %v2591_v53  ;;  %6018 = vset.pattern.permute.xlu2 %v6349_v11  ;;  %v3274_v11 = vld [vmem:[%s8105_s6 + $0x148] sm:$0xff]  ;;  %vm3087_vm0 = vcmask 39936  }
 0x7b9   : > { %v2767_v47 = vld.sshfl [vmem:[#allocation1 + $0x8] sm:$0xff pattern:$0x75316420]  ;;  %v2766_v61 = vld.sshfl [vmem:[#allocation1] sm:$0xff pattern:$0x75316420] }
 0x7ba   : > { %v2768_v41 = vld.sshfl [vmem:[#allocation1 + $0x10] sm:$0xff pattern:$0x75316420]  ;;  %v2769_v44 = vld.sshfl [vmem:[#allocation1 + $0x18] sm:$0xff pattern:$0x75316420] }
 0x80b   : > { %v2413_v20 = vpop.f32.mrf.mxu0 }
 0x814   : > { %v2433_v16 = vpop.f32.mrf.mxu1  ;;  %v2508_v34 = vpop.f32.mrf.mxu0 }
 0x815   : > { %v2509_v52 = vadd.f32 %v2508_v34, %v2413_v20 }
 0x81b   : > { %v2453_v17 = vpop.f32.mrf.mxu2 }
 0x81c   : > { %v2473_v18 = vpop.f32.mrf.mxu3  ;;  %v2528_v26 = vpop.f32.mrf.mxu1 }
 0x81d   : > { %v2529_v38 = vadd.f32 %v2528_v26, %v2433_v16 }
 0x823   : > { %v2548_v27 = vpop.f32.mrf.mxu2 }
 0x824   : > { %v2568_v31 = vpop.f32.mrf.mxu3  ;;  %v2549_v28 = vadd.f32 %v2548_v27, %v2453_v17 }
 0x825   : > { %v2569_v39 = vadd.f32 %v2568_v31, %v2473_v18 }
 0x82b   : > { %v2725_v40 = vpop.f32.mrf.mxu2 }
 0x82c   : > { %v2750_v42 = vadd.f32 %v2725_v40, %v2549_v28  ;;  %v2745_v43 = vpop.f32.mrf.mxu3  ;;  %v2705_v25 = vpop.f32.mrf.mxu1 }
 0x82d   : > { %v2751_v8 = vadd.f32 %v2745_v43, %v2569_v39  ;;  %v2749_v45 = vadd.f32 %v2705_v25, %v2529_v38 }
 0x82e   : > { %v2776_v46 = vadd.f32 %v2768_v41, %v2750_v42 }
 0x82f   : > { %v2777_v48 = vadd.f32 %v2769_v44, %v2751_v8  ;;  %v2775_v50 = vadd.f32 %v2767_v47, %v2749_v45 }
 0x830   : > { %v2784_v53 = vmul.f32 0.2, %v2776_v46  ;;  %vm2780_vm6 = vcmp.ge.f32.partialorder %v2776_v46, 0.0 }
 0x831   : > { %v2785_v49 = vmul.f32 0.2, %v2777_v48  ;;  %v2783_v54 = vmul.f32 0.2, %v2775_v50  ;;  %vm2781_vm11 = vcmp.ge.f32.partialorder %v2777_v48, 0.0  ;;  %vm2779_vm13 = vcmp.ge.f32.partialorder %v2775_v50, 0.0 }
 0x832   : > { %v2788_v51 = vsel %vm2780_vm6, %v2776_v46, %v2784_v53  ;;  %vm3141_vm6 = vcmask 1047576  }
 0x833   : > { %v2685_v22 = vpop.f32.mrf.mxu0  ;;  %v2789_v23 = vsel %vm2781_vm11, %v2777_v48, %v2785_v49  ;;  %v2796_v55 = vrot.slane %v2788_v51, 4  ;;  %v2787_v56 = vsel %vm2779_vm13, %v2775_v50, %v2783_v54  ;;  %vm3132_vm11 = vcmask 23552  }
 0x834   : > { %v2748_v57 = vadd.f32 %v2685_v22, %v2509_v52  ;;  %v2797_v59 = vrot.slane %v2789_v23, 4  ;;  %v2795_v60 = vrot.slane %v2787_v56, 4  ;;  %vm3164_vm13 = vcmask 1047568  }
 0x835   : > { %2802 = vrot.lane.b32.xlu0 %v2796_v55, %s8180_s24 }
 0x836   : > { %v2774_v36 = vadd.f32 %v2766_v61, %v2748_v57  ;;  %2804 = vrot.lane.b32.xlu1 %v2797_v59, %s8180_s24  ;;  %2800 = vrot.lane.b32.xlu2 %v2795_v60, %s8180_s24 }
 0x838   : > { %v2782_v62 = vmul.f32 0.2, %v2774_v36  ;;  %vm2778_vm14 = vcmp.ge.f32.partialorder %v2774_v36, 0.0 }
 0x83a   : > { %v2786_v63 = vsel %vm2778_vm14, %v2774_v36, %v2782_v62  ;;  %vm3155_vm14 = vcmask 15360  }
 0x83b   : > { %v2794_v1 = vrot.slane %v2786_v63, 4  ;;  %v3264_v63 = vld [vmem:[%s8105_s6 + $0xf8] sm:$0xff] }
 0x83e   : > { %5984 = vrot.lane.b32.xlu1 %v6932_v24, %s8182_s17  ;;  %2798 = vrot.lane.b32.xlu2 %v2794_v1, %s8180_s24  ;;  %v3280_v1 = vld [vmem:[%s8105_s6 + $0x178] sm:$0xff] }
 0x846   : > { %6004 = vrot.lane.b32.xlu1 %v6003_v2, %s8182_s17  ;;  %5989 = vrot.lane.b32.xlu2 %v5988_v33, %s8182_s17  ;;  %v3263_v2 = vld [vmem:[%s8105_s6 + $0xf0] sm:$0xff] }
 0x847   : > { %v3279_v33 = vld [vmem:[%s8105_s6 + $0x170] sm:$0xff] }
 0x84e   : > { %2863 = vrot.lane.b32.xlu1 %v7008_v30, %s8182_s17  ;;  %6009 = vrot.lane.b32.xlu2 %v6008_v4, %s8182_s17  ;;  %v3248_v4 = vld [vmem:[%s8105_s6 + $0x78] sm:$0xff] }
 0x856   : > { %2837 = vperm.xlu2 %6018, %v2819_v10  }
 0x890   : > { %v2801_v24 = vpop.permute.xlu2 %2800 }
 0x898   : > { %v2799_v5 = vpop.permute.xlu2 %2798 }
 0x899   : > { %v2806_v6 = vsel %vm498_vm1, %v2799_v5, %v2801_v24  ;;  %2814 = vst.msk [vmem:[#allocation3 + $0x50] sm:$0xf0] %vm1815_vm2, %v2799_v5  ;;  %vm2909_vm2 = vcmask 195584  }
 0x89a   : > { %2815 = vst [vmem:[#allocation3 + $0x58] sm:$0xf0] %v2806_v6  ;;  %v3262_v6 = vld [vmem:[%s8105_s6 + $0xe8] sm:$0xff] }
 0x8a0   : > { %v2830_v7 = vld [vmem:[#allocation3 + $0x50] sm:$0xff]  ;;  %v5990_v15 = vpop.permute.xlu2 %5989 }
 0x8a1   : > { %v2831_v32 = vld [vmem:[#allocation3 + $0x58] sm:$0xff]  ;;  %v5992_v26 = vunpack.i.h.bf16 %v5990_v15  ;;  %v5991_v31 = vunpack.i.l.bf16 %v5990_v15  ;;  %v3273_v15 = vld [vmem:[%s8105_s6 + $0x140] sm:$0xff] }
 0x8a2   : > { %v5998_v35 = vpack.i.bf16 %v2831_v32, %v2830_v7  ;;  %v3259_v7 = vld [vmem:[%s8105_s6 + $0xd0] sm:$0xff] }
 0x8a3   : > { %v2887_v38 = vsel %vm542_vm7, %v5991_v31, %v5992_v26  ;;  %v3275_v32 = vld [vmem:[%s8105_s6 + $0x150] sm:$0xff] }
 0x8a7   : > { %v2803_v12 = vpop.permute.xlu0 %2802 }
 0x8a8   : > { %v2805_v14 = vpop.permute.xlu1 %2804  ;;  %v2807_v21 = vsel %vm498_vm1, %v2801_v24, %v2803_v12  ;;  %v6010_v39 = vpop.permute.xlu2 %6009  ;;  %v3247_v24 = vld [vmem:[%s8105_s6 + $0x70] sm:$0xff] }
 0x8a9   : > { %2818 = vst.msk [vmem:[#allocation3 + $0x70] sm:$0xf0] %vm1820_vm4, %v2805_v14  ;;  %v2808_v29 = vsel %vm498_vm1, %v2803_v12, %v2805_v14  ;;  %v6012_v25 = vunpack.i.h.bf16 %v6010_v39  ;;  %v6011_v8 = vunpack.i.l.bf16 %v6010_v39  ;;  %v3278_v12 = vld [vmem:[%s8105_s6 + $0x168] sm:$0xff]  ;;  %vm3073_vm4 = vcmask 1047600  }
 0x8aa   : > { %2816 = vst [vmem:[#allocation3 + $0x60] sm:$0xf0] %v2807_v21  ;;  %v3246_v14 = vld [vmem:[%s8105_s6 + $0x68] sm:$0xff]  ;;  %v3261_v21 = vld [vmem:[%s8105_s6 + $0xe0] sm:$0xff] }
 0x8ab   : > { %2817 = vst [vmem:[#allocation3 + $0x68] sm:$0xf0] %v2808_v29  ;;  %v2885_v50 = vsel %vm542_vm7, %v6011_v8, %v6012_v25  ;;  %v2886_v53 = vsel %vm542_vm7, %v6012_v25, %v5991_v31  ;;  %v3277_v29 = vld [vmem:[%s8105_s6 + $0x160] sm:$0xff]  ;;  %v3240_v31 = vld [vmem:[%s8105_s6 + $0x38] sm:$0xff]  ;;  %v3238_v39 = vld [vmem:[%s8105_s6 + $0x28] sm:$0xff] }
 0x8ac   : > { %v3267_v25 = vld [vmem:[%s8105_s6 + $0x110] sm:$0xff]  ;;  %v3250_v8 = vld [vmem:[%s8105_s6 + $0x88] sm:$0xff] }
 0x8b0   : > { %v2834_v9 = vld [vmem:[#allocation3 + $0x70] sm:$0xff]  ;;  %v5985_v13 = vpop.permute.xlu1 %5984  ;;  %v2838_v56 = vpop.permute.xlu2 %2837 }
 0x8b1   : > { %v2832_v30 = vld [vmem:[#allocation3 + $0x60] sm:$0xff]  ;;  %v6013_v3 = vpack.i.bf16 %v6920_v19, %v2834_v9  ;;  %v5987_v17 = vunpack.i.h.bf16 %v5985_v13  ;;  %v5986_v18 = vunpack.i.l.bf16 %v5985_v13 }
 0x8b2   : > { %v2833_v37 = vld [vmem:[#allocation3 + $0x68] sm:$0xff]  ;;  %v3244_v9 = vld [vmem:[%s8105_s6 + $0x58] sm:$0xff] }
 0x8b3   : > { %v5993_v58 = vpack.i.bf16 %v2833_v37, %v2832_v30  ;;  %v2891_v28 = vsel %vm542_vm7, %v5986_v18, %v5987_v17  ;;  %v3260_v37 = vld [vmem:[%s8105_s6 + $0xd8] sm:$0xff]  ;;  %v3257_v13 = vld [vmem:[%s8105_s6 + $0xc0] sm:$0xff] }
 0x8b5   : > { %5994 = vrot.lane.b32.xlu0 %v5993_v58, %s8182_s17  ;;  %v3276_v58 = vld [vmem:[%s8105_s6 + $0x158] sm:$0xff] }
 0x8b8   : > { %v6005_v34 = vpop.permute.xlu1 %6004 }
 0x8b9   : > { %v6007_v41 = vunpack.i.h.bf16 %v6005_v34  ;;  %v6006_v42 = vunpack.i.l.bf16 %v6005_v34  ;;  %v3270_v34 = vld [vmem:[%s8105_s6 + $0x128] sm:$0xff] }
 0x8bb   : > { %v2889_v47 = vsel %vm542_vm7, %v6006_v42, %v6007_v41  ;;  %v2890_v48 = vsel %vm542_vm7, %v6007_v41, %v5986_v18  ;;  %v3272_v18 = vld [vmem:[%s8105_s6 + $0x138] sm:$0xff] }
 0x8bc   : > { %v3252_v41 = vld [vmem:[%s8105_s6 + $0x98] sm:$0xff] }
 0x8bd   : > { %5999 = vrot.lane.b32.xlu0 %v5998_v35, %s8182_s17  ;;  %v3245_v35 = vld [vmem:[%s8105_s6 + $0x60] sm:$0xff]  ;;  %v3268_v42 = vld [vmem:[%s8105_s6 + $0x118] sm:$0xff] }
 0x8c0   : > { %v2864_v22 = vpop.permute.xlu1 %2863 }
 0x8c1   : > { %v2888_v55 = vsel %vm542_vm7, %v5992_v26, %v2864_v22  ;;  %v3241_v26 = vld [vmem:[%s8105_s6 + $0x40] sm:$0xff] }
 0x8c5   : > { %6014 = vrot.lane.b32.xlu0 %v6013_v3, %s8182_s17  ;;  %v3258_v3 = vld [vmem:[%s8105_s6 + $0xc8] sm:$0xff] }
 0x927   : > { %v5995_v16 = vpop.permute.xlu0 %5994 }
 0x928   : > { %v5997_v20 = vunpack.i.h.bf16 %v5995_v16  ;;  %v5996_v27 = vunpack.i.l.bf16 %v5995_v16  ;;  %v3242_v16 = vld [vmem:[%s8105_s6 + $0x48] sm:$0xff] }
 0x92a   : > { %v2895_v19 = vsel %vm542_vm7, %v5996_v27, %v5997_v20 }
 0x92b   : > { %2965 = vmatpush.msrb.mxu2 %v2895_v19  ;;  %v3254_v19 = vld [vmem:[%s8105_s6 + $0xa8] sm:$0xff] }
 0x92d   : > { %2966 = vmatpush.msrb.mxu2 %v2891_v28  ;;  %v3239_v28 = vld [vmem:[%s8105_s6 + $0x30] sm:$0xff] }
 0x92f   : > { %v6000_v40 = vpop.permute.xlu0 %5999  ;;  %2967 = vmatpush.msrb.mxu2 %v2887_v38  ;;  %v3253_v38 = vld [vmem:[%s8105_s6 + $0xa0] sm:$0xff] }
 0x930   : > { %v6002_v43 = vunpack.i.h.bf16 %v6000_v40  ;;  %v6001_v44 = vunpack.i.l.bf16 %v6000_v40  ;;  %5641 = vmatmul.msk.f32.vlgmr.msrb.gmra.mxu2 %vm2909_vm2, %v2819_v10  ;;  %v3269_v40 = vld [vmem:[%s8105_s6 + $0x120] sm:$0xff] }
 0x931   : > { %3404 = vmatpush.msra.mxu2 %v3280_v1 }
 0x932   : > { %v2893_v45 = vsel %vm542_vm7, %v6001_v44, %v6002_v43  ;;  %v2894_v46 = vsel %vm542_vm7, %v6002_v43, %v5996_v27  ;;  %v3271_v27 = vld [vmem:[%s8105_s6 + $0x130] sm:$0xff]  ;;  %v3237_v43 = vld [vmem:[%s8105_s6 + $0x20] sm:$0xff] }
 0x933   : > { %2925 = vmatpush.msra.mxu0 %v2893_v45  ;;  %2945 = vmatpush.msrb.mxu1 %v2894_v46  ;;  %v3251_v44 = vld [vmem:[%s8105_s6 + $0x90] sm:$0xff]  ;;  %v3266_v45 = vld [vmem:[%s8105_s6 + $0x108] sm:$0xff]  ;;  %v3236_v46 = vld [vmem:[%s8105_s6 + $0x18] sm:$0xff] }
 0x934   : > { %3405 = vmatpush.msra.mxu2 %v3279_v33 }
 0x935   : > { %2926 = vmatpush.msra.mxu0 %v2889_v47  ;;  %2946 = vmatpush.msrb.mxu1 %v2890_v48  ;;  %v3249_v47 = vld [vmem:[%s8105_s6 + $0x80] sm:$0xff]  ;;  %v3235_v48 = vld [vmem:[%s8105_s6 + $0x10] sm:$0xff] }
 0x936   : > { %3406 = vmatpush.msra.mxu2 %v3278_v12  ;;  %v3290_v12 = vld [vmem:[%s8105_s6 + $0x1c8] sm:$0xff] }
 0x937   : > { %v6015_v49 = vpop.permute.xlu0 %6014  ;;  %2927 = vmatpush.msra.mxu0 %v2885_v50  ;;  %2947 = vmatpush.msrb.mxu1 %v2886_v53  ;;  %v3265_v50 = vld [vmem:[%s8105_s6 + $0x100] sm:$0xff]  ;;  %v3234_v53 = vld [vmem:[%s8105_s6 + $0x8] sm:$0xff] }
 0x938   : > { %v6017_v54 = vunpack.i.h.bf16 %v6015_v49  ;;  %v6016_v52 = vunpack.i.l.bf16 %v6015_v49  ;;  %5639 = vmatmul.msk.f32.vlgmr.msra.gmra.mxu0 %vm2909_vm2, %v2819_v10  ;;  %5640 = vmatmul.msk.f32.vlgmr.msrb.gmra.mxu1 %vm2909_vm2, %v2819_v10 }
 0x939   : > { %3363 = vmatpush.msra.mxu1 %v3264_v63  ;;  %3322 = vmatpush.msrb.mxu0 %v3248_v4  ;;  %v3293_v4 = vld [vmem:[%s8105_s6 + $0x1e0] sm:$0xff] }
 0x93a   : > { %v2896_v51 = vsel %vm542_vm7, %v5997_v20, %v6016_v52  ;;  %v2892_v23 = vsel %vm542_vm7, %v5987_v17, %v6017_v54  ;;  %3407 = vmatpush.msra.mxu2 %v3277_v29  ;;  %v3256_v17 = vld [vmem:[%s8105_s6 + $0xb8] sm:$0xff]  ;;  %v3255_v20 = vld [vmem:[%s8105_s6 + $0xb0] sm:$0xff]  ;;  %v3233_v54 = vld [vmem:[%s8105_s6] sm:$0xff]  ;;  %vm3050_vm7 = vcmask 1047608  }
 0x93b   : > { %2985 = vmatpush.msra.mxu3 %v2896_v51  ;;  %3364 = vmatpush.msra.mxu1 %v3263_v2 }
 0x93c   : > { %3323 = vmatpush.msrb.mxu0 %v3247_v24  ;;  %3408 = vmatpush.msra.mxu2 %v3276_v58  ;;  %v3292_v24 = vld [vmem:[%s8105_s6 + $0x1d8] sm:$0xff]  ;;  %v3289_v58 = vld [vmem:[%s8105_s6 + $0x1c0] sm:$0xff] }
 0x93d   : > { %2986 = vmatpush.msra.mxu3 %v2892_v23  ;;  %3365 = vmatpush.msra.mxu1 %v3262_v6 }
 0x93e   : > { %3324 = vmatpush.msrb.mxu0 %v3246_v14  ;;  %3409 = vmatpush.msra.mxu2 %v3275_v32  ;;  %v3288_v32 = vld [vmem:[%s8105_s6 + $0x1b8] sm:$0xff] }
 0x93f   : > { %2987 = vmatpush.msra.mxu3 %v2888_v55  ;;  %3366 = vmatpush.msra.mxu1 %v3261_v21 }
 0x940   : > { %5642 = vmatmul.msk.f32.vlgmr.msra.gmra.mxu3 %vm2909_vm2, %v2819_v10  ;;  %3325 = vmatpush.msrb.mxu0 %v3245_v35  ;;  %v3243_v10 = vld [vmem:[%s8105_s6 + $0x50] sm:$0xff] }
 0x941   : > { %3367 = vmatpush.msra.mxu1 %v3260_v37  ;;  %3410 = vmatpush.msra.mxu2 %v3274_v11  ;;  %v3287_v35 = vld [vmem:[%s8105_s6 + $0x1b0] sm:$0xff] }
 0x942   : > { %3326 = vmatpush.msrb.mxu0 %v3244_v9 }
 0x943   : > { %3368 = vmatpush.msra.mxu1 %v3259_v7  ;;  %3411 = vmatpush.msra.mxu2 %v3273_v15  ;;  %v3297_v7 = vld [vmem:[%s8105_s6 + $0x200] sm:$0xff] }
 0x944   : > { %3327 = vmatpush.msrb.mxu0 %v3243_v10 }
 0x945   : > { %3369 = vmatpush.msra.mxu1 %v3258_v3  ;;  %3412 = vmatpush.msra.mxu2 %v3272_v18  ;;  %v3286_v3 = vld [vmem:[%s8105_s6 + $0x1a8] sm:$0xff]  ;;  %v3284_v18 = vld [vmem:[%s8105_s6 + $0x198] sm:$0xff] }
 0x946   : > { %3328 = vmatpush.msrb.mxu0 %v3242_v16 }
 0x947   : > { %3370 = vmatpush.msra.mxu1 %v3257_v13  ;;  %3413 = vmatpush.msra.mxu2 %v3271_v27  ;;  %v3283_v27 = vld [vmem:[%s8105_s6 + $0x190] sm:$0xff] }
 0x948   : > { %3329 = vmatpush.msrb.mxu0 %v3241_v26 }
 0x949   : > { %3371 = vmatpush.msra.mxu1 %v3256_v17  ;;  %3414 = vmatpush.msra.mxu2 %v3270_v34  ;;  %v3285_v17 = vld [vmem:[%s8105_s6 + $0x1a0] sm:$0xff] }
 0x94a   : > { %3330 = vmatpush.msrb.mxu0 %v3240_v31 }
 0x94b   : > { %3372 = vmatpush.msra.mxu1 %v3255_v20  ;;  %3415 = vmatpush.msra.mxu2 %v3269_v40 }
 0x94c   : > { %3331 = vmatpush.msrb.mxu0 %v3239_v28 }
 0x94d   : > { %3373 = vmatpush.msra.mxu1 %v3254_v19  ;;  %3416 = vmatpush.msra.mxu2 %v3268_v42 }
 0x94e   : > { %3332 = vmatpush.msrb.mxu0 %v3238_v39  ;;  %v3281_v39 = vld [vmem:[%s8105_s6 + $0x180] sm:$0xff] }
 0x94f   : > { %3374 = vmatpush.msra.mxu1 %v3253_v38  ;;  %3417 = vmatpush.msra.mxu2 %v3267_v25  ;;  %v3282_v38 = vld [vmem:[%s8105_s6 + $0x188] sm:$0xff] }
 0x950   : > { %3333 = vmatpush.msrb.mxu0 %v3237_v43 }
 0x951   : > { %3375 = vmatpush.msra.mxu1 %v3252_v41  ;;  %3418 = vmatpush.msra.mxu2 %v3266_v45 }
 0x952   : > { %3334 = vmatpush.msrb.mxu0 %v3236_v46 }
 0x953   : > { %3376 = vmatpush.msra.mxu1 %v3251_v44  ;;  %3419 = vmatpush.msra.mxu2 %v3265_v50 }
 0x954   : > { %3335 = vmatpush.msrb.mxu0 %v3235_v48 }
 0x955   : > { %3377 = vmatpush.msra.mxu1 %v3250_v8 }
 0x956   : > { %3336 = vmatpush.msrb.mxu0 %v3234_v53 }
 0x957   : > { %3378 = vmatpush.msra.mxu1 %v3249_v47 }
 0x958   : > { %3337 = vmatpush.msrb.mxu0 %v3233_v54 }
 0x95a   : > { %3501 = vmatpush.msra.mxu0 %v3297_v7 }
 0x9b3   : > { %v2969_v57 = vpop.f32.mrf.mxu2 }
 0x9b4   : > { %v2970_v59 = vadd.f32 %v2969_v57, %v2838_v56 }
 0x9b5   : > { %v2929_v60 = vpop.f32.mrf.mxu0  ;;  %v2949_v61 = vpop.f32.mrf.mxu1 }
 0x9b6   : > { %v2930_v36 = vadd.f32 %v2929_v60, %v2838_v56  ;;  %v2950_v62 = vadd.f32 %v2949_v61, %v2838_v56  ;;  %3016 = vrot.lane.b32.xlu2 %v2970_v59, %s8180_s24  ;;  %v3295_v60 = vld [vmem:[%s8105_s6 + $0x1f0] sm:$0xff] }
 0x9b8   : > { %3012 = vrot.lane.b32.xlu0 %v2930_v36, %s8180_s24  ;;  %3014 = vrot.lane.b32.xlu1 %v2950_v62, %s8180_s24 }
 0x9be   : > { %3037 = vrot.lane.b32.xlu2 %v2970_v59, %s8132_s2 }
 0x9c0   : > { %3033 = vrot.lane.b32.xlu0 %v2930_v36, %s8132_s2  ;;  %3035 = vrot.lane.b32.xlu1 %v2950_v62, %s8132_s2  ;;  %s8141_s2 = smov 3  }
 0x9c3   : > { %v2989_v5 = vpop.f32.mrf.mxu3 }
 0x9c4   : > { %v2990_v30 = vadd.f32 %v2989_v5, %v2838_v56  ;;  %v3291_v5 = vld [vmem:[%s8105_s6 + $0x1d0] sm:$0xff] }
 0x9c6   : > { %3060 = vrot.lane.b32.xlu2 %v2970_v59, %s8134_s0 }
 0x9c8   : > { %3056 = vrot.lane.b32.xlu0 %v2930_v36, %s8134_s0  ;;  %3058 = vrot.lane.b32.xlu1 %v2950_v62, %s8134_s0  ;;  %s8147_s0 = smov 2  }
 0x9ce   : > { %3083 = vrot.lane.b32.xlu2 %v2970_v59, %s8136_s16 }
 0x9d0   : > { %3079 = vrot.lane.b32.xlu0 %v2930_v36, %s8136_s16  ;;  %3081 = vrot.lane.b32.xlu1 %v2950_v62, %s8136_s16  ;;  %s8191_s16 = smov 2  }
 0x9d6   : > { %3106 = vrot.lane.b32.xlu2 %v2970_v59, %s8138_s21 }
 0x9d8   : > { %3102 = vrot.lane.b32.xlu0 %v2930_v36, %s8138_s21  ;;  %3104 = vrot.lane.b32.xlu1 %v2950_v62, %s8138_s21  ;;  %s8186_s21 = smov 7  }
 0x9de   : > { %3128 = vrot.lane.b32.xlu2 %v2970_v59, %s8141_s2 }
 0x9e0   : > { %3124 = vrot.lane.b32.xlu0 %v2930_v36, %s8141_s2  ;;  %3126 = vrot.lane.b32.xlu1 %v2950_v62, %s8141_s2  ;;  %s6365_s2 = smov 96  }
 0x9e6   : > { %3151 = vrot.lane.b32.xlu2 %v2970_v59, %s8147_s0 }
 0x9e8   : > { %3147 = vrot.lane.b32.xlu0 %v2930_v36, %s8147_s0  ;;  %3149 = vrot.lane.b32.xlu1 %v2950_v62, %s8147_s0  ;;  %s6357_s0 = smov 127  }
 0x9ee   : > { %3174 = vrot.lane.b32.xlu2 %v2970_v59, %s8149_s27  ;;  %v3296_v59 = vld [vmem:[%s8105_s6 + $0x1f8] sm:$0xff] }
 0x9ef   : > { %3445 = vmatpush.msrb.mxu2 %v3296_v59  ;;  %5693 = vmatpush.msrb.mxu3 %v3296_v59 }
 0x9f0   : > { %3170 = vrot.lane.b32.xlu0 %v2930_v36, %s8149_s27  ;;  %3172 = vrot.lane.b32.xlu1 %v2950_v62, %s8149_s27  ;;  %v3294_v36 = vld [vmem:[%s8105_s6 + $0x1e8] sm:$0xff]  ;;  %s8193_s27 = smov 118  }
 0x9f1   : > { %3446 = vmatpush.msrb.mxu2 %v3295_v60  ;;  %5694 = vmatpush.msrb.mxu3 %v3295_v60 }
 0x9f3   : > { %3447 = vmatpush.msrb.mxu2 %v3294_v36  ;;  %5695 = vmatpush.msrb.mxu3 %v3294_v36 }
 0x9f5   : > { %3448 = vmatpush.msrb.mxu2 %v3293_v4  ;;  %5696 = vmatpush.msrb.mxu3 %v3293_v4 }
 0x9f6   : > { %3062 = vrot.lane.b32.xlu2 %v2990_v30, %s8185_s25 }
 0x9f7   : > { %3449 = vmatpush.msrb.mxu2 %v3292_v24  ;;  %5697 = vmatpush.msrb.mxu3 %v3292_v24 }
 0x9f8   : > { %3018 = vrot.lane.b32.xlu0 %v2990_v30, %s8180_s24  ;;  %3039 = vrot.lane.b32.xlu1 %v2990_v30, %s8186_s21 }
 0x9f9   : > { %3450 = vmatpush.msrb.mxu2 %v3291_v5  ;;  %5698 = vmatpush.msrb.mxu3 %v3291_v5 }
 0x9fb   : > { %3451 = vmatpush.msrb.mxu2 %v3290_v12  ;;  %5699 = vmatpush.msrb.mxu3 %v3290_v12 }
 0x9fd   : > { %3452 = vmatpush.msrb.mxu2 %v3289_v58  ;;  %5700 = vmatpush.msrb.mxu3 %v3289_v58 }
 0x9fe   : > { %3130 = vrot.lane.b32.xlu2 %v2990_v30, %s8187_s28 }
 0x9ff   : > { %3453 = vmatpush.msrb.mxu2 %v3288_v32  ;;  %5701 = vmatpush.msrb.mxu3 %v3288_v32 }
 0xa00   : > { %3085 = vrot.lane.b32.xlu0 %v2990_v30, %s8188_s3  ;;  %3108 = vrot.lane.b32.xlu1 %v2990_v30, %s8189_s4 }
 0xa01   : > { %3454 = vmatpush.msrb.mxu2 %v3287_v35  ;;  %5702 = vmatpush.msrb.mxu3 %v3287_v35 }
 0xa03   : > { %3455 = vmatpush.msrb.mxu2 %v3286_v3  ;;  %5703 = vmatpush.msrb.mxu3 %v3286_v3 }
 0xa05   : > { %3456 = vmatpush.msrb.mxu2 %v3285_v17  ;;  %5704 = vmatpush.msrb.mxu3 %v3285_v17 }
 0xa07   : > { %3457 = vmatpush.msrb.mxu2 %v3284_v18  ;;  %5705 = vmatpush.msrb.mxu3 %v3284_v18 }
 0xa08   : > { %3176 = vrot.lane.b32.xlu0 %v2990_v30, %s8190_s13  ;;  %3153 = vrot.lane.b32.xlu1 %v2990_v30, %s8191_s16 }
 0xa09   : > { %3458 = vmatpush.msrb.mxu2 %v3283_v27  ;;  %5706 = vmatpush.msrb.mxu3 %v3283_v27 }
 0xa0b   : > { %3459 = vmatpush.msrb.mxu2 %v3282_v38  ;;  %5707 = vmatpush.msrb.mxu3 %v3282_v38 }
 0xa0d   : > { %3460 = vmatpush.msrb.mxu2 %v3281_v39  ;;  %5708 = vmatpush.msrb.mxu3 %v3281_v39 }
 0xa10   : > { %v7359_v49 = vpop.permute.xlu2 %3016 }
 0xa18   : > { %v7364_v52 = vpop.permute.xlu2 %3037 }
 0xa20   : > { %v7366_v51 = vpop.permute.xlu2 %3060 }
 0xa28   : > { %v7368_v22 = vpop.permute.xlu2 %3083 }
 0xa2a   : > { %v3013_v23 = vpop.permute.xlu0 %3012  ;;  %v3015_v55 = vpop.permute.xlu1 %3014 }
 0xa2b   : > { %3028 = vst.msk [vmem:[#allocation4] sm:$0xff] %vm919_vm12, %v3013_v23  ;;  %v3020_v56 = vsel %vm498_vm1, %v3013_v23, %v3015_v55  ;;  %v3021_v57 = vsel %vm498_vm1, %v3015_v55, %v7359_v49  ;;  %vm3041_vm12 = vcmask 56320  }
 0xa2c   : > { %3379 = vmatmul.f32.vlgmr.msra.gmra.mxu1 %v3020_v56  ;;  %3420 = vmatmul.f32.vlgmr.msra.gmra.mxu2 %v3021_v57 }
 0xa30   : > { %v7380_v61 = vpop.permute.xlu2 %3106 }
 0xa32   : > { %v3034_v62 = vpop.permute.xlu0 %3033  ;;  %v3036_v63 = vpop.permute.xlu1 %3035  ;;  %v3193_v1 = vld [vmem:[#allocation4] sm:$0xff] }
 0xa33   : > { %3051 = vst.msk [vmem:[#allocation4 + $0x28] sm:$0xff] %vm3050_vm7, %v3034_v62  ;;  %v3042_v2 = vsel %vm3041_vm12, %v3034_v62, %v3036_v63  ;;  %v3043_v33 = vsel %vm3041_vm12, %v3036_v63, %v7364_v52  ;;  %3338 = vmatmul.f32.vlgmr.msrb.gmra.mxu0 %v3193_v1 }
 0xa34   : > { %3382 = vmatmul.f32.gmra.mxu1 %v3042_v2  ;;  %3423 = vmatmul.f32.gmra.mxu2 %v3043_v33 }
 0xa38   : > { %v7398_v6 = vpop.permute.xlu2 %3128 }
 0xa3a   : > { %v3057_v14 = vpop.permute.xlu0 %3056  ;;  %v3059_v21 = vpop.permute.xlu1 %3058  ;;  %v3198_v29 = vld [vmem:[#allocation4 + $0x28] sm:$0xff] }
 0xa3b   : > { %3074 = vst.msk [vmem:[#allocation4 + $0x50] sm:$0xff] %vm3073_vm4, %v3057_v14  ;;  %v3065_v30 = vsel %vm3064_vm15, %v3057_v14, %v3059_v21  ;;  %v3066_v37 = vsel %vm3064_vm15, %v3059_v21, %v7366_v51  ;;  %3341 = vmatmul.f32.gmra.mxu0 %v3198_v29  ;;  %vm3187_vm4 = vcmask 1047560  }
 0xa3c   : > { %3385 = vmatmul.f32.gmra.mxu1 %v3065_v30  ;;  %3426 = vmatmul.f32.gmra.mxu2 %v3066_v37 }
 0xa40   : > { %v7418_v9 = vpop.permute.xlu2 %3151 }
 0xa42   : > { %v3080_v10 = vpop.permute.xlu0 %3079  ;;  %v3082_v11 = vpop.permute.xlu1 %3081  ;;  %v3203_v13 = vld [vmem:[#allocation4 + $0x50] sm:$0xff] }
 0xa43   : > { %3097 = vst.msk [vmem:[#allocation4 + $0x78] sm:$0xff] %vm3096_vm10, %v3080_v10  ;;  %v3088_v15 = vsel %vm3087_vm0, %v3080_v10, %v3082_v11  ;;  %v3089_v16 = vsel %vm3087_vm0, %v3082_v11, %v7368_v22  ;;  %3344 = vmatmul.f32.gmra.mxu0 %v3203_v13 }
 0xa44   : > { %3388 = vmatmul.f32.gmra.mxu1 %v3088_v15  ;;  %3429 = vmatmul.f32.gmra.mxu2 %v3089_v16 }
 0xa48   : > { %v7432_v20 = vpop.permute.xlu2 %3174 }
 0xa4a   : > { %v3103_v26 = vpop.permute.xlu0 %3102  ;;  %v3105_v31 = vpop.permute.xlu1 %3104  ;;  %v3208_v19 = vld [vmem:[#allocation4 + $0x78] sm:$0xff] }
 0xa4b   : > { %3119 = vst.msk [vmem:[#allocation4 + $0xa0] sm:$0xff] %vm3118_vm3, %v3103_v26  ;;  %v3110_v28 = vsel %vm547_vm8, %v3103_v26, %v3105_v31  ;;  %v3111_v34 = vsel %vm547_vm8, %v3105_v31, %v7380_v61  ;;  %3347 = vmatmul.f32.gmra.mxu0 %v3208_v19 }
 0xa4c   : > { %3391 = vmatmul.f32.gmra.mxu1 %v3110_v28  ;;  %3432 = vmatmul.f32.gmra.mxu2 %v3111_v34 }
 0xa50   : > { %v3063_v40 = vpop.permute.xlu2 %3062 }
 0xa51   : > { %v3067_v41 = vsel %vm3064_vm15, %v7366_v51, %v3063_v40  ;;  %3078 = vst.msk [vmem:[#allocation4 + $0x70] sm:$0xff] %vm3064_vm15, %v3063_v40  ;;  %vm3178_vm15 = vcmask 7168  }
 0xa52   : > { %v3125_v42 = vpop.permute.xlu0 %3124  ;;  %v3127_v43 = vpop.permute.xlu1 %3126  ;;  %v3213_v44 = vld [vmem:[#allocation4 + $0xa0] sm:$0xff] }
 0xa53   : > { %3142 = vst.msk [vmem:[#allocation4 + $0xc8] sm:$0xff] %vm3141_vm6, %v3125_v42  ;;  %v3133_v25 = vsel %vm3132_vm11, %v3125_v42, %v3127_v43  ;;  %v3134_v8 = vsel %vm3132_vm11, %v3127_v43, %v7398_v6  ;;  %3350 = vmatmul.f32.gmra.mxu0 %v3213_v44 }
 0xa54   : > { %3394 = vmatmul.f32.gmra.mxu1 %v3133_v25  ;;  %3435 = vmatmul.f32.gmra.mxu2 %v3134_v8 }
 0xa58   : > { %v3131_v45 = vpop.permute.xlu2 %3130 }
 0xa59   : > { %v3135_v46 = vsel %vm3132_vm11, %v7398_v6, %v3131_v45  ;;  %3146 = vst.msk [vmem:[#allocation4 + $0xe8] sm:$0xff] %vm3132_vm11, %v3131_v45  ;;  %vm3758_vm11 = vcmask 654912  }
 0xa5a   : > { %v3148_v47 = vpop.permute.xlu0 %3147  ;;  %v3150_v48 = vpop.permute.xlu1 %3149  ;;  %v3218_v50 = vld [vmem:[#allocation4 + $0xc8] sm:$0xff]  ;;  %3760 = vst.msk [vmem:[#allocation5 + $0x8] sm:$0xff] %vm3758_vm11, %v6325_v0 }
 0xa5b   : > { %3165 = vst.msk [vmem:[#allocation4 + $0xf0] sm:$0xff] %vm3164_vm13, %v3148_v47  ;;  %v3156_v53 = vsel %vm3155_vm14, %v3148_v47, %v3150_v48  ;;  %v3157_v54 = vsel %vm3155_vm14, %v3150_v48, %v7418_v9  ;;  %3353 = vmatmul.f32.gmra.mxu0 %v3218_v50 }
 0xa5c   : > { %3397 = vmatmul.f32.gmra.mxu1 %v3156_v53  ;;  %3438 = vmatmul.f32.gmra.mxu2 %v3157_v54  ;;  %3759 = vst.msk [vmem:[#allocation5] sm:$0xff] %vm3758_vm11, %v6325_v0 }
 0xa5d   : > { %3761 = vst.msk [vmem:[#allocation5 + $0x10] sm:$0xff] %vm3758_vm11, %v6325_v0 }
 0xa5e   : > { %3762 = vst.msk [vmem:[#allocation5 + $0x18] sm:$0xff] %vm3758_vm11, %v6325_v0 }
 0xa5f   : > { %3763 = vst.msk [vmem:[#allocation5 + $0x20] sm:$0xff] %vm3758_vm11, %v6325_v0 }
 0xa60   : > { %v3222_v21 = vld [vmem:[#allocation4 + $0xe8] sm:$0xff]  ;;  %3764 = vst.msk [vmem:[#allocation5 + $0x28] sm:$0xff] %vm3758_vm11, %v6325_v0 }
 0xa62   : > { %v3171_v51 = vpop.permute.xlu0 %3170  ;;  %v3173_v23 = vpop.permute.xlu1 %3172  ;;  %v3223_v55 = vld [vmem:[#allocation4 + $0xf0] sm:$0xff] }
 0xa63   : > { %3188 = vst.msk [vmem:[#allocation4 + $0x118] sm:$0xff] %vm3187_vm4, %v3171_v51  ;;  %v3179_v56 = vsel %vm3178_vm15, %v3171_v51, %v3173_v23  ;;  %v3180_v57 = vsel %vm3178_vm15, %v3173_v23, %v7432_v20  ;;  %3356 = vmatmul.f32.gmra.mxu0 %v3223_v55 }
 0xa64   : > { %3400 = vmatmul.f32.gmra.mxu1 %v3179_v56  ;;  %3441 = vmatmul.f32.gmra.mxu2 %v3180_v57 }
 0xa6a   : > { %v3019_v59 = vpop.permute.xlu0 %3018  ;;  %v3040_v60 = vpop.permute.xlu1 %3039  ;;  %v3228_v36 = vld [vmem:[#allocation4 + $0x118] sm:$0xff] }
 0xa6b   : > { %v3022_v62 = vsel %vm498_vm1, %v7359_v49, %v3019_v59  ;;  %3032 = vst.msk [vmem:[#allocation4 + $0x20] sm:$0xff] %vm498_vm1, %v3019_v59  ;;  %v3044_v63 = vsel %vm3041_vm12, %v7364_v52, %v3040_v60  ;;  %3359 = vmatmul.f32.gmra.mxu0 %v3228_v36 }
 0xa6c   : > { %3461 = vmatmul.f32.vlgmr.msrb.gmra.mxu2 %v3022_v62  ;;  %3055 = vst.msk [vmem:[#allocation4 + $0x48] sm:$0xff] %vm3041_vm12, %v3040_v60 }
 0xa72   : > { %v3086_v1 = vpop.permute.xlu0 %3085  ;;  %v3109_v2 = vpop.permute.xlu1 %3108  ;;  %v3197_v33 = vld [vmem:[#allocation4 + $0x20] sm:$0xff] }
 0xa73   : > { %v3090_v4 = vsel %vm3087_vm0, %v7368_v22, %v3086_v1  ;;  %3101 = vst.msk [vmem:[#allocation4 + $0x98] sm:$0xff] %vm3087_vm0, %v3086_v1  ;;  %v3112_v49 = vsel %vm547_vm8, %v7380_v61, %v3109_v2  ;;  %5643 = vmatmul.msk.f32.vlgmr.msra.gmra.mxu0 %vm498_vm1, %v3197_v33  ;;  %v3202_v5 = vld [vmem:[#allocation4 + $0x48] sm:$0xff]  ;;  %v3207_v61 = vld [vmem:[#allocation4 + $0x70] sm:$0xff] }
 0xa74   : > { %3464 = vmatmul.f32.gmra.mxu2 %v3044_v63  ;;  %3123 = vst.msk [vmem:[#allocation4 + $0xc0] sm:$0xff] %vm547_vm8, %v3109_v2  ;;  %vm3569_vm8 = vcmask 523264  }
 0xa7a   : > { %v3177_v52 = vpop.permute.xlu0 %3176  ;;  %v3154_v24 = vpop.permute.xlu1 %3153  ;;  %v3212_v12 = vld [vmem:[#allocation4 + $0x98] sm:$0xff] }
 0xa7b   : > { %v3181_v6 = vsel %vm3178_vm15, %v7432_v20, %v3177_v52  ;;  %3192 = vst.msk [vmem:[#allocation4 + $0x138] sm:$0xff] %vm3178_vm15, %v3177_v52  ;;  %v3158_v22 = vsel %vm3155_vm14, %v7418_v9, %v3154_v24  ;;  %5644 = vmatmul.msk.f32.gmra.mxu0 %vm498_vm1, %v3202_v5  ;;  %v3217_v14 = vld [vmem:[#allocation4 + $0xc0] sm:$0xff] }
 0xa7c   : > { %3467 = vmatmul.f32.gmra.mxu2 %v3067_v41  ;;  %3482 = vmatmul.f32.vlgmr.msrb.gmra.mxu3 %v3181_v6  ;;  %3169 = vst.msk [vmem:[#allocation4 + $0x110] sm:$0xff] %vm3155_vm14, %v3154_v24 }
 0xa82   : > { %v3232_v37 = vld [vmem:[#allocation4 + $0x138] sm:$0xff] }
 0xa83   : > { %5645 = vmatmul.msk.f32.gmra.mxu0 %vm498_vm1, %v3207_v61  ;;  %v3227_v29 = vld [vmem:[#allocation4 + $0x110] sm:$0xff] }
 0xa84   : > { %3470 = vmatmul.f32.gmra.mxu2 %v3090_v4 }
 0xa8b   : > { %5646 = vmatmul.msk.f32.gmra.mxu0 %vm498_vm1, %v3212_v12 }
 0xa8c   : > { %3473 = vmatmul.f32.gmra.mxu2 %v3112_v49 }
 0xa93   : > { %5647 = vmatmul.msk.f32.gmra.mxu0 %vm498_vm1, %v3217_v14 }
 0xa94   : > { %3476 = vmatmul.f32.gmra.mxu2 %v3135_v46 }
 0xa9b   : > { %5648 = vmatmul.msk.f32.gmra.mxu0 %vm498_vm1, %v3222_v21 }
 0xa9c   : > { %3479 = vmatmul.f32.gmra.mxu2 %v3158_v22  ;;  %v3528_v22 = vld [vmem:[%s8104_s5 + $0x10] sm:$0xff] }
 0xaa3   : > { %5649 = vmatmul.msk.f32.gmra.mxu0 %vm498_vm1, %v3227_v29 }
 0xaa9   : > { %v3380_v30 = vpop.f32.mrf.mxu1 }
 0xaab   : > { %5650 = vmatmul.msk.f32.gmra.mxu0 %vm498_vm1, %v3232_v37 }
 0xaaf   : > { %v3421_v58 = vpop.f32.mrf.mxu2 }
 0xab0   : > { %v3339_v7 = vpop.f32.mrf.mxu0 }
 0xab1   : > { %v3381_v32 = vadd.f32 %v3380_v30, %v3339_v7  ;;  %v3383_v35 = vpop.f32.mrf.mxu1 }
 0xab3   : > { %v3422_v9 = vadd.f32 %v3421_v58, %v3381_v32 }
 0xab7   : > { %v3424_v3 = vpop.f32.mrf.mxu2 }
 0xab8   : > { %v3342_v10 = vpop.f32.mrf.mxu0 }
 0xab9   : > { %v3384_v11 = vadd.f32 %v3383_v35, %v3342_v10  ;;  %v3386_v13 = vpop.f32.mrf.mxu1 }
 0xabb   : > { %v3425_v15 = vadd.f32 %v3424_v3, %v3384_v11  ;;  %v3527_v3 = vld [vmem:[%s8104_s5] sm:$0xff] }
 0xabf   : > { %v3427_v16 = vpop.f32.mrf.mxu2 }
 0xac0   : > { %v3345_v17 = vpop.f32.mrf.mxu0 }
 0xac1   : > { %v3387_v18 = vadd.f32 %v3386_v13, %v3345_v17  ;;  %v3389_v20 = vpop.f32.mrf.mxu1 }
 0xac3   : > { %v3428_v27 = vadd.f32 %v3427_v16, %v3387_v18 }
 0xac7   : > { %v3430_v26 = vpop.f32.mrf.mxu2 }
 0xac8   : > { %v3348_v31 = vpop.f32.mrf.mxu0 }
 0xac9   : > { %v3392_v19 = vpop.f32.mrf.mxu1  ;;  %v3390_v36 = vadd.f32 %v3389_v20, %v3348_v31 }
 0xacb   : > { %v3431_v62 = vadd.f32 %v3430_v26, %v3390_v36  ;;  %v7507_v26 = vld [vmem:[%s8104_s5 + $0x18] sm:$0xff] }
 0xacf   : > { %v3433_v28 = vpop.f32.mrf.mxu2 }
 0xad0   : > { %v3351_v34 = vpop.f32.mrf.mxu0 }
 0xad1   : > { %v3393_v38 = vadd.f32 %v3392_v19, %v3351_v34  ;;  %v3395_v40 = vpop.f32.mrf.mxu1  ;;  %v6359_v19 = vmov 0  }
 0xad2   : > { %6040 = vset.pattern.permute.xlu0 %v6359_v19  ;;  %6039 = vset.pattern.permute.xlu2 %v6359_v19 }
 0xad3   : > { %v3434_v39 = vadd.f32 %v3433_v28, %v3393_v38 }
 0xad7   : > { %v3436_v41 = vpop.f32.mrf.mxu2 }
 0xad8   : > { %v3354_v42 = vpop.f32.mrf.mxu0 }
 0xad9   : > { %v3398_v25 = vpop.f32.mrf.mxu1  ;;  %v3396_v6 = vadd.f32 %v3395_v40, %v3354_v42 }
 0xadb   : > { %v3437_v61 = vadd.f32 %v3436_v41, %v3396_v6 }
 0xadf   : > { %v3439_v43 = vpop.f32.mrf.mxu2 }
 0xae0   : > { %v3357_v44 = vpop.f32.mrf.mxu0 }
 0xae1   : > { %v3399_v8 = vadd.f32 %v3398_v25, %v3357_v44  ;;  %v3401_v7 = vpop.f32.mrf.mxu1 }
 0xae3   : > { %v3440_v45 = vadd.f32 %v3439_v43, %v3399_v8 }
 0xae7   : > { %v3442_v46 = vpop.f32.mrf.mxu2 }
 0xae8   : > { %v3360_v47 = vpop.f32.mrf.mxu0 }
 0xae9   : > { %v3402_v35 = vadd.f32 %v3401_v7, %v3360_v47  ;;  %v6360_v47 = vmov 1  }
 0xaea   : > { %6041 = vset.pattern.permute.xlu1 %v6360_v47 }
 0xaeb   : > { %v3443_v11 = vadd.f32 %v3442_v46, %v3402_v35 }
 0xaef   : > { %v3462_v48 = vpop.f32.mrf.mxu2 }
 0xaf0   : > { %v3503_v50 = vpop.f32.mrf.mxu0  ;;  %v3463_v53 = vadd.f32 %v3462_v48, %v3422_v9 }
 0xaf2   : > { %v3504_v54 = vadd.f32 %v3503_v50, %v3463_v53 }
 0xaf7   : > { %v3465_v51 = vpop.f32.mrf.mxu2 }
 0xaf8   : > { %v3506_v23 = vpop.f32.mrf.mxu0  ;;  %v3466_v55 = vadd.f32 %v3465_v51, %v3425_v15 }
 0xafa   : > { %v3507_v56 = vadd.f32 %v3506_v23, %v3466_v55 }
 0xafc   : > { %v6034_v57 = vpack.i.bf16 %v3504_v54, %v3507_v56 }
 0xaff   : > { %v3468_v59 = vpop.f32.mrf.mxu2  ;;  %v3483_v10 = vpop.f32.mrf.mxu3 }
 0xb00   : > { %v3509_v60 = vpop.f32.mrf.mxu0  ;;  %v3469_v63 = vadd.f32 %v3468_v59, %v3428_v27  ;;  %v3484_v15 = vadd.f32 %v3483_v10, %v3443_v11  ;;  %v7502_v27 = vld [vmem:[%s8104_s5 + $0x8] sm:$0xff] }
 0xb02   : > { %v3510_v4 = vadd.f32 %v3509_v60, %v3469_v63 }
 0xb07   : > { %v3471_v1 = vpop.f32.mrf.mxu2 }
 0xb08   : > { %v3512_v2 = vpop.f32.mrf.mxu0  ;;  %v3472_v33 = vadd.f32 %v3471_v1, %v3431_v62  ;;  %v6361_v62 = vmov 64.0  }
 0xb09   : > { %6202 = vrcp.f32 %v6361_v62 }
 0xb0a   : > { %v3513_v49 = vadd.f32 %v3512_v2, %v3472_v33 }
 0xb0c   : > { %v6029_v52 = vpack.i.bf16 %v3510_v4, %v3513_v49 }
 0xb0e   : > { %6030 = vrot.lane.b32.xlu1 %v6029_v52, %s6357_s0 }
 0xb0f   : > { %v3474_v24 = vpop.f32.mrf.mxu2  ;;  %v6203_v63 = vpop.eup %6202 }
 0xb10   : > { %v3515_v5 = vpop.f32.mrf.mxu0  ;;  %v3475_v12 = vadd.f32 %v3474_v24, %v3434_v39  ;;  %v3643_v1 = vmul.f32 64.0, %v6203_v63  ;;  %vm3647_vm10 = vweird.f32 %v6203_v63 }
 0xb12   : > { %v3516_v30 = vadd.f32 %v3515_v5, %v3475_v12  ;;  %v3644_v2 = vsub.f32 1.0, %v3643_v1  ;;  %v6362_v5 = vmov 2  }
 0xb14   : > { %v3645_v33 = vmul.f32 %v6203_v63, %v3644_v2 }
 0xb16   : > { %3535 = vrot.lane.b32.xlu1 %v3528_v22, %s6358_s12 }
 0xb17   : > { %v3477_v14 = vpop.f32.mrf.mxu2 }
 0xb18   : > { %v3518_v21 = vpop.f32.mrf.mxu0  ;;  %v3478_v29 = vadd.f32 %v3477_v14, %v3437_v61 }
 0xb1a   : > { %v3519_v37 = vadd.f32 %v3518_v21, %v3478_v29 }
 0xb1c   : > { %v6024_v58 = vpack.i.bf16 %v3516_v30, %v3519_v37 }
 0xb1e   : > { %6025 = vrot.lane.b32.xlu0 %v6024_v58, %s6357_s0 }
 0xb1f   : > { %v3480_v9 = vpop.f32.mrf.mxu2 }
 0xb20   : > { %v3521_v32 = vpop.f32.mrf.mxu0  ;;  %v3481_v13 = vadd.f32 %v3480_v9, %v3440_v45 }
 0xb22   : > { %v3522_v17 = vadd.f32 %v3521_v32, %v3481_v13 }
 0xb26   : > { %3533 = vrot.lane.b32.xlu0 %v3527_v3, %s6358_s12  ;;  %s8195_s12 = smov 104  }
 0xb28   : > { %v3524_v16 = vpop.f32.mrf.mxu0 }
 0xb29   : > { %v3525_v18 = vadd.f32 %v3524_v16, %v3484_v15 }
 0xb2b   : > { %v6019_v20 = vpack.i.bf16 %v3522_v17, %v3525_v18  ;;  %3609 = vmatpush.msra.mxu2 %v3525_v18 }
 0xb2d   : > { %3610 = vmatpush.msra.mxu2 %v3522_v17  ;;  %6020 = vrot.lane.b32.xlu2 %v6019_v20, %s6357_s0 }
 0xb2e   : > { %3626 = vperm.xlu0 %6040, %v7502_v27  }
 0xb2f   : > { %3611 = vmatpush.msra.mxu2 %v3519_v37  ;;  %v6363_v37 = vmov 63.0  }
 0xb30   : > { %6204 = vrcp.f32 %v6363_v37 }
 0xb31   : > { %3612 = vmatpush.msra.mxu2 %v3516_v30 }
 0xb33   : > { %3613 = vmatpush.msra.mxu2 %v3513_v49 }
 0xb35   : > { %3614 = vmatpush.msra.mxu2 %v3510_v4  ;;  %6035 = vrot.lane.b32.xlu2 %v6034_v57, %s6357_s0  ;;  %v3646_v4 = vadd.f32 %v6203_v63, %v3645_v33 }
 0xb36   : > { %6043 = vset.pattern.permute.xlu0 %v6362_v5  ;;  %v6205_v58 = vpop.eup %6204 }
 0xb37   : > { %3615 = vmatpush.msra.mxu2 %v3507_v56  ;;  %v3648_v49 = vsel %vm3647_vm10, %v6203_v63, %v3646_v4  ;;  %v3662_v7 = vmul.f32 63.0, %v6205_v58  ;;  %vm3666_vm0 = vweird.f32 %v6205_v58 }
 0xb39   : > { %3616 = vmatpush.msra.mxu2 %v3504_v54  ;;  %v3663_v32 = vsub.f32 1.0, %v3662_v7 }
 0xb3a   : > { %5653 = vmatmul.msk.f32.vlgmr.msra.gmra.mxu2 %vm3569_vm8, %v3527_v3 }
 0xb3b   : > { %v3664_v35 = vmul.f32 %v6205_v58, %v3663_v32 }
 0xb3d   : > { %3631 = vperm.xlu2 %6039, %v7507_v26   ;;  %v3665_v9 = vadd.f32 %v6205_v58, %v3664_v35 }
 0xb3f   : > { %v3667_v3 = vsel %vm3666_vm0, %v6205_v58, %v3665_v9 }
 0xb42   : > { %5654 = vmatmul.msk.f32.gmra.mxu2 %vm3569_vm8, %v3528_v22 }
 0xb45   : > { %6042 = vset.pattern.permute.xlu2 %v6360_v47 }
 0xb80   : > { %v6031_v40 = vpop.permute.xlu1 %6030 }
 0xb81   : > { %v6032_v42 = vunpack.i.l.bf16 %v6031_v40  ;;  %v6033_v44 = vunpack.i.h.bf16 %v6031_v40 }
 0xb87   : > { %v6021_v31 = vpop.permute.xlu2 %6020 }
 0xb88   : > { %v6022_v28 = vunpack.i.l.bf16 %v6021_v31  ;;  %v6023_v34 = vunpack.i.h.bf16 %v6021_v31  ;;  %v3536_v46 = vpop.permute.xlu1 %3535 }
 0xb8a   : > { %3582 = vmatpush.msrb.mxu1 %v6022_v28 }
 0xb8c   : > { %3583 = vmatpush.msrb.mxu1 %v6023_v34 }
 0xb8f   : > { %v6036_v43 = vpop.permute.xlu2 %6035 }
 0xb90   : > { %v6026_v38 = vpop.permute.xlu0 %6025  ;;  %v6037_v25 = vunpack.i.l.bf16 %v6036_v43  ;;  %v6038_v8 = vunpack.i.h.bf16 %v6036_v43 }
 0xb91   : > { %v6027_v39 = vunpack.i.l.bf16 %v6026_v38  ;;  %v6028_v41 = vunpack.i.h.bf16 %v6026_v38 }
 0xb93   : > { %3584 = vmatpush.msrb.mxu1 %v6027_v39 }
 0xb95   : > { %3585 = vmatpush.msrb.mxu1 %v6028_v41 }
 0xb97   : > { %3586 = vmatpush.msrb.mxu1 %v6032_v42  ;;  %v3632_v57 = vpop.permute.xlu2 %3631 }
 0xb98   : > { %v3534_v45 = vpop.permute.xlu0 %3533 }
 0xb99   : > { %3587 = vmatpush.msrb.mxu1 %v6033_v44 }
 0xb9b   : > { %3588 = vmatpush.msrb.mxu1 %v6037_v25 }
 0xb9d   : > { %3589 = vmatpush.msrb.mxu1 %v6038_v8 }
 0xb9e   : > { %5651 = vmatmul.msk.f32.vlgmr.msrb.gmra.mxu1 %vm3569_vm8, %v3534_v45 }
 0xba0   : > { %v3627_v53 = vpop.permute.xlu0 %3626 }
 0xba6   : > { %5652 = vmatmul.msk.f32.gmra.mxu1 %vm3569_vm8, %v3536_v46 }
 0xbbd   : > { %v3618_v48 = vpop.f32.mrf.mxu2 }
 0xbc5   : > { %v3621_v55 = vpop.f32.mrf.mxu2 }
 0xc1b   : > { %v3591_v50 = vpop.f32.mrf.mxu1 }
 0xc1c   : > { %v3619_v54 = vadd.f32 %v3618_v48, %v3591_v50 }
 0xc1e   : > { %v3634_v51 = vadd.f32 %v3627_v53, %v3619_v54 }
 0xc20   : > { %v3636_v23 = vsel %vm3569_vm8, %v3634_v51, 0.0 }
 0xc21   : > { %3637 = vadd.xlane.f32.xlu2 %v3636_v23 }
 0xc23   : > { %v3594_v56 = vpop.f32.mrf.mxu1 }
 0xc24   : > { %v3622_v59 = vadd.f32 %v3621_v55, %v3594_v56 }
 0xc26   : > { %v3635_v60 = vadd.f32 %v3632_v57, %v3622_v59 }
 0xc28   : > { %v3639_v36 = vsel %vm3569_vm8, %v3635_v60, 0.0 }
 0xc29   : > { %3640 = vadd.xlane.f32.xlu1 %v3639_v36 }
 0xc42   : > { %3675 = vperm.xlu1 %6041, %v7507_v26  }
 0xc4a   : > { %6044 = vset.pattern.permute.xlu1 %v6362_v5 }
 0xc4b   : > { %3737 = vperm.xlu1 %6044, %v7502_v27  }
 0xc94   : > { %v3638_v52 = vpop.xlane.xlu2 %3637 }
 0xc95   : > { %v3649_v24 = vmul.f32 %v3648_v49, %v3638_v52 }
 0xc97   : > { %v7522_v6 = vsub.f32 %v3634_v51, %v3649_v24 }
 0xc99   : > { %v3653_v22 = vmul.f32 %v7522_v6, %v7522_v6 }
 0xc9b   : > { %v3655_v61 = vsel %vm3569_vm8, %v3653_v22, 0.0 }
 0xc9c   : > { %3656 = vadd.xlane.f32.xlu2 %v3655_v61  ;;  %v3641_v12 = vpop.xlane.xlu1 %3640 }
 0xc9d   : > { %v3650_v14 = vmul.f32 %v3648_v49, %v3641_v12 }
 0xc9f   : > { %v7528_v21 = vsub.f32 %v3635_v60, %v3650_v14 }
 0xca1   : > { %v3654_v29 = vmul.f32 %v7528_v21, %v7528_v21 }
 0xca3   : > { %v3658_v30 = vsel %vm3569_vm8, %v3654_v29, 0.0 }
 0xca4   : > { %3659 = vadd.xlane.f32.xlu0 %v3658_v30 }
 0xcb4   : > { %3671 = vperm.xlu2 %6042, %v7502_v27   ;;  %v3676_v51 = vpop.permute.xlu1 %3675 }
 0xcb8   : > { %3741 = vperm.xlu0 %6043, %v7507_v26  }
 0xcbd   : > { %v3738_v4 = vpop.permute.xlu1 %3737 }
 0xd0f   : > { %v3657_v10 = vpop.xlane.xlu2 %3656 }
 0xd10   : > { %v3668_v11 = vmul.f32 %v3667_v3, %v3657_v10 }
 0xd12   : > { %6206 = vrsqrt.f32 %v3668_v11  ;;  %vm3687_vm3 = vcmp.eq.f32.partialorder %v3668_v11, inf  ;;  %v3690_v39 = vand.u32 2147483648, %v3668_v11  ;;  %vm3689_vm6 = vcmp.eq.f32.partialorder %v3668_v11, 0.0 }
 0xd17   : > { %v3660_v13 = vpop.xlane.xlu0 %3659  ;;  %v3672_v59 = vpop.permute.xlu2 %3671 }
 0xd18   : > { %v6207_v15 = vpop.eup %6206  ;;  %v3669_v16 = vmul.f32 %v3667_v3, %v3660_v13  ;;  %v3678_v63 = vmul.f32 %v3672_v59, %v7522_v6  ;;  %v3679_v6 = vmul.f32 %v3676_v51, %v7528_v21  ;;  %v6364_v21 = vmov 80   ;;  %v7555_v13 = vld [vmem:[%s8106_s7 + $0x10] sm:$0xff] }
 0xd19   : > { %v3681_v17 = vmul.f32 %v6207_v15, %v3668_v11  ;;  %6060 = vset.pattern.permute.xlu0 %v6364_v21  ;;  %v6366_v51 = vmov 81  }
 0xd1a   : > { %6208 = vrsqrt.f32 %v3669_v16  ;;  %vm3699_vm13 = vcmp.eq.f32.partialorder %v3669_v16, inf  ;;  %v3702_v45 = vand.u32 2147483648, %v3669_v16  ;;  %vm3701_vm14 = vcmp.eq.f32.partialorder %v3669_v16, 0.0  ;;  %3874 = vperm.xlu0 %6060, %v7555_v13  }
 0xd1b   : > { %v3682_v18 = vmul.f32 %v6207_v15, %v3681_v17 }
 0xd1d   : > { %v3683_v20 = vmul.f32 0.5, %v3682_v18 }
 0xd1f   : > { %v3684_v27 = vsub.f32 1.5, %v3683_v20 }
 0xd20   : > { %v6209_v26 = vpop.eup %6208 }
 0xd21   : > { %v3685_v31 = vmul.f32 %v6207_v15, %v3684_v27  ;;  %v3693_v28 = vmul.f32 %v6209_v26, %v3669_v16 }
 0xd22   : > { %6076 = vset.pattern.permute.xlu0 %v6366_v51  ;;  %v6372_v51 = vmov 83  }
 0xd23   : > { %v3686_v34 = vmul.f32 %v3685_v31, %v3668_v11  ;;  %v3694_v38 = vmul.f32 %v6209_v26, %v3693_v28  ;;  %6128 = vset.pattern.permute.xlu2 %v6372_v51  ;;  %v4477_v51 = vld [vmem:[%s8109_s10 + $0x38] sm:$0xff] }
 0xd25   : > { %v3695_v40 = vmul.f32 0.5, %v3694_v38  ;;  %v3688_v41 = vsel %vm3687_vm3, %v3668_v11, %v3686_v34  ;;  %v7548_v11 = vld [vmem:[%s8106_s7] sm:$0xff] }
 0xd26   : > { %v3691_v42 = vsel %vm3689_vm6, %v3690_v39, %v3688_v41 }
 0xd27   : > { %v3696_v43 = vsub.f32 1.5, %v3695_v40  ;;  %v3704_v44 = vadd.f32 1e-08, %v3691_v42 }
 0xd29   : > { %v3697_v25 = vmul.f32 %v6209_v26, %v3696_v43  ;;  %6210 = vrcp.f32 %v3704_v44  ;;  %v3717_v55 = vand.u32 2147483648, %v3704_v44  ;;  %v3715_v57 = vand.u32 2147483647, %v3704_v44 }
 0xd2a   : > { %vm3711_vm8 = vweird.f32 %v3704_v44  ;;  %v3742_v32 = vpop.permute.xlu0 %3741 }
 0xd2b   : > { %v3698_v8 = vmul.f32 %v3697_v25, %v3669_v16  ;;  %v3718_v62 = vor.u32 1.1754944e-38, %v3717_v55  ;;  %vm3716_vm0 = vcmp.eq.f32.partialorder %v3715_v57, 8.507059e+37 }
 0xd2d   : > { %v3700_v46 = vsel %vm3699_vm13, %v3669_v16, %v3698_v8 }
 0xd2e   : > { %v3703_v48 = vsel %vm3701_vm14, %v3702_v45, %v3700_v46 }
 0xd2f   : > { %v6211_v50 = vpop.eup %6210  ;;  %v3705_v53 = vadd.f32 1e-08, %v3703_v48 }
 0xd30   : > { %v3707_v54 = vmul.f32 %v6211_v50, %v3704_v44  ;;  %vm3712_vm4 = vweird.f32 %v6211_v50 }
 0xd31   : > { %6212 = vrcp.f32 %v3705_v53  ;;  %vm3713_vm10 = vmor %vm3711_vm8, %vm3712_vm4  ;;  %v3732_v24 = vand.u32 2147483648, %v3705_v53  ;;  %v3730_v12 = vand.u32 2147483647, %v3705_v53  ;;  %vm3726_vm11 = vweird.f32 %v3705_v53 }
 0xd32   : > { %v3708_v23 = vsub.f32 1.0, %v3707_v54  ;;  %vm3773_vm8 = vcmask 588864  }
 0xd33   : > { %v3733_v30 = vor.u32 1.1754944e-38, %v3732_v24  ;;  %vm3731_vm14 = vcmp.eq.f32.partialorder %v3730_v12, 8.507059e+37 }
 0xd34   : > { %v3709_v56 = vmul.f32 %v6211_v50, %v3708_v23 }
 0xd36   : > { %v3710_v60 = vadd.f32 %v6211_v50, %v3709_v56 }
 0xd37   : > { %v6213_v36 = vpop.eup %6212 }
 0xd38   : > { %v3714_v1 = vsel %vm3713_vm10, %v6211_v50, %v3710_v60  ;;  %v3722_v2 = vmul.f32 %v6213_v36, %v3705_v53  ;;  %vm3727_vm3 = vweird.f32 %v6213_v36 }
 0xd39   : > { %v3719_v33 = vsel %vm3716_vm0, %v3718_v62, %v3714_v1  ;;  %vm3728_vm13 = vmor %vm3726_vm11, %vm3727_vm3  ;;  %vm4176_vm3 = vcmask 326656   ;;  %vm4320_vm11 = vcmask 392192  }
 0xd3a   : > { %v3720_v49 = vmul.f32 %v3719_v33, %v3678_v63  ;;  %v3723_v52 = vsub.f32 1.0, %v3722_v2 }
 0xd3c   : > { %v3744_v22 = vadd.f32 %v3738_v4, %v3720_v49  ;;  %v3724_v61 = vmul.f32 %v6213_v36, %v3723_v52 }
 0xd3e   : > { %vm3746_vm6 = vcmp.ge.f32.partialorder %v3744_v22, 0.0  ;;  %v3748_v14 = vmul.f32 0.2, %v3744_v22  ;;  %v3725_v29 = vadd.f32 %v6213_v36, %v3724_v61 }
 0xd40   : > { %v3750_v37 = vsel %vm3746_vm6, %v3744_v22, %v3748_v14  ;;  %v3729_v58 = vsel %vm3728_vm13, %v6213_v36, %v3725_v29  ;;  %vm4364_vm13 = vcmask 589312  }
 0xd41   : > { %3767 = vrot.lane.b32.xlu1 %v3750_v37, %s8180_s24  ;;  %v3734_v7 = vsel %vm3731_vm14, %v3733_v30, %v3729_v58  ;;  %4367 = vst.msk [vmem:[#allocation6 + $0x10] sm:$0xff] %vm4364_vm13, %v6325_v0  ;;  %vm4397_vm14 = vcmask 580664  }
 0xd42   : > { %v3735_v35 = vmul.f32 %v3734_v7, %v3679_v6  ;;  %4365 = vst.msk [vmem:[#allocation6] sm:$0xff] %vm4364_vm13, %v6325_v0 }
 0xd43   : > { %4366 = vst.msk [vmem:[#allocation6 + $0x8] sm:$0xff] %vm4364_vm13, %v6325_v0 }
 0xd44   : > { %v3745_v9 = vadd.f32 %v3742_v32, %v3735_v35  ;;  %v4010_v35 = vld [vmem:[%s8106_s7 + $0x8] sm:$0xff]  ;;  %4368 = vst.msk [vmem:[#allocation6 + $0x18] sm:$0xff] %vm4364_vm13, %v6325_v0 }
 0xd45   : > { %4369 = vst.msk [vmem:[#allocation6 + $0x20] sm:$0xff] %vm4364_vm13, %v6325_v0 }
 0xd46   : > { %vm3747_vm4 = vcmp.ge.f32.partialorder %v3745_v9, 0.0  ;;  %v3749_v3 = vmul.f32 0.2, %v3745_v9  ;;  %4370 = vst.msk [vmem:[#allocation6 + $0x28] sm:$0xff] %vm4364_vm13, %v6325_v0 }
 0xd47   : > { %4371 = vst.msk [vmem:[#allocation6 + $0x30] sm:$0xff] %vm4364_vm13, %v6325_v0 }
 0xd48   : > { %v3751_v10 = vsel %vm3747_vm4, %v3745_v9, %v3749_v3  ;;  %v6369_v9 = vmov 82   ;;  %4372 = vst.msk [vmem:[#allocation6 + $0x38] sm:$0xff] %vm4364_vm13, %v6325_v0  ;;  %vm4406_vm4 = vcmask 572464  }
 0xd49   : > { %3769 = vrot.lane.b32.xlu2 %v3751_v10, %s8180_s24  ;;  %3780 = vrot.lane.b32.xlu1 %v7548_v11, %s8183_s22  ;;  %4373 = vst.msk [vmem:[#allocation6 + $0x40] sm:$0xff] %vm4364_vm13, %v6325_v0 }
 0xd4a   : > { %6107 = vset.pattern.permute.xlu1 %v6369_v9  ;;  %4374 = vst.msk [vmem:[#allocation6 + $0x48] sm:$0xff] %vm4364_vm13, %v6325_v0 }
 0xd4b   : > { %4375 = vst.msk [vmem:[#allocation6 + $0x50] sm:$0xff] %vm4364_vm13, %v6325_v0 }
 0xd4c   : > { %4376 = vst.msk [vmem:[#allocation6 + $0x58] sm:$0xff] %vm4364_vm13, %v6325_v0 }
 0xd4d   : > { %4377 = vst.msk [vmem:[#allocation6 + $0x60] sm:$0xff] %vm4364_vm13, %v6325_v0 }
 0xd4e   : > { %4378 = vst.msk [vmem:[#allocation6 + $0x68] sm:$0xff] %vm4364_vm13, %v6325_v0 }
 0xd4f   : > { %4379 = vst.msk [vmem:[#allocation6 + $0x70] sm:$0xff] %vm4364_vm13, %v6325_v0 }
 0xd50   : > { %4380 = vst.msk [vmem:[#allocation6 + $0x78] sm:$0xff] %vm4364_vm13, %v6325_v0  ;;  %v4476_v0 = vld [vmem:[%s8109_s10 + $0x30] sm:$0xff] }
 0xd8c   : > { %v3875_v48 = vpop.permute.xlu0 %3874 }
 0xda3   : > { %v3770_v15 = vpop.permute.xlu2 %3769 }
 0xda4   : > { %3775 = vst.msk [vmem:[#allocation5 + $0x8] sm:$0xff] %vm3773_vm8, %v3770_v15 }
 0xdab   : > { %v7562_v18 = vld [vmem:[#allocation5 + $0x8] sm:$0xff] }
 0xdb3   : > { %v3768_v16 = vpop.permute.xlu1 %3767 }
 0xdb4   : > { %3774 = vst.msk [vmem:[#allocation5] sm:$0xff] %vm3773_vm8, %v3768_v16 }
 0xdbb   : > { %v7560_v17 = vld [vmem:[#allocation5] sm:$0xff]  ;;  %v3781_v28 = vpop.permute.xlu1 %3780 }
 0xdbc   : > { %3929 = vrot.lane.b32.xlu0 %v7560_v17, %s8179_s30  ;;  %v7568_v20 = vpack.i.bf16 %v7560_v17, %v7562_v18 }
 0xdbe   : > { %6056 = vrot.lane.b32.xlu1 %v7568_v20, %s8192_s14  ;;  %6046 = vrot.lane.b32.xlu2 %v7568_v20, %s8182_s17  ;;  %s8196_s14 = smov 116  }
 0xdc6   : > { %6051 = vrot.lane.b32.xlu2 %v7568_v20, %s8178_s23 }
 0xdce   : > { %3840 = vrot.lane.b32.xlu2 %v7548_v11, %s6365_s2  ;;  %s6373_s2 = smov 88  }
 0xdd6   : > { %3896 = vrot.lane.b32.xlu2 %v7560_v17, %s8182_s17 }
 0xe18   : > { %v6047_v27 = vpop.permute.xlu2 %6046 }
 0xe19   : > { %v6048_v26 = vunpack.i.l.bf16 %v6047_v27  ;;  %v6049_v31 = vunpack.i.h.bf16 %v6047_v27 }
 0xe1b   : > { %3806 = vmatpush.msra.mxu3 %v6048_v26 }
 0xe1d   : > { %3807 = vmatpush.msra.mxu3 %v6049_v31 }
 0xe1e   : > { %5655 = vmatmul.msk.f32.vlgmr.msra.gmra.mxu3 %vm1884_vm5, %v3781_v28 }
 0xe20   : > { %v6052_v34 = vpop.permute.xlu2 %6051 }
 0xe21   : > { %v6053_v38 = vunpack.i.l.bf16 %v6052_v34  ;;  %v6054_v39 = vunpack.i.h.bf16 %v6052_v34 }
 0xe23   : > { %3834 = vmatpush.msrb.mxu3 %v6053_v38 }
 0xe25   : > { %3835 = vmatpush.msrb.mxu3 %v6054_v39 }
 0xe26   : > { %5656 = vmatmul.msk.f32.vlgmr.msrb.gmra.mxu3 %vm1884_vm5, %v7548_v11 }
 0xe28   : > { %v3841_v43 = vpop.permute.xlu2 %3840 }
 0xe2e   : > { %v3930_v62 = vpop.permute.xlu0 %3929 }
 0xe30   : > { %v6057_v40 = vpop.permute.xlu1 %6056  ;;  %v3897_v57 = vpop.permute.xlu2 %3896 }
 0xe31   : > { %v6058_v41 = vunpack.i.l.bf16 %v6057_v40  ;;  %v6059_v42 = vunpack.i.h.bf16 %v6057_v40 }
 0xe33   : > { %3864 = vmatpush.msra.mxu1 %v6058_v41 }
 0xe35   : > { %3865 = vmatpush.msra.mxu1 %v6059_v42 }
 0xe36   : > { %5657 = vmatmul.msk.f32.vlgmr.msra.gmra.mxu1 %vm1884_vm5, %v3841_v43 }
 0xea1   : > { %v3809_v44 = vpop.f32.mrf.mxu3 }
 0xea9   : > { %v3837_v25 = vpop.f32.mrf.mxu3 }
 0xeaa   : > { %v3838_v8 = vadd.f32 %v3837_v25, %v3809_v44 }
 0xeb3   : > { %v3867_v45 = vpop.f32.mrf.mxu1 }
 0xeb4   : > { %v3870_v46 = vadd.f32 %v3867_v45, %v3838_v8 }
 0xeb6   : > { %v3877_v50 = vadd.f32 %v3875_v48, %v3870_v46 }
 0xeb8   : > { %v3879_v53 = vmul.f32 0.2, %v3877_v50  ;;  %vm3878_vm10 = vcmp.ge.f32.partialorder %v3877_v50, 0.0 }
 0xeba   : > { %v3880_v54 = vsel %vm3878_vm10, %v3877_v50, %v3879_v53  ;;  %vm4424_vm10 = vcmask 556064  }
 0xebb   : > { %3882 = vrot.lane.b32.xlu1 %v3880_v54, %s8180_s24 }
 0xf2d   : > { %v3883_v23 = vpop.permute.xlu1 %3882 }
 0xf2e   : > { %3885 = vst.msk [vmem:[#allocation5 + $0x10] sm:$0xff] %vm3773_vm8, %v3883_v23 }
 0xf35   : > { %v7585_v55 = vld [vmem:[#allocation5 + $0x10] sm:$0xff] }
 0xf36   : > { %v7589_v56 = vpack.i.bf16 %v7562_v18, %v7585_v55 }
 0xf38   : > { %6072 = vrot.lane.b32.xlu0 %v7589_v56, %s8193_s27  ;;  %6067 = vrot.lane.b32.xlu1 %v7589_v56, %s8179_s30  ;;  %s8203_s30 = sld [smem:[#allocation25_spill]] }
 0xf39   : > { %6062 = vrot.lane.b32.xlu2 %v7589_v56, %s8182_s17 }
 0xf40   : > { %3997 = vperm.xlu0 %6076, %v7555_v13   ;;  %3891 = vrot.lane.b32.xlu1 %v7548_v11, %s6367_s26  ;;  %s8199_s26 = sld [smem:[#allocation20_spill]] }
 0xf41   : > { %3927 = vrot.lane.b32.xlu2 %v7548_v11, %s8194_s29 }
 0xf48   : > { %6083 = vrot.lane.b32.xlu0 %v7568_v20, %s8181_s15  ;;  %3962 = vrot.lane.b32.xlu1 %v7560_v17, %s8193_s27 }
 0xf49   : > { %3960 = vrot.lane.b32.xlu2 %v7548_v11, %s6368_s19  ;;  %6186 = vset.pattern.permute.xlu0 %v6359_v19 }
 0xf50   : > { %4016 = vrot.lane.b32.xlu0 %v4010_v35, %s8195_s12  ;;  %s5710_s12 = smul.u32 48, %s6500_s20 }
 0xf51   : > { %6078 = vrot.lane.b32.xlu2 %v7568_v20, %s8182_s17 }
 0xf58   : > { %4097 = vrot.lane.b32.xlu0 %v4010_v35, %s6370_s18 }
 0xf93   : > { %v6063_v59 = vpop.permute.xlu2 %6062 }
 0xf94   : > { %v6064_v60 = vunpack.i.l.bf16 %v6063_v59  ;;  %v6065_v36 = vunpack.i.h.bf16 %v6063_v59 }
 0xf96   : > { %3920 = vmatpush.msrb.mxu2 %v6064_v60 }
 0xf98   : > { %3921 = vmatpush.msrb.mxu2 %v6065_v36 }
 0xf9a   : > { %3922 = vmatpush.msrb.mxu2 %v3897_v57 }
 0xf9b   : > { %v3928_v52 = vpop.permute.xlu2 %3927 }
 0xfa3   : > { %v3961_v61 = vpop.permute.xlu2 %3960 }
 0xfaa   : > { %v6073_v63 = vpop.permute.xlu0 %6072  ;;  %v6068_v1 = vpop.permute.xlu1 %6067 }
 0xfab   : > { %v6074_v2 = vunpack.i.l.bf16 %v6073_v63  ;;  %v6069_v33 = vunpack.i.l.bf16 %v6068_v1  ;;  %v6075_v4 = vunpack.i.h.bf16 %v6073_v63  ;;  %v6070_v49 = vunpack.i.h.bf16 %v6068_v1 }
 0xfad   : > { %3953 = vmatpush.msra.mxu3 %v6069_v33  ;;  %3986 = vmatpush.msrb.mxu1 %v6074_v2 }
 0xfaf   : > { %3954 = vmatpush.msra.mxu3 %v6070_v49  ;;  %3987 = vmatpush.msrb.mxu1 %v6075_v4 }
 0xfb1   : > { %3955 = vmatpush.msra.mxu3 %v3930_v62 }
 0xfb2   : > { %v3892_v24 = vpop.permute.xlu1 %3891  ;;  %5659 = vmatmul.msk.f32.vlgmr.msra.gmra.mxu3 %vm2909_vm2, %v3928_v52  ;;  %v3998_v37 = vpop.permute.xlu0 %3997 }
 0xfb3   : > { %5658 = vmatmul.msk.f32.vlgmr.msrb.gmra.mxu2 %vm2909_vm2, %v3892_v24 }
 0xfba   : > { %v3963_v22 = vpop.permute.xlu1 %3962  ;;  %v6084_v15 = vpop.permute.xlu0 %6083 }
 0xfbb   : > { %3988 = vmatpush.msrb.mxu1 %v3963_v22  ;;  %v6085_v43 = vunpack.i.l.bf16 %v6084_v15  ;;  %v6086_v44 = vunpack.i.h.bf16 %v6084_v15 }
 0xfbc   : > { %5660 = vmatmul.msk.f32.vlgmr.msrb.gmra.mxu1 %vm2909_vm2, %v3961_v61  ;;  %vm4034_vm2 = vcmask 261120  }
 0xfc2   : > { %v4017_v34 = vpop.permute.xlu0 %4016 }
 0xfca   : > { %v4098_v54 = vpop.permute.xlu0 %4097 }
0x1035   : > { %v3957_v12 = vpop.f32.mrf.mxu3 }
0x1036   : > { %v3924_v14 = vpop.f32.mrf.mxu2 }
0x1037   : > { %v3958_v29 = vadd.f32 %v3957_v12, %v3924_v14 }
0x1039   : > { %v3990_v30 = vpop.f32.mrf.mxu1 }
0x103a   : > { %v3993_v6 = vadd.f32 %v3990_v30, %v3958_v29 }
0x103c   : > { %v4000_v58 = vadd.f32 %v3998_v37, %v3993_v6 }
0x103e   : > { %v4002_v7 = vmul.f32 0.2, %v4000_v58  ;;  %vm4001_vm5 = vcmp.ge.f32.partialorder %v4000_v58, 0.0 }
0x1040   : > { %v4003_v32 = vsel %vm4001_vm5, %v4000_v58, %v4002_v7  ;;  %vm4433_vm5 = vcmask 547864  }
0x1041   : > { %4005 = vrot.lane.b32.xlu1 %v4003_v32, %s8180_s24 }
0x1049   : > { %4058 = vrot.lane.b32.xlu1 %v7548_v11, %s8180_s24  ;;  %v6079_v11 = vpop.permute.xlu2 %6078 }
0x104a   : > { %v6080_v31 = vunpack.i.l.bf16 %v6079_v11  ;;  %v6081_v28 = vunpack.i.h.bf16 %v6079_v11 }
0x10b3   : > { %v4006_v3 = vpop.permute.xlu1 %4005 }
0x10b4   : > { %4008 = vst.msk [vmem:[#allocation5 + $0x18] sm:$0xff] %vm3773_vm8, %v4006_v3 }
0x10bb   : > { %v7620_v10 = vld [vmem:[#allocation5 + $0x18] sm:$0xff]  ;;  %v4059_v38 = vpop.permute.xlu1 %4058 }
0x10bc   : > { %v7624_v21 = vpack.i.bf16 %v7585_v55, %v7620_v10 }
0x10be   : > { %6093 = vrot.lane.b32.xlu1 %v7624_v21, %s8181_s15  ;;  %6088 = vrot.lane.b32.xlu2 %v7624_v21, %s8182_s17  ;;  %s6371_s15 = smov 40  }
0x10c6   : > { %6098 = vrot.lane.b32.xlu1 %v7624_v21, %s8196_s14  ;;  %4060 = vrot.lane.b32.xlu2 %v4010_v35, %s8180_s24 }
0x10ce   : > { %4137 = vperm.xlu1 %6107, %v7555_v13   ;;  %6103 = vrot.lane.b32.xlu2 %v7568_v20, %s8196_s14 }
0x10d6   : > { %6109 = vrot.lane.b32.xlu1 %v7589_v56, %s8182_s17 }
0x10de   : > { %4201 = vrot.lane.b32.xlu1 %v4010_v35, %s6371_s15  ;;  %s8002_s15 = scalar_lea.vmem %s8110_s11, %s5710_s12 }
0x10e6   : > { %4225 = vrot.lane.b32.xlu1 %v7555_v13, %s6373_s2  ;;  %s5709_s2 = smul.u32 24, %s6500_s20  ;;  %s6377_s20 = smov 126  }
0x10e8   : > { %s8016_s29 = scalar_lea.vmem %s8199_s26, %s5709_s2 }
0x1118   : > { %v6089_v16 = vpop.permute.xlu2 %6088 }
0x1119   : > { %v6090_v27 = vunpack.i.l.bf16 %v6089_v16  ;;  %v6091_v26 = vunpack.i.h.bf16 %v6089_v16 }
0x111b   : > { %4049 = vmatpush.msra.mxu2 %v6090_v27 }
0x111d   : > { %4050 = vmatpush.msra.mxu2 %v6091_v26 }
0x111f   : > { %4051 = vmatpush.msra.mxu2 %v6080_v31  ;;  %v4278_v31 = vld [vmem:[%s8107_s8] sm:$0xff] }
0x1120   : > { %v4061_v39 = vpop.permute.xlu2 %4060 }
0x1121   : > { %4052 = vmatpush.msra.mxu2 %v6081_v28  ;;  %v4062_v8 = vsel %vm498_vm1, %v4059_v38, %v4061_v39  ;;  %v4279_v28 = vld [vmem:[%s8107_s8 + $0x8] sm:$0xff] }
0x1122   : > { %5661 = vmatmul.msk.f32.vlgmr.msra.gmra.mxu2 %vm4034_vm2, %v4017_v34  ;;  %v6374_v34 = vmov 48  }
0x1123   : > { %6144 = vset.pattern.permute.xlu1 %v6374_v34 }
0x1128   : > { %v6104_v46 = vpop.permute.xlu2 %6103 }
0x1129   : > { %v6105_v50 = vunpack.i.l.bf16 %v6104_v46  ;;  %v6106_v53 = vunpack.i.h.bf16 %v6104_v46 }
0x1130   : > { %v6094_v40 = vpop.permute.xlu1 %6093 }
0x1131   : > { %v6095_v41 = vunpack.i.l.bf16 %v6094_v40  ;;  %v6096_v42 = vunpack.i.h.bf16 %v6094_v40 }
0x1133   : > { %4089 = vmatpush.msrb.mxu3 %v6095_v41 }
0x1135   : > { %4090 = vmatpush.msrb.mxu3 %v6096_v42 }
0x1137   : > { %4091 = vmatpush.msrb.mxu3 %v6085_v43 }
0x1138   : > { %v6099_v25 = vpop.permute.xlu1 %6098 }
0x1139   : > { %v6100_v45 = vunpack.i.l.bf16 %v6099_v25  ;;  %4092 = vmatpush.msrb.mxu3 %v6086_v44  ;;  %v6101_v48 = vunpack.i.h.bf16 %v6099_v25 }
0x113a   : > { %5662 = vmatmul.msk.f32.vlgmr.msrb.gmra.mxu3 %vm4034_vm2, %v4062_v8 }
0x113b   : > { %4125 = vmatpush.msra.mxu1 %v6100_v45 }
0x113d   : > { %4126 = vmatpush.msra.mxu1 %v6101_v48 }
0x113f   : > { %4127 = vmatpush.msra.mxu1 %v6105_v50 }
0x1140   : > { %v4138_v62 = vpop.permute.xlu1 %4137 }
0x1141   : > { %4128 = vmatpush.msra.mxu1 %v6106_v53 }
0x1142   : > { %5663 = vmatmul.msk.f32.vlgmr.msra.gmra.mxu1 %vm4034_vm2, %v4098_v54  ;;  %v4478_v54 = vld [vmem:[%s8109_s10 + $0x40] sm:$0xff]  ;;  %vm4451_vm2 = vcmask 531464  }
0x11a5   : > { %v4054_v23 = vpop.f32.mrf.mxu2 }
0x11bd   : > { %v4094_v57 = vpop.f32.mrf.mxu3 }
0x11be   : > { %v4095_v59 = vadd.f32 %v4094_v57, %v4054_v23  ;;  %v4475_v23 = vld [vmem:[%s8109_s10 + $0x28] sm:$0xff]  ;;  %v4474_v57 = vld [vmem:[%s8109_s10 + $0x20] sm:$0xff] }
0x11bf   : > { %v4130_v60 = vpop.f32.mrf.mxu1 }
0x11c0   : > { %v4133_v36 = vadd.f32 %v4130_v60, %v4095_v59  ;;  %v4473_v59 = vld [vmem:[%s8109_s10 + $0x18] sm:$0xff]  ;;  %v4472_v60 = vld [vmem:[%s8109_s10 + $0x10] sm:$0xff] }
0x11c2   : > { %v4140_v63 = vadd.f32 %v4138_v62, %v4133_v36  ;;  %v4471_v36 = vld [vmem:[%s8109_s10 + $0x8] sm:$0xff]  ;;  %v4470_v62 = vld [vmem:[%s8109_s10] sm:$0xff] }
0x11c4   : > { %v4142_v1 = vmul.f32 0.2, %v4140_v63  ;;  %vm4141_vm0 = vcmp.ge.f32.partialorder %v4140_v63, 0.0 }
0x11c6   : > { %v4143_v2 = vsel %vm4141_vm0, %v4140_v63, %v4142_v1  ;;  %vm4479_vm0 = vcmask 588800  }
0x11c7   : > { %4145 = vrot.lane.b32.xlu2 %v4143_v2, %s8180_s24 }
0x11cf   : > { %4161 = vrot.lane.b32.xlu2 %v7560_v17, %s8182_s17 }
0x11d7   : > { %6114 = vrot.lane.b32.xlu2 %v7589_v56, %s8183_s22  ;;  %v6110_v56 = vpop.permute.xlu1 %6109 }
0x11df   : > { %4266 = vperm.xlu2 %6128, %v7555_v13   ;;  %v4202_v52 = vpop.permute.xlu1 %4201 }
0x11e7   : > { %6135 = vrot.lane.b32.xlu2 %v7624_v21, %s8182_s17  ;;  %v4226_v58 = vpop.permute.xlu1 %4225 }
0x11e8   : > { %6145 = vset.pattern.permute.xlu2 %v6374_v34 }
0x11ef   : > { %4293 = vperm.xlu2 %6145, %v4279_v28  }
0x11f7   : > { %6188 = vset.pattern.permute.xlu2 %v6359_v19 }
0x1221   : > { %v4146_v33 = vpop.permute.xlu2 %4145 }
0x1222   : > { %4148 = vst.msk [vmem:[#allocation5 + $0x20] sm:$0xff] %vm3773_vm8, %v4146_v33 }
0x1229   : > { %v4154_v4 = vld [vmem:[#allocation5 + $0x20] sm:$0xff]  ;;  %v4162_v24 = vpop.permute.xlu2 %4161 }
0x122a   : > { %v6123_v49 = vpack.i.bf16 %v7620_v10, %v4154_v4  ;;  %4216 = vmatpush.msra.mxu3 %v4154_v4 }
0x122c   : > { %6119 = vrot.lane.b32.xlu0 %v6123_v49, %s8182_s17  ;;  %4217 = vmatpush.msra.mxu3 %v7620_v10 }
0x122e   : > { %4218 = vmatpush.msra.mxu3 %v7585_v55  ;;  %v6111_v55 = vunpack.i.l.bf16 %v6110_v56 }
0x1230   : > { %4219 = vmatpush.msra.mxu3 %v7562_v18  ;;  %v6112_v18 = vunpack.i.h.bf16 %v6110_v56 }
0x1231   : > { %v6115_v30 = vpop.permute.xlu2 %6114 }
0x1232   : > { %4220 = vmatpush.msra.mxu3 %v7560_v17  ;;  %v6117_v37 = vunpack.i.h.bf16 %v6115_v30 }
0x1233   : > { %5665 = vmatmul.msk.f32.vlgmr.msra.gmra.mxu3 %vm4176_vm3, %v4202_v52 }
0x1234   : > { %6124 = vrot.lane.b32.xlu0 %v6123_v49, %s8183_s22  ;;  %4535 = vmatpush.msrb.mxu3 %v4478_v54 }
0x1236   : > { %4536 = vmatpush.msrb.mxu3 %v4477_v51 }
0x1238   : > { %4537 = vmatpush.msrb.mxu3 %v4476_v0 }
0x1239   : > { %v4267_v21 = vpop.permute.xlu2 %4266 }
0x123a   : > { %4538 = vmatpush.msrb.mxu3 %v4475_v23 }
0x123c   : > { %4227 = vrot.lane.b32.xlu0 %v7560_v17, %s8183_s22  ;;  %v6116_v17 = vunpack.i.l.bf16 %v6115_v30  ;;  %4539 = vmatpush.msrb.mxu3 %v4474_v57 }
0x123e   : > { %4540 = vmatpush.msrb.mxu3 %v4473_v59 }
0x1240   : > { %4541 = vmatpush.msrb.mxu3 %v4472_v60 }
0x1241   : > { %v6136_v39 = vpop.permute.xlu2 %6135 }
0x1242   : > { %v6137_v41 = vunpack.i.l.bf16 %v6136_v39  ;;  %v6138_v43 = vunpack.i.h.bf16 %v6136_v39  ;;  %4542 = vmatpush.msrb.mxu3 %v4471_v36  ;;  %v4593_v36 = vld [vmem:[%s8108_s9] sm:$0xff] }
0x1244   : > { %4543 = vmatpush.msrb.mxu3 %v4470_v62 }
0x1249   : > { %v4294_v48 = vpop.permute.xlu2 %4293 }
0x129e   : > { %v6120_v22 = vpop.permute.xlu0 %6119 }
0x129f   : > { %v6121_v61 = vunpack.i.l.bf16 %v6120_v22  ;;  %v6122_v12 = vunpack.i.h.bf16 %v6120_v22 }
0x12a1   : > { %4191 = vmatpush.msrb.mxu2 %v6121_v61 }
0x12a3   : > { %4192 = vmatpush.msrb.mxu2 %v6122_v12 }
0x12a5   : > { %4193 = vmatpush.msrb.mxu2 %v6111_v55 }
0x12a6   : > { %v6125_v14 = vpop.permute.xlu0 %6124 }
0x12a7   : > { %v6126_v29 = vunpack.i.l.bf16 %v6125_v14  ;;  %4194 = vmatpush.msrb.mxu2 %v6112_v18  ;;  %v6127_v6 = vunpack.i.h.bf16 %v6125_v14 }
0x12a9   : > { %4195 = vmatpush.msrb.mxu2 %v4162_v24  ;;  %4255 = vmatpush.msrb.mxu1 %v6126_v29 }
0x12aa   : > { %5664 = vmatmul.msk.f32.vlgmr.msrb.gmra.mxu2 %vm4176_vm3, %v7555_v13 }
0x12ab   : > { %4256 = vmatpush.msrb.mxu1 %v6127_v6 }
0x12ad   : > { %4257 = vmatpush.msrb.mxu1 %v6116_v17 }
0x12ae   : > { %v4228_v7 = vpop.permute.xlu0 %4227 }
0x12af   : > { %4258 = vmatpush.msrb.mxu1 %v6117_v37 }
0x12b1   : > { %4259 = vmatpush.msrb.mxu1 %v4228_v7 }
0x12b2   : > { %5666 = vmatmul.msk.f32.vlgmr.msrb.gmra.mxu1 %vm4176_vm3, %v4226_v58  ;;  %vm4415_vm3 = vcmask 564264  }
0x12b6   : > { %v4222_v32 = vpop.f32.mrf.mxu3 }
0x132d   : > { %v4197_v35 = vpop.f32.mrf.mxu2 }
0x132e   : > { %v4223_v9 = vadd.f32 %v4222_v32, %v4197_v35 }
0x132f   : > { %v4261_v3 = vpop.f32.mrf.mxu1 }
0x1330   : > { %v4264_v10 = vadd.f32 %v4261_v3, %v4223_v9 }
0x1332   : > { %v4269_v11 = vadd.f32 %v4267_v21, %v4264_v10 }
0x1334   : > { %v4271_v15 = vmul.f32 0.2, %v4269_v11  ;;  %vm4270_vm6 = vcmp.ge.f32.partialorder %v4269_v11, 0.0 }
0x1336   : > { %v4272_v13 = vsel %vm4270_vm6, %v4269_v11, %v4271_v15 }
0x1337   : > { %4274 = vrot.lane.b32.xlu0 %v4272_v13, %s8180_s24 }
0x133f   : > { %6140 = vrot.lane.b32.xlu0 %v7568_v20, %s8182_s17 }
0x13a9   : > { %v4275_v16 = vpop.permute.xlu0 %4274 }
0x13aa   : > { %4277 = vst.msk [vmem:[#allocation5 + $0x28] sm:$0xff] %vm3773_vm8, %v4275_v16 }
0x13b1   : > { %v4285_v27 = vld [vmem:[#allocation5 + $0x28] sm:$0xff]  ;;  %v6141_v42 = vpop.permute.xlu0 %6140 }
0x13b2   : > { %v6129_v26 = vpack.i.bf16 %v4154_v4, %v4285_v27  ;;  %v6142_v44 = vunpack.i.l.bf16 %v6141_v42  ;;  %v6143_v25 = vunpack.i.h.bf16 %v6141_v42 }
0x13b4   : > { %6130 = vrot.lane.b32.xlu1 %v6129_v26, %s8182_s17 }
0x13bc   : > { %4288 = vperm.xlu1 %6144, %v4278_v31  }
0x13c4   : > { %6187 = vset.pattern.permute.xlu1 %v6359_v19 }
0x1426   : > { %v6131_v20 = vpop.permute.xlu1 %6130 }
0x1427   : > { %v6132_v38 = vunpack.i.l.bf16 %v6131_v20  ;;  %v6133_v40 = vunpack.i.h.bf16 %v6131_v20 }
0x1429   : > { %4335 = vmatpush.msra.mxu2 %v6132_v38 }
0x142b   : > { %4336 = vmatpush.msra.mxu2 %v6133_v40 }
0x142d   : > { %4337 = vmatpush.msra.mxu2 %v6137_v41 }
0x142e   : > { %v4289_v8 = vpop.permute.xlu1 %4288 }
0x142f   : > { %4338 = vmatpush.msra.mxu2 %v6138_v43 }
0x1431   : > { %4339 = vmatpush.msra.mxu2 %v6142_v44 }
0x1433   : > { %4340 = vmatpush.msra.mxu2 %v6143_v25 }
0x1434   : > { %5667 = vmatmul.msk.f32.vlgmr.msra.gmra.mxu2 %vm4320_vm11, %v4278_v31 }
0x143c   : > { %5668 = vmatmul.msk.f32.gmra.mxu2 %vm4320_vm11, %v4279_v28 }
0x14b7   : > { %v4342_v45 = vpop.f32.mrf.mxu2 }
0x14b8   : > { %v4343_v46 = vadd.f32 %v4342_v45, %v4289_v8 }
0x14ba   : > { %4391 = vrot.lane.b32.xlu2 %v4343_v46, %s8186_s21  ;;  %4383 = vrot.lane.b32.xlu0 %v4343_v46, %s8180_s24 }
0x14bf   : > { %v4345_v50 = vpop.f32.mrf.mxu2 }
0x14c0   : > { %v4346_v53 = vadd.f32 %v4345_v50, %v4294_v48 }
0x14c2   : > { %4385 = vrot.lane.b32.xlu1 %v4346_v53, %s8180_s24  ;;  %4402 = vrot.lane.b32.xlu2 %v4346_v53, %s8185_s25 }
0x14c3   : > { %4393 = vrot.lane.b32.xlu0 %v4346_v53, %s8186_s21 }
0x14ca   : > { %4400 = vrot.lane.b32.xlu1 %v4343_v46, %s8185_s25  ;;  %4418 = vrot.lane.b32.xlu2 %v4343_v46, %s8189_s4  ;;  %s8200_s25 = sld [smem:[#allocation24_spill]] }
0x14cb   : > { %4409 = vrot.lane.b32.xlu0 %v4343_v46, %s8188_s3 }
0x14d0   : > { %s8030_s21 = scalar_lea.vmem %s8200_s25, %s5709_s2 }
0x14d2   : > { %4411 = vrot.lane.b32.xlu1 %v4346_v53, %s8188_s3  ;;  %4429 = vrot.lane.b32.xlu2 %v4346_v53, %s8187_s28  ;;  %s8202_s3 = sld [smem:[#allocation14_spill]] }
0x14d3   : > { %4420 = vrot.lane.b32.xlu0 %v4346_v53, %s8189_s4 }
0x14d8   : > { %s5689_s19 = sshll.u32 %s8202_s3, 2 }
0x14d9   : > { %s5407_s1 = scalar_lea.hbm %s8203_s30, %s5689_s19 }
0x14da   : > { %4427 = vrot.lane.b32.xlu1 %v4343_v46, %s8187_s28  ;;  %4445 = vrot.lane.b32.xlu2 %v4343_v46, %s8190_s13 }
0x14db   : > { %4436 = vrot.lane.b32.xlu0 %v4343_v46, %s8191_s16 }
0x14e2   : > { %4438 = vrot.lane.b32.xlu1 %v4346_v53, %s8191_s16 }
0x14e3   : > { %4447 = vrot.lane.b32.xlu0 %v4346_v53, %s8190_s13 }
0x1514   : > { %v4392_v63 = vpop.permute.xlu2 %4391 }
0x1515   : > { %4398 = vst.msk [vmem:[#allocation6 + $0x10] sm:$0xff] %vm4397_vm14, %v4392_v63 }
0x151c   : > { %v4403_v1 = vpop.permute.xlu2 %4402  ;;  %v4456_v14 = vld [vmem:[#allocation6 + $0x10] sm:$0xff] }
0x151d   : > { %4408 = vst.msk [vmem:[#allocation6 + $0x28] sm:$0xff] %vm4406_vm4, %v4403_v1 }
0x1524   : > { %v4419_v2 = vpop.permute.xlu2 %4418  ;;  %v4459_v7 = vld [vmem:[#allocation6 + $0x28] sm:$0xff] }
0x1525   : > { %4425 = vst.msk [vmem:[#allocation6 + $0x40] sm:$0xff] %vm4424_vm10, %v4419_v2 }
0x152c   : > { %v4430_v33 = vpop.permute.xlu2 %4429  ;;  %v4384_v4 = vpop.permute.xlu0 %4383  ;;  %v4462_v9 = vld [vmem:[#allocation6 + $0x40] sm:$0xff] }
0x152d   : > { %4435 = vst.msk [vmem:[#allocation6 + $0x58] sm:$0xff] %vm4433_vm5, %v4430_v33 }
0x152e   : > { %4389 = vst.msk [vmem:[#allocation6] sm:$0xff] %vm3773_vm8, %v4384_v4 }
0x1534   : > { %v4386_v49 = vpop.permute.xlu1 %4385  ;;  %v4446_v56 = vpop.permute.xlu2 %4445  ;;  %v4465_v21 = vld [vmem:[#allocation6 + $0x58] sm:$0xff] }
0x1535   : > { %4390 = vst.msk [vmem:[#allocation6 + $0x8] sm:$0xff] %vm3773_vm8, %v4386_v49  ;;  %v4394_v52 = vpop.permute.xlu0 %4393  ;;  %v4454_v24 = vld [vmem:[#allocation6] sm:$0xff]  ;;  %vm4442_vm8 = vcmask 539664   ;;  %v4594_v49 = vld [vmem:[%s8108_s9 + $0x18] sm:$0xff] }
0x1536   : > { %4452 = vst.msk [vmem:[#allocation6 + $0x70] sm:$0xff] %vm4451_vm2, %v4446_v56  ;;  %5669 = vmatmul.msk.f32.vlgmr.msrb.gmra.mxu3 %vm4479_vm0, %v4454_v24 }
0x1537   : > { %4399 = vst.msk [vmem:[#allocation6 + $0x18] sm:$0xff] %vm4397_vm14, %v4394_v52 }
0x153c   : > { %v4401_v22 = vpop.permute.xlu1 %4400  ;;  %v4455_v61 = vld [vmem:[#allocation6 + $0x8] sm:$0xff] }
0x153d   : > { %4407 = vst.msk [vmem:[#allocation6 + $0x20] sm:$0xff] %vm4406_vm4, %v4401_v22  ;;  %v4410_v12 = vpop.permute.xlu0 %4409  ;;  %v4468_v13 = vld [vmem:[#allocation6 + $0x70] sm:$0xff] }
0x153e   : > { %4416 = vst.msk [vmem:[#allocation6 + $0x30] sm:$0xff] %vm4415_vm3, %v4410_v12  ;;  %5670 = vmatmul.msk.f32.gmra.mxu3 %vm4479_vm0, %v4455_v61  ;;  %v4457_v6 = vld [vmem:[#allocation6 + $0x18] sm:$0xff] }
0x1544   : > { %v4412_v55 = vpop.permute.xlu1 %4411  ;;  %v4458_v58 = vld [vmem:[#allocation6 + $0x20] sm:$0xff] }
0x1545   : > { %4417 = vst.msk [vmem:[#allocation6 + $0x38] sm:$0xff] %vm4415_vm3, %v4412_v55  ;;  %v4421_v18 = vpop.permute.xlu0 %4420  ;;  %v4460_v32 = vld [vmem:[#allocation6 + $0x30] sm:$0xff] }
0x1546   : > { %4426 = vst.msk [vmem:[#allocation6 + $0x48] sm:$0xff] %vm4424_vm10, %v4421_v18  ;;  %5671 = vmatmul.msk.f32.gmra.mxu3 %vm4479_vm0, %v4456_v14  ;;  %v4595_v55 = vld [vmem:[%s8108_s9 + $0x30] sm:$0xff]  ;;  %v7801_v18 = vld [vmem:[%s8108_s9 + $0x28] sm:$0xff] }
0x1547   : > { %v7806_v14 = vld [vmem:[%s8108_s9 + $0x88] sm:$0xff] }
0x154c   : > { %v4428_v29 = vpop.permute.xlu1 %4427  ;;  %v4461_v35 = vld [vmem:[#allocation6 + $0x38] sm:$0xff] }
0x154d   : > { %4434 = vst.msk [vmem:[#allocation6 + $0x50] sm:$0xff] %vm4433_vm5, %v4428_v29  ;;  %v4437_v30 = vpop.permute.xlu0 %4436  ;;  %v4463_v3 = vld [vmem:[#allocation6 + $0x48] sm:$0xff] }
0x154e   : > { %4443 = vst.msk [vmem:[#allocation6 + $0x60] sm:$0xff] %vm4442_vm8, %v4437_v30  ;;  %5672 = vmatmul.msk.f32.gmra.mxu3 %vm4479_vm0, %v4457_v6 }
0x1554   : > { %v4439_v17 = vpop.permute.xlu1 %4438  ;;  %v4464_v10 = vld [vmem:[#allocation6 + $0x50] sm:$0xff] }
0x1555   : > { %4444 = vst.msk [vmem:[#allocation6 + $0x68] sm:$0xff] %vm4442_vm8, %v4439_v17  ;;  %v4448_v37 = vpop.permute.xlu0 %4447  ;;  %v4466_v11 = vld [vmem:[#allocation6 + $0x60] sm:$0xff] }
0x1556   : > { %4453 = vst.msk [vmem:[#allocation6 + $0x78] sm:$0xff] %vm4451_vm2, %v4448_v37  ;;  %5673 = vmatmul.msk.f32.gmra.mxu3 %vm4479_vm0, %v4458_v58 }
0x155c   : > { %v4467_v15 = vld [vmem:[#allocation6 + $0x68] sm:$0xff] }
0x155d   : > { %v4469_v16 = vld [vmem:[#allocation6 + $0x78] sm:$0xff] }
0x155e   : > { %5674 = vmatmul.msk.f32.gmra.mxu3 %vm4479_vm0, %v4459_v7  ;;  %v4596_v7 = vld [vmem:[%s8108_s9 + $0x48] sm:$0xff] }
0x1566   : > { %5675 = vmatmul.msk.f32.gmra.mxu3 %vm4479_vm0, %v4460_v32  ;;  %v7816_v32 = vld [vmem:[%s8108_s9 + $0x58] sm:$0xff] }
0x156e   : > { %5676 = vmatmul.msk.f32.gmra.mxu3 %vm4479_vm0, %v4461_v35  ;;  %v7821_v35 = vld [vmem:[%s8108_s9 + $0x40] sm:$0xff] }
0x1576   : > { %5677 = vmatmul.msk.f32.gmra.mxu3 %vm4479_vm0, %v4462_v9 }
0x157e   : > { %5678 = vmatmul.msk.f32.gmra.mxu3 %vm4479_vm0, %v4463_v3 }
0x1586   : > { %5679 = vmatmul.msk.f32.gmra.mxu3 %vm4479_vm0, %v4464_v10 }
0x158e   : > { %5680 = vmatmul.msk.f32.gmra.mxu3 %vm4479_vm0, %v4465_v21  ;;  %v4599_v21 = vld [vmem:[%s8108_s9 + $0x8] sm:$0xff] }
0x1596   : > { %5681 = vmatmul.msk.f32.gmra.mxu3 %vm4479_vm0, %v4466_v11  ;;  %v4597_v11 = vld [vmem:[%s8108_s9 + $0x60] sm:$0xff] }
0x159e   : > { %5682 = vmatmul.msk.f32.gmra.mxu3 %vm4479_vm0, %v4467_v15  ;;  %v7834_v15 = vld [vmem:[%s8108_s9 + $0x10] sm:$0xff] }
0x15a6   : > { %5683 = vmatmul.msk.f32.gmra.mxu3 %vm4479_vm0, %v4468_v13  ;;  %v4609_v13 = vld [vmem:[%s8108_s9 + $0x70] sm:$0xff] }
0x15ae   : > { %5684 = vmatmul.msk.f32.gmra.mxu3 %vm4479_vm0, %v4469_v16  ;;  %v4600_v16 = vld [vmem:[%s8108_s9 + $0x20] sm:$0xff] }
0x15b9   : > { %v4545_v27 = vpop.f32.mrf.mxu3 }
0x15c1   : > { %v4548_v26 = vpop.f32.mrf.mxu3 }
0x15c2   : > { %v6181_v54 = vpack.i.bf16 %v4545_v27, %v4548_v26 }
0x15c9   : > { %v4551_v31 = vpop.f32.mrf.mxu3 }
0x15d1   : > { %v4554_v28 = vpop.f32.mrf.mxu3 }
0x15d2   : > { %v6176_v23 = vpack.i.bf16 %v4551_v31, %v4554_v28 }
0x15d9   : > { %v4557_v34 = vpop.f32.mrf.mxu3 }
0x15e1   : > { %v4560_v20 = vpop.f32.mrf.mxu3 }
0x15e2   : > { %v6171_v8 = vpack.i.bf16 %v4557_v34, %v4560_v20 }
0x15e9   : > { %v4563_v38 = vpop.f32.mrf.mxu3 }
0x15f1   : > { %v4566_v39 = vpop.f32.mrf.mxu3 }
0x15f2   : > { %v6166_v50 = vpack.i.bf16 %v4563_v38, %v4566_v39 }
0x15f9   : > { %v4569_v40 = vpop.f32.mrf.mxu3 }
0x1601   : > { %v4572_v41 = vpop.f32.mrf.mxu3 }
0x1602   : > { %v6161_v0 = vpack.i.bf16 %v4569_v40, %v4572_v41 }
0x1609   : > { %v4575_v42 = vpop.f32.mrf.mxu3 }
0x1611   : > { %v4578_v43 = vpop.f32.mrf.mxu3 }
0x1612   : > { %v6156_v44 = vpack.i.bf16 %v4575_v42, %v4578_v43 }
0x1614   : > { %6157 = vrot.lane.b32.xlu0 %v6156_v44, %s6357_s0 }
0x1619   : > { %v4581_v25 = vpop.f32.mrf.mxu3 }
0x161c   : > { %6172 = vrot.lane.b32.xlu0 %v6171_v8, %s6357_s0 }
0x1621   : > { %v4584_v45 = vpop.f32.mrf.mxu3 }
0x1622   : > { %v6151_v46 = vpack.i.bf16 %v4581_v25, %v4584_v45 }
0x1624   : > { %6152 = vrot.lane.b32.xlu2 %v6151_v46, %s6357_s0  ;;  %4767 = vperm.xlu0 %6186, %v4609_v13  }
0x1629   : > { %v4587_v48 = vpop.f32.mrf.mxu3 }
0x162c   : > { %6167 = vrot.lane.b32.xlu2 %v6166_v50, %s6357_s0  ;;  %6189 = vset.pattern.permute.xlu0 %v6360_v47 }
0x1631   : > { %v4590_v53 = vpop.f32.mrf.mxu3 }
0x1632   : > { %v6146_v51 = vpack.i.bf16 %v4587_v48, %v4590_v53  ;;  %4710 = vmatpush.msra.mxu1 %v4590_v53 }
0x1634   : > { %6182 = vrot.lane.b32.xlu2 %v6181_v54, %s6357_s0  ;;  %6147 = vrot.lane.b32.xlu1 %v6146_v51, %s6357_s0 }
0x1635   : > { %4711 = vmatpush.msra.mxu1 %v4587_v48 }
0x1637   : > { %4712 = vmatpush.msra.mxu1 %v4584_v45 }
0x1639   : > { %4713 = vmatpush.msra.mxu1 %v4581_v25 }
0x163b   : > { %4714 = vmatpush.msra.mxu1 %v4578_v43 }
0x163c   : > { %6162 = vrot.lane.b32.xlu1 %v6161_v0, %s6357_s0  ;;  %4752 = vperm.xlu2 %6188, %v7801_v18  }
0x163d   : > { %4715 = vmatpush.msra.mxu1 %v4575_v42 }
0x163f   : > { %4716 = vmatpush.msra.mxu1 %v4572_v41 }
0x1641   : > { %4717 = vmatpush.msra.mxu1 %v4569_v40 }
0x1643   : > { %4718 = vmatpush.msra.mxu1 %v4566_v39 }
0x1644   : > { %6177 = vrot.lane.b32.xlu1 %v6176_v23, %s6357_s0  ;;  %4762 = vperm.xlu2 %6188, %v7816_v32  }
0x1645   : > { %4719 = vmatpush.msra.mxu1 %v4563_v38 }
0x1647   : > { %4720 = vmatpush.msra.mxu1 %v4560_v20 }
0x1649   : > { %4721 = vmatpush.msra.mxu1 %v4557_v34  ;;  %v4604_v34 = vld [vmem:[%s8108_s9 + $0x80] sm:$0xff] }
0x164b   : > { %4722 = vmatpush.msra.mxu1 %v4554_v28  ;;  %v4603_v28 = vld [vmem:[%s8108_s9 + $0x68] sm:$0xff] }
0x164c   : > { %4772 = vperm.xlu1 %6187, %v7806_v14   ;;  %4747 = vperm.xlu2 %6188, %v7834_v15  }
0x164d   : > { %4723 = vmatpush.msra.mxu1 %v4551_v31  ;;  %v4602_v31 = vld [vmem:[%s8108_s9 + $0x50] sm:$0xff] }
0x164f   : > { %4724 = vmatpush.msra.mxu1 %v4548_v26  ;;  %v4601_v26 = vld [vmem:[%s8108_s9 + $0x38] sm:$0xff] }
0x1651   : > { %4725 = vmatpush.msra.mxu1 %v4545_v27  ;;  %v4598_v27 = vld [vmem:[%s8108_s9 + $0x78] sm:$0xff] }
0x1652   : > { %4726 = vmatmul.f32.vlgmr.msra.gmra.mxu1 %v4593_v36 }
0x1654   : > { %4757 = vperm.xlu1 %6187, %v7821_v35   ;;  %6191 = vset.pattern.permute.xlu2 %v6362_v5 }
0x165a   : > { %4729 = vmatmul.f32.gmra.mxu1 %v4594_v49 }
0x165c   : > { %6190 = vset.pattern.permute.xlu1 %v6360_v47 }
0x1662   : > { %4732 = vmatmul.f32.gmra.mxu1 %v4595_v55 }
0x166a   : > { %4735 = vmatmul.f32.gmra.mxu1 %v4596_v7 }
0x1672   : > { %4738 = vmatmul.f32.gmra.mxu1 %v4597_v11 }
0x167a   : > { %4741 = vmatmul.f32.gmra.mxu1 %v4598_v27 }
0x167e   : > { %v6153_v60 = vpop.permute.xlu2 %6152 }
0x167f   : > { %v6154_v63 = vunpack.i.l.bf16 %v6153_v60  ;;  %v6155_v2 = vunpack.i.h.bf16 %v6153_v60 }
0x1686   : > { %v6158_v1 = vpop.permute.xlu0 %6157  ;;  %v6168_v24 = vpop.permute.xlu2 %6167 }
0x1687   : > { %v6159_v33 = vunpack.i.l.bf16 %v6158_v1  ;;  %v6160_v56 = vunpack.i.h.bf16 %v6158_v1  ;;  %v6169_v61 = vunpack.i.l.bf16 %v6168_v24  ;;  %v6170_v29 = vunpack.i.h.bf16 %v6168_v24 }
0x168e   : > { %v6173_v12 = vpop.permute.xlu0 %6172  ;;  %v6183_v58 = vpop.permute.xlu2 %6182 }
0x168f   : > { %v6174_v30 = vunpack.i.l.bf16 %v6173_v12  ;;  %v6175_v17 = vunpack.i.h.bf16 %v6173_v12  ;;  %v6184_v3 = vunpack.i.l.bf16 %v6183_v58  ;;  %v6185_v10 = vunpack.i.h.bf16 %v6183_v58 }
0x1690   : > { %v6375_v12 = vmov 8.0  }
0x1691   : > { %6214 = vrcp.f32 %v6375_v12 }
0x1696   : > { %v4753_v20 = vpop.permute.xlu2 %4752 }
0x169e   : > { %v4763_v38 = vpop.permute.xlu2 %4762 }
0x16a6   : > { %v6148_v57 = vpop.permute.xlu1 %6147  ;;  %v4748_v40 = vpop.permute.xlu2 %4747 }
0x16a7   : > { %v6149_v59 = vunpack.i.l.bf16 %v6148_v57  ;;  %v6150_v62 = vunpack.i.h.bf16 %v6148_v57 }
0x16a9   : > { %4675 = vmatpush.msrb.mxu0 %v6149_v59 }
0x16ab   : > { %4676 = vmatpush.msrb.mxu0 %v6150_v62 }
0x16ad   : > { %4677 = vmatpush.msrb.mxu0 %v6154_v63 }
0x16ae   : > { %v6163_v4 = vpop.permute.xlu1 %6162 }
0x16af   : > { %4678 = vmatpush.msrb.mxu0 %v6155_v2  ;;  %v6164_v52 = vunpack.i.l.bf16 %v6163_v4  ;;  %v6165_v22 = vunpack.i.h.bf16 %v6163_v4 }
0x16b1   : > { %4679 = vmatpush.msrb.mxu0 %v6159_v33  ;;  %v4768_v33 = vpop.permute.xlu0 %4767 }
0x16b3   : > { %4680 = vmatpush.msrb.mxu0 %v6160_v56 }
0x16b5   : > { %4681 = vmatpush.msrb.mxu0 %v6164_v52 }
0x16b6   : > { %v6178_v6 = vpop.permute.xlu1 %6177 }
0x16b7   : > { %4682 = vmatpush.msrb.mxu0 %v6165_v22  ;;  %v6179_v37 = vunpack.i.l.bf16 %v6178_v6  ;;  %v6180_v9 = vunpack.i.h.bf16 %v6178_v6 }
0x16b9   : > { %4683 = vmatpush.msrb.mxu0 %v6169_v61 }
0x16bb   : > { %4684 = vmatpush.msrb.mxu0 %v6170_v29  ;;  %v6215_v29 = vpop.eup %6214 }
0x16bc   : > { %vm4804_vm6 = vweird.f32 %v6215_v29 }
0x16bd   : > { %4685 = vmatpush.msrb.mxu0 %v6174_v30  ;;  %v4800_v30 = vmul.f32 8.0, %v6215_v29 }
0x16be   : > { %v4773_v8 = vpop.permute.xlu1 %4772 }
0x16bf   : > { %4686 = vmatpush.msrb.mxu0 %v6175_v17  ;;  %v4801_v6 = vsub.f32 1.0, %v4800_v30 }
0x16c1   : > { %4687 = vmatpush.msrb.mxu0 %v6179_v37  ;;  %v4802_v17 = vmul.f32 %v6215_v29, %v4801_v6 }
0x16c3   : > { %4688 = vmatpush.msrb.mxu0 %v6180_v9  ;;  %v4803_v37 = vadd.f32 %v6215_v29, %v4802_v17 }
0x16c5   : > { %4689 = vmatpush.msrb.mxu0 %v6184_v3  ;;  %v7870_v58 = vsel %vm4804_vm6, %v6215_v29, %v4803_v37 }
0x16c6   : > { %v4758_v51 = vpop.permute.xlu1 %4757 }
0x16c7   : > { %4690 = vmatpush.msrb.mxu0 %v6185_v10 }
0x16c8   : > { %4691 = vmatmul.f32.vlgmr.msrb.gmra.mxu0 %v4599_v21 }
0x16cf   : > { %v4727_v39 = vpop.f32.mrf.mxu1 }
0x16d0   : > { %4694 = vmatmul.f32.gmra.mxu0 %v4600_v16 }
0x16d7   : > { %v4730_v42 = vpop.f32.mrf.mxu1 }
0x16d8   : > { %4697 = vmatmul.f32.gmra.mxu0 %v4601_v26 }
0x16df   : > { %v4733_v48 = vpop.f32.mrf.mxu1 }
0x16e0   : > { %4700 = vmatmul.f32.gmra.mxu0 %v4602_v31 }
0x16e7   : > { %v4736_v57 = vpop.f32.mrf.mxu1 }
0x16e8   : > { %4703 = vmatmul.f32.gmra.mxu0 %v4603_v28 }
0x16ef   : > { %v4739_v1 = vpop.f32.mrf.mxu1 }
0x16f0   : > { %4706 = vmatmul.f32.gmra.mxu0 %v4604_v34 }
0x16f7   : > { %v4742_v24 = vpop.f32.mrf.mxu1 }
0x1745   : > { %v4692_v41 = vpop.f32.mrf.mxu0 }
0x1746   : > { %v4728_v43 = vadd.f32 %v4727_v39, %v4692_v41 }
0x1748   : > { %v4775_v44 = vadd.f32 %v4748_v40, %v4728_v43 }
0x174a   : > { %v4781_v25 = vsel %vm498_vm1, %v4775_v44, 0.0 }
0x174b   : > { %4782 = vadd.xlane.f32.xlu2 %v4781_v25 }
0x174d   : > { %v4695_v45 = vpop.f32.mrf.mxu0 }
0x174e   : > { %v4731_v46 = vadd.f32 %v4730_v42, %v4695_v45 }
0x1750   : > { %v4776_v50 = vadd.f32 %v4753_v20, %v4731_v46 }
0x1752   : > { %v4784_v53 = vsel %vm498_vm1, %v4776_v50, 0.0 }
0x1753   : > { %4785 = vadd.xlane.f32.xlu2 %v4784_v53 }
0x1755   : > { %v4698_v54 = vpop.f32.mrf.mxu0 }
0x1756   : > { %v4734_v0 = vadd.f32 %v4733_v48, %v4698_v54 }
0x1758   : > { %v4777_v23 = vadd.f32 %v4758_v51, %v4734_v0 }
0x175a   : > { %v4787_v59 = vsel %vm498_vm1, %v4777_v23, 0.0 }
0x175b   : > { %4788 = vadd.xlane.f32.xlu0 %v4787_v59 }
0x175d   : > { %v4701_v60 = vpop.f32.mrf.mxu0 }
0x175e   : > { %v4737_v36 = vadd.f32 %v4736_v57, %v4701_v60 }
0x1760   : > { %v4778_v62 = vadd.f32 %v4763_v38, %v4737_v36 }
0x1762   : > { %v4790_v63 = vsel %vm498_vm1, %v4778_v62, 0.0 }
0x1763   : > { %4791 = vadd.xlane.f32.xlu1 %v4790_v63 }
0x1765   : > { %v4704_v2 = vpop.f32.mrf.mxu0 }
0x1766   : > { %v4740_v4 = vadd.f32 %v4739_v1, %v4704_v2 }
0x1768   : > { %v4779_v49 = vadd.f32 %v4768_v33, %v4740_v4 }
0x176a   : > { %v4793_v56 = vsel %vm498_vm1, %v4779_v49, 0.0 }
0x176b   : > { %4794 = vadd.xlane.f32.xlu0 %v4793_v56  ;;  %5070 = vperm.xlu2 %6191, %v4609_v13  }
0x176d   : > { %v4707_v52 = vpop.f32.mrf.mxu0 }
0x176e   : > { %v4743_v22 = vadd.f32 %v4742_v24, %v4707_v52 }
0x1770   : > { %v4780_v61 = vadd.f32 %v4773_v8, %v4743_v22 }
0x1772   : > { %v4796_v55 = vsel %vm498_vm1, %v4780_v61, 0.0 }
0x1773   : > { %6198 = vset.pattern.permute.xlu2 %v6360_v47 }
0x177c   : > { %4876 = vperm.xlu1 %6190, %v7806_v14  }
0x177f   : > { %4872 = vperm.xlu0 %6189, %v4609_v13  }
0x1784   : > { %6192 = vset.pattern.permute.xlu1 %v6362_v5 }
0x17a6   : > { %4797 = vadd.xlane.f32.xlu1 %v4796_v55 }
0x17be   : > { %v4783_v7 = vpop.xlane.xlu2 %4782 }
0x17bf   : > { %v4806_v9 = vmul.f32 %v7870_v58, %v4783_v7  ;;  %5074 = vperm.xlu1 %6192, %v7806_v14  }
0x17c1   : > { %v7874_v3 = vsub.f32 %v4775_v44, %v4806_v9 }
0x17c3   : > { %v4818_v10 = vmul.f32 %v7874_v3, %v7874_v3 }
0x17c5   : > { %v4824_v21 = vsel %vm498_vm1, %v4818_v10, 0.0 }
0x17c6   : > { %4825 = vadd.xlane.f32.xlu2 %v4824_v21  ;;  %v4786_v11 = vpop.xlane.xlu2 %4785 }
0x17c7   : > { %v4807_v13 = vmul.f32 %v7870_v58, %v4786_v11  ;;  %6193 = vset.pattern.permute.xlu1 %v6360_v47 }
0x17c9   : > { %v7881_v16 = vsub.f32 %v4776_v50, %v4807_v13 }
0x17cb   : > { %v4819_v27 = vmul.f32 %v7881_v16, %v7881_v16 }
0x17cd   : > { %v4827_v14 = vsel %vm498_vm1, %v4819_v27, 0.0 }
0x17ce   : > { %4828 = vadd.xlane.f32.xlu0 %v4827_v14  ;;  %v4789_v26 = vpop.xlane.xlu0 %4788  ;;  %v7915_v60 = vpop.permute.xlu2 %5070 }
0x17cf   : > { %v4808_v38 = vmul.f32 %v7870_v58, %v4789_v26 }
0x17d1   : > { %v7894_v42 = vsub.f32 %v4777_v23, %v4808_v38  ;;  %v6376_v23 = vmov 7.0  }
0x17d2   : > { %6216 = vrcp.f32 %v6376_v23 }
0x17d3   : > { %v4820_v25 = vmul.f32 %v7894_v42, %v7894_v42 }
0x17d5   : > { %v4830_v45 = vsel %vm498_vm1, %v4820_v25, 0.0 }
0x17d6   : > { %v4792_v31 = vpop.xlane.xlu1 %4791 }
0x17d7   : > { %v4809_v28 = vmul.f32 %v7870_v58, %v4792_v31 }
0x17d9   : > { %v7887_v34 = vsub.f32 %v4778_v62, %v4809_v28 }
0x17db   : > { %v4821_v20 = vmul.f32 %v7887_v34, %v7887_v34 }
0x17dd   : > { %v4833_v39 = vsel %vm498_vm1, %v4821_v20, 0.0 }
0x17de   : > { %4834 = vadd.xlane.f32.xlu2 %v4833_v39  ;;  %v4795_v40 = vpop.xlane.xlu0 %4794 }
0x17df   : > { %v4810_v41 = vmul.f32 %v7870_v58, %v4795_v40 }
0x17e1   : > { %v7896_v43 = vsub.f32 %v4779_v49, %v4810_v41 }
0x17e3   : > { %v4822_v44 = vmul.f32 %v7896_v43, %v7896_v43 }
0x17e5   : > { %v4836_v8 = vsel %vm498_vm1, %v4822_v44, 0.0 }
0x17e6   : > { %4837 = vadd.xlane.f32.xlu0 %v4836_v8 }
0x17e9   : > { %4831 = vadd.xlane.f32.xlu1 %v4830_v45 }
0x17ee   : > { %v4877_v46 = vpop.permute.xlu1 %4876 }
0x17f1   : > { %v7923_v33 = vpop.permute.xlu0 %4872 }
0x17f6   : > { %4856 = vperm.xlu2 %6198, %v7834_v15  }
0x17fa   : > { %4864 = vperm.xlu0 %6189, %v7821_v35  }
0x17fe   : > { %6199 = vset.pattern.permute.xlu2 %v6362_v5 }
0x17ff   : > { %5054 = vperm.xlu2 %6199, %v7834_v15   ;;  %v6217_v15 = vpop.eup %6216 }
0x1800   : > { %v4843_v57 = vmul.f32 7.0, %v6217_v15  ;;  %vm4847_vm11 = vweird.f32 %v6217_v15 }
0x1802   : > { %6195 = vset.pattern.permute.xlu0 %v6362_v5  ;;  %v4844_v59 = vsub.f32 1.0, %v4843_v57 }
0x1803   : > { %5062 = vperm.xlu0 %6195, %v7821_v35  }
0x1804   : > { %v4845_v35 = vmul.f32 %v6217_v15, %v4844_v59 }
0x1806   : > { %v4846_v36 = vadd.f32 %v6217_v15, %v4845_v35 }
0x1808   : > { %v7918_v62 = vsel %vm4847_vm11, %v6217_v15, %v4846_v36 }
0x180b   : > { %6201 = vset.pattern.permute.xlu0 %v6359_v19 }
0x1819   : > { %v4798_v48 = vpop.xlane.xlu1 %4797 }
0x181a   : > { %v4811_v50 = vmul.f32 %v7870_v58, %v4798_v48 }
0x181c   : > { %v4817_v53 = vsub.f32 %v4780_v61, %v4811_v50 }
0x181e   : > { %v7912_v54 = vmul.f32 %v4877_v46, %v4817_v53  ;;  %v4823_v51 = vmul.f32 %v4817_v53, %v4817_v53 }
0x1820   : > { %v4839_v0 = vsel %vm498_vm1, %v4823_v51, 0.0 }
0x1821   : > { %4840 = vadd.xlane.f32.xlu1 %v4839_v0 }
0x1831   : > { %v7927_v52 = vpop.permute.xlu1 %5074 }
0x1839   : > { %v4826_v63 = vpop.xlane.xlu2 %4825 }
0x183a   : > { %4860 = vperm.xlu1 %6193, %v7801_v18   ;;  %v4849_v1 = vmul.f32 %v7918_v62, %v4826_v63 }
0x183c   : > { %6218 = vrsqrt.f32 %v4849_v1  ;;  %vm4892_vm13 = vcmp.eq.f32.partialorder %v4849_v1, inf  ;;  %v4895_v17 = vand.u32 2147483648, %v4849_v1  ;;  %vm4894_vm14 = vcmp.eq.f32.partialorder %v4849_v1, 0.0 }
0x1841   : > { %v4829_v56 = vpop.xlane.xlu0 %4828 }
0x1842   : > { %6194 = vset.pattern.permute.xlu1 %v6362_v5  ;;  %v6219_v2 = vpop.eup %6218  ;;  %v7935_v6 = vmul.f32 %v7918_v62, %v4829_v56 }
0x1843   : > { %5058 = vperm.xlu1 %6194, %v7801_v18   ;;  %v4886_v4 = vmul.f32 %v6219_v2, %v4849_v1 }
0x1845   : > { %v4887_v49 = vmul.f32 %v6219_v2, %v4886_v4 }
0x1847   : > { %v4888_v24 = vmul.f32 0.5, %v4887_v49 }
0x1849   : > { %v4889_v22 = vsub.f32 1.5, %v4888_v24 }
0x184b   : > { %6196 = vset.pattern.permute.xlu1 %v6360_v47  ;;  %v4890_v12 = vmul.f32 %v6219_v2, %v4889_v22 }
0x184c   : > { %4868 = vperm.xlu1 %6196, %v7816_v32  }
0x184d   : > { %v4891_v29 = vmul.f32 %v4890_v12, %v4849_v1 }
0x1851   : > { %v4835_v51 = vpop.xlane.xlu2 %4834 }
0x1852   : > { %v7947_v57 = vmul.f32 %v7918_v62, %v4835_v51  ;;  %v4907_v51 = vand.u32 2147483648, %v7935_v6 }
0x1854   : > { %6197 = vset.pattern.permute.xlu1 %v6362_v5 }
0x1855   : > { %5066 = vperm.xlu1 %6197, %v7816_v32   ;;  %v4893_v32 = vsel %vm4892_vm13, %v4849_v1, %v4891_v29 }
0x1856   : > { %v4896_v10 = vsel %vm4894_vm14, %v4895_v17, %v4893_v32 }
0x1857   : > { %v7938_v13 = vadd.f32 1e-08, %v4896_v10 }
0x1859   : > { %v4838_v61 = vpop.xlane.xlu0 %4837 }
0x185a   : > { %v4853_v18 = vmul.f32 %v7918_v62, %v4838_v61  ;;  %v4883_v61 = vmul.f32 %v7923_v33, %v7896_v43 }
0x185c   : > { %6220 = vrsqrt.f32 %v4853_v18  ;;  %v4832_v55 = vpop.xlane.xlu1 %4831  ;;  %vm4940_vm4 = vcmp.eq.f32.partialorder %v4853_v18, inf  ;;  %v4943_v20 = vand.u32 2147483648, %v4853_v18  ;;  %vm4942_vm10 = vcmp.eq.f32.partialorder %v4853_v18, 0.0 }
0x185d   : > { %v4851_v47 = vmul.f32 %v7918_v62, %v4832_v55  ;;  %6200 = vset.pattern.permute.xlu1 %v6359_v19 }
0x185f   : > { %6222 = vrsqrt.f32 %v4851_v47  ;;  %vm4916_vm5 = vcmp.eq.f32.partialorder %v4851_v47, inf  ;;  %v4919_v25 = vand.u32 2147483648, %v4851_v47  ;;  %vm4918_vm2 = vcmp.eq.f32.partialorder %v4851_v47, 0.0 }
0x1860   : > { %6224 = vrsqrt.f32 %v7935_v6 }
0x1861   : > { %6226 = vrcp.f32 %v7938_v13 }
0x1862   : > { %v6221_v30 = vpop.eup %6220 }
0x1863   : > { %v4934_v5 = vmul.f32 %v6221_v30, %v4853_v18 }
0x1865   : > { %v6223_v37 = vpop.eup %6222  ;;  %v4935_v7 = vmul.f32 %v6221_v30, %v4934_v5 }
0x1866   : > { %v4910_v9 = vmul.f32 %v6223_v37, %v4851_v47  ;;  %v6225_v31 = vpop.eup %6224 }
0x1867   : > { %v4936_v21 = vmul.f32 0.5, %v4935_v7  ;;  %v4898_v40 = vmul.f32 %v6225_v31, %v7935_v6  ;;  %v7942_v46 = vpop.eup %6226  ;;  %v4974_v7 = vand.u32 2147483648, %v7938_v13 }
0x1868   : > { %v4911_v11 = vmul.f32 %v6223_v37, %v4910_v9  ;;  %v4964_v0 = vmul.f32 %v7942_v46, %v7938_v13  ;;  %vm4969_vm11 = vweird.f32 %v7942_v46  ;;  %v4972_v9 = vand.u32 2147483647, %v7938_v13 }
0x1869   : > { %v4937_v19 = vsub.f32 1.5, %v4936_v21  ;;  %v4899_v50 = vmul.f32 %v6225_v31, %v4898_v40 }
0x186a   : > { %v4912_v27 = vmul.f32 0.5, %v4911_v11  ;;  %v4965_v59 = vsub.f32 1.0, %v4964_v0  ;;  %v4857_v11 = vpop.permute.xlu2 %4856 }
0x186b   : > { %v4938_v14 = vmul.f32 %v6221_v30, %v4937_v19  ;;  %v4900_v23 = vmul.f32 0.5, %v4899_v50 }
0x186c   : > { %v4913_v26 = vsub.f32 1.5, %v4912_v27  ;;  %v4966_v49 = vmul.f32 %v7942_v46, %v4965_v59  ;;  %v4865_v56 = vpop.permute.xlu0 %4864 }
0x186d   : > { %v4939_v28 = vmul.f32 %v4938_v14, %v4853_v18  ;;  %v4901_v63 = vsub.f32 1.5, %v4900_v23  ;;  %v4881_v27 = vmul.f32 %v4865_v56, %v7894_v42 }
0x186e   : > { %v4914_v38 = vmul.f32 %v6223_v37, %v4913_v26  ;;  %v4967_v32 = vadd.f32 %v7942_v46, %v4966_v49 }
0x186f   : > { %v4941_v39 = vsel %vm4940_vm4, %v4853_v18, %v4939_v28  ;;  %v4902_v12 = vmul.f32 %v6225_v31, %v4901_v63  ;;  %vm4968_vm4 = vweird.f32 %v7938_v13 }
0x1870   : > { %v4915_v41 = vmul.f32 %v4914_v38, %v4851_v47  ;;  %v4944_v44 = vsel %vm4942_vm10, %v4943_v20, %v4941_v39  ;;  %v4975_v38 = vor.u32 1.1754944e-38, %v4974_v7 }
0x1871   : > { %v4961_v8 = vadd.f32 1e-08, %v4944_v44  ;;  %v4903_v40 = vmul.f32 %v4902_v12, %v7935_v6 }
0x1872   : > { %v4917_v45 = vsel %vm4916_vm5, %v4851_v47, %v4915_v41  ;;  %vm7959_vm5 = vmor %vm4968_vm4, %vm4969_vm11  ;;  %vm4906_vm11 = vcmp.eq.f32.partialorder %v7935_v6, 0.0  ;;  %vm4930_vm4 = vcmp.eq.f32.partialorder %v7947_v57, 0.0 }
0x1873   : > { %v4920_v48 = vsel %vm4918_vm2, %v4919_v25, %v4917_v45  ;;  %6228 = vrcp.f32 %v4961_v8  ;;  %v5034_v4 = vand.u32 2147483648, %v4961_v8  ;;  %v5032_v22 = vand.u32 2147483647, %v4961_v8 }
0x1874   : > { %v4959_v53 = vadd.f32 1e-08, %v4920_v48  ;;  %vm5028_vm3 = vweird.f32 %v4961_v8  ;;  %v4971_v26 = vsel %vm7959_vm5, %v7942_v46, %v4967_v32  ;;  %v4879_v25 = vmul.f32 %v4857_v11, %v7874_v3 }
0x1875   : > { %v5035_v5 = vor.u32 1.1754944e-38, %v5034_v4  ;;  %vm5033_vm13 = vcmp.eq.f32.partialorder %v5032_v22, 8.507059e+37  ;;  %v5063_v31 = vpop.permute.xlu0 %5062 }
0x1876   : > { %6230 = vrcp.f32 %v4959_v53  ;;  %v5004_v55 = vand.u32 2147483648, %v4959_v53  ;;  %v5002_v30 = vand.u32 2147483647, %v4959_v53  ;;  %vm4998_vm14 = vweird.f32 %v4959_v53 }
0x1877   : > { %6232 = vrsqrt.f32 %v7947_v57 }
0x1878   : > { %v5005_v10 = vor.u32 1.1754944e-38, %v5004_v55  ;;  %vm5003_vm2 = vcmp.eq.f32.partialorder %v5002_v30, 8.507059e+37 }
0x1879   : > { %v6229_v15 = vpop.eup %6228 }
0x187a   : > { %v5024_v35 = vmul.f32 %v6229_v15, %v4961_v8  ;;  %vm5029_vm0 = vweird.f32 %v6229_v15 }
0x187b   : > { %vm5030_vm6 = vmor %vm5028_vm3, %vm5029_vm0  ;;  %vm4973_vm0 = vcmp.eq.f32.partialorder %v4972_v9, 8.507059e+37 }
0x187c   : > { %v6231_v36 = vpop.eup %6230  ;;  %v5025_v1 = vsub.f32 1.0, %v5024_v35  ;;  %v4976_v42 = vsel %vm4973_vm0, %v4975_v38, %v4971_v26 }
0x187d   : > { %v4994_v2 = vmul.f32 %v6231_v36, %v4959_v53  ;;  %vm4999_vm8 = vweird.f32 %v6231_v36  ;;  %v6233_v37 = vpop.eup %6232  ;;  %v5055_v53 = vpop.permute.xlu2 %5054 }
0x187e   : > { %v5026_v24 = vmul.f32 %v6229_v15, %v5025_v1  ;;  %vm5000_vm10 = vmor %vm4998_vm14, %vm4999_vm8  ;;  %v4922_v20 = vmul.f32 %v6233_v37, %v7947_v57  ;;  %vm4904_vm8 = vcmp.eq.f32.partialorder %v7935_v6, inf  ;;  %vm4928_vm14 = vcmp.eq.f32.partialorder %v7947_v57, inf }
0x187f   : > { %v4995_v18 = vsub.f32 1.0, %v4994_v2  ;;  %v4905_v50 = vsel %vm4904_vm8, %v7935_v6, %v4903_v40 }
0x1880   : > { %v5027_v47 = vadd.f32 %v6229_v15, %v5026_v24  ;;  %v4923_v45 = vmul.f32 %v6233_v37, %v4922_v20  ;;  %v4908_v23 = vsel %vm4906_vm11, %v4907_v51, %v4905_v50 }
0x1881   : > { %v4996_v29 = vmul.f32 %v6231_v36, %v4995_v18  ;;  %v4958_v59 = vadd.f32 1e-08, %v4908_v23 }
0x1882   : > { %v5031_v17 = vsel %vm5030_vm6, %v6229_v15, %v5027_v47  ;;  %v4924_v0 = vmul.f32 0.5, %v4923_v45 }
0x1883   : > { %v4997_v43 = vadd.f32 %v6231_v36, %v4996_v29  ;;  %v5036_v33 = vsel %vm5033_vm13, %v5035_v5, %v5031_v17  ;;  %6234 = vrcp.f32 %v4958_v59  ;;  %v4989_v11 = vand.u32 2147483648, %v4958_v59 }
0x1884   : > { %v5037_v21 = vmul.f32 %v5036_v33, %v4883_v61  ;;  %v4925_v35 = vsub.f32 1.5, %v4924_v0  ;;  %vm4983_vm0 = vweird.f32 %v4958_v59  ;;  %v4987_v19 = vand.u32 2147483647, %v4958_v59 }
0x1885   : > { %v5001_v14 = vsel %vm5000_vm10, %v6231_v36, %v4997_v43 }
0x1886   : > { %v5006_v28 = vsel %vm5003_vm2, %v5005_v10, %v5001_v14  ;;  %v5081_v13 = vadd.f32 %v7915_v60, %v5037_v21  ;;  %v4977_v60 = vmul.f32 %v4976_v42, %v4879_v25  ;;  %v4926_v4 = vmul.f32 %v6233_v37, %v4925_v35 }
0x1887   : > { %v5007_v39 = vmul.f32 %v5006_v28, %v4881_v27  ;;  %vm4988_vm8 = vcmp.eq.f32.partialorder %v4987_v19, 8.507059e+37 }
0x1888   : > { %vm5087_vm3 = vcmp.ge.f32.partialorder %v5081_v13, 0.0  ;;  %v5093_v41 = vmul.f32 0.2, %v5081_v13  ;;  %v5077_v3 = vadd.f32 %v5055_v53, %v4977_v60  ;;  %v4927_v6 = vmul.f32 %v4926_v4, %v7947_v57 }
0x1889   : > { %v5079_v44 = vadd.f32 %v5063_v31, %v5007_v39  ;;  %v6235_v24 = vpop.eup %6234  ;;  %v4990_v31 = vor.u32 1.1754944e-38, %v4989_v11 }
0x188a   : > { %v5099_v8 = vsel %vm5087_vm3, %v5081_v13, %v5093_v41  ;;  %v5089_v63 = vmul.f32 0.2, %v5077_v3  ;;  %vm5083_vm13 = vcmp.ge.f32.partialorder %v5077_v3, 0.0  ;;  %v4929_v18 = vsel %vm4928_vm14, %v7947_v57, %v4927_v6 }
0x188b   : > { %v5113_v46 = vsel %vm498_vm1, %v5099_v8, 0.0  ;;  %v5091_v48 = vmul.f32 0.2, %v5079_v44  ;;  %vm5085_vm6 = vcmp.ge.f32.partialorder %v5079_v44, 0.0  ;;  %v4979_v55 = vmul.f32 %v6235_v24, %v4958_v59 }
0x188c   : > { %5114 = vadd.xlane.f32.xlu0 %v5113_v46  ;;  %v5095_v49 = vsel %vm5083_vm13, %v5077_v3, %v5089_v63  ;;  %vm4984_vm2 = vweird.f32 %v6235_v24 }
0x188d   : > { %v5097_v15 = vsel %vm5085_vm6, %v5079_v44, %v5091_v48  ;;  %v5101_v56 = vsel %vm498_vm1, %v5095_v49, 0.0  ;;  %v4980_v5 = vsub.f32 1.0, %v4979_v55  ;;  %vm4985_vm3 = vmor %vm4983_vm0, %vm4984_vm2 }
0x188e   : > { %v5107_v36 = vsel %vm498_vm1, %v5097_v15, 0.0 }
0x188f   : > { %v4981_v7 = vmul.f32 %v6235_v24, %v4980_v5 }
0x1891   : > { %v4982_v21 = vadd.f32 %v6235_v24, %v4981_v7 }
0x1893   : > { %v4986_v26 = vsel %vm4985_vm3, %v6235_v24, %v4982_v21 }
0x1894   : > { %5108 = vadd.xlane.f32.xlu0 %v5107_v36  ;;  %v4841_v1 = vpop.xlane.xlu1 %4840  ;;  %v4991_v13 = vsel %vm4988_vm8, %v4990_v31, %v4986_v26 }
0x1895   : > { %v4854_v2 = vmul.f32 %v7918_v62, %v4841_v1  ;;  %v4931_v62 = vand.u32 2147483648, %v7947_v57 }
0x1897   : > { %6236 = vrsqrt.f32 %v4854_v2  ;;  %v4932_v29 = vsel %vm4930_vm4, %v4931_v62, %v4929_v18  ;;  %vm4952_vm10 = vcmp.eq.f32.partialorder %v4854_v2, inf  ;;  %v4955_v43 = vand.u32 2147483648, %v4854_v2 }
0x1898   : > { %v7984_v32 = vadd.f32 1e-08, %v4932_v29  ;;  %vm4954_vm5 = vcmp.eq.f32.partialorder %v4854_v2, 0.0 }
0x189a   : > { %6238 = vrcp.f32 %v7984_v32  ;;  %v5019_v59 = vand.u32 2147483648, %v7984_v32  ;;  %v5017_v35 = vand.u32 2147483647, %v7984_v32 }
0x189c   : > { %5102 = vadd.xlane.f32.xlu0 %v5101_v56  ;;  %v5020_v4 = vor.u32 1.1754944e-38, %v5019_v59  ;;  %vm5018_vm3 = vcmp.eq.f32.partialorder %v5017_v35, 8.507059e+37 }
0x189d   : > { %v6237_v22 = vpop.eup %6236 }
0x189e   : > { %v4946_v61 = vmul.f32 %v6237_v22, %v4854_v2 }
0x18a0   : > { %v4947_v12 = vmul.f32 %v6237_v22, %v4946_v61  ;;  %v6239_v27 = vpop.eup %6238 }
0x18a1   : > { %v5009_v28 = vmul.f32 %v6239_v27, %v7984_v32 }
0x18a2   : > { %v4948_v47 = vmul.f32 0.5, %v4947_v12 }
0x18a3   : > { %v5010_v42 = vsub.f32 1.0, %v5009_v28 }
0x18a4   : > { %v4949_v30 = vsub.f32 1.5, %v4948_v47 }
0x18a5   : > { %v5011_v60 = vmul.f32 %v6239_v27, %v5010_v42 }
0x18a6   : > { %v4950_v17 = vmul.f32 %v6237_v22, %v4949_v30 }
0x18a7   : > { %v5012_v3 = vadd.f32 %v6239_v27, %v5011_v60 }
0x18a8   : > { %v4951_v37 = vmul.f32 %v4950_v17, %v4854_v2 }
0x18aa   : > { %v4953_v33 = vsel %vm4952_vm10, %v4854_v2, %v4951_v37  ;;  %vm5014_vm10 = vweird.f32 %v6239_v27 }
0x18ab   : > { %v4956_v9 = vsel %vm4954_vm5, %v4955_v43, %v4953_v33  ;;  %vm5013_vm5 = vweird.f32 %v7984_v32  ;;  %v5147_v43 = vld [vmem:[%s8016_s29 + $0x8] sm:$0xff] }
0x18ac   : > { %v4861_v10 = vpop.permute.xlu1 %4860  ;;  %v4962_v57 = vadd.f32 1e-08, %v4956_v9  ;;  %vm5015_vm2 = vmor %vm5013_vm5, %vm5014_vm10 }
0x18ad   : > { %v4880_v14 = vmul.f32 %v4861_v10, %v7881_v16  ;;  %v5016_v1 = vsel %vm5015_vm2, %v6239_v27, %v5012_v3 }
0x18ae   : > { %6240 = vrcp.f32 %v4962_v57  ;;  %v5049_v8 = vand.u32 2147483648, %v4962_v57  ;;  %v5047_v46 = vand.u32 2147483647, %v4962_v57  ;;  %vm5043_vm13 = vweird.f32 %v4962_v57 }
0x18af   : > { %v4992_v38 = vmul.f32 %v4991_v13, %v4880_v14  ;;  %v5021_v6 = vsel %vm5018_vm3, %v5020_v4, %v5016_v1  ;;  %v5146_v1 = vld [vmem:[%s8016_s29] sm:$0xff] }
0x18b0   : > { %v5050_v53 = vor.u32 1.1754944e-38, %v5049_v8  ;;  %vm5048_vm4 = vcmp.eq.f32.partialorder %v5047_v46, 8.507059e+37 }
0x18b4   : > { %v6241_v20 = vpop.eup %6240 }
0x18b5   : > { %v5059_v39 = vpop.permute.xlu1 %5058  ;;  %v5039_v40 = vmul.f32 %v6241_v20, %v4962_v57  ;;  %vm5044_vm11 = vweird.f32 %v6241_v20 }
0x18b6   : > { %v5078_v41 = vadd.f32 %v5059_v39, %v4992_v38  ;;  %vm5045_vm14 = vmor %vm5043_vm13, %vm5044_vm11 }
0x18b7   : > { %v5040_v44 = vsub.f32 1.0, %v5039_v40 }
0x18b8   : > { %v5090_v25 = vmul.f32 0.2, %v5078_v41  ;;  %vm5084_vm6 = vcmp.ge.f32.partialorder %v5078_v41, 0.0 }
0x18b9   : > { %v5041_v45 = vmul.f32 %v6241_v20, %v5040_v44 }
0x18ba   : > { %v5096_v16 = vsel %vm5084_vm6, %v5078_v41, %v5090_v25 }
0x18bb   : > { %v5104_v48 = vsel %vm498_vm1, %v5096_v16, 0.0  ;;  %v5042_v50 = vadd.f32 %v6241_v20, %v5041_v45 }
0x18bc   : > { %5105 = vadd.xlane.f32.xlu2 %v5104_v48 }
0x18bd   : > { %v5046_v51 = vsel %vm5045_vm14, %v6241_v20, %v5042_v50 }
0x18be   : > { %v4869_v0 = vpop.permute.xlu1 %4868  ;;  %v5051_v23 = vsel %vm5048_vm4, %v5050_v53, %v5046_v51  ;;  %v5148_v51 = vld [vmem:[%s8016_s29 + $0x10] sm:$0xff]  ;;  %s6281_s29 = scalar_lea.hbm %s8203_s30, 8 }
0x18bf   : > { %v5052_v15 = vmul.f32 %v5051_v23, %v7912_v54  ;;  %v4882_v63 = vmul.f32 %v4869_v0, %v7887_v34 }
0x18c1   : > { %v5082_v36 = vadd.f32 %v7927_v52, %v5052_v15  ;;  %v5022_v56 = vmul.f32 %v5021_v6, %v4882_v63 }
0x18c3   : > { %vm5088_vm0 = vcmp.ge.f32.partialorder %v5082_v36, 0.0  ;;  %v5094_v2 = vmul.f32 0.2, %v5082_v36 }
0x18c5   : > { %v5100_v49 = vsel %vm5088_vm0, %v5082_v36, %v5094_v2 }
0x18c6   : > { %v5116_v54 = vsel %vm498_vm1, %v5100_v49, 0.0 }
0x18c7   : > { %5117 = vadd.xlane.f32.xlu1 %v5116_v54  ;;  %v5067_v24 = vpop.permute.xlu1 %5066 }
0x18c8   : > { %v5080_v22 = vadd.f32 %v5067_v24, %v5022_v56 }
0x18ca   : > { %v5092_v61 = vmul.f32 0.2, %v5080_v22  ;;  %vm5086_vm8 = vcmp.ge.f32.partialorder %v5080_v22, 0.0 }
0x18cc   : > { %v5098_v52 = vsel %vm5086_vm8, %v5080_v22, %v5092_v61 }
0x18cd   : > { %v5110_v34 = vsel %vm498_vm1, %v5098_v52, 0.0 }
0x18cf   : > { %5111 = vadd.xlane.f32.xlu1 %v5110_v34 }
0x18ff   : > { %v5115_v18 = vpop.xlane.xlu0 %5114 }
0x1900   : > { %v5123_v12 = vmul.f32 %v5115_v18, %v7870_v58 }
0x1902   : > { %5129 = vst.msk [vmem:[%s8002_s15 + $0x20] sm:$0xff] %vm3178_vm15, %v5123_v12  ;;  %v5686_v55 = vclamps-f32 %v5123_v12, 10.0 }
0x1904   : > { %v5138_v62 = vmul.f32 0.5, %v5686_v55  ;;  %v5166_v47 = vmul.f32 1.442695, %v5686_v55 }
0x1906   : > { %6242 = vpow2.f32 %v5166_v47  ;;  %v5142_v29 = vmul.f32 1.442695, %v5138_v62  ;;  %v5156_v20 = vsub.f32 -0.9189385, %v5138_v62 }
0x1907   : > { %v5109_v30 = vpop.xlane.xlu0 %5108 }
0x1908   : > { %v5121_v5 = vmul.f32 %v5109_v30, %v7870_v58  ;;  %6244 = vpow2.f32 %v5142_v29 }
0x190a   : > { %5127 = vst.msk [vmem:[%s8002_s15 + $0x10] sm:$0xff] %vm3178_vm15, %v5121_v5 }
0x190c   : > { %v6243_v32 = vpop.eup %6242 }
0x190d   : > { %6246 = vrcp.f32 %v6243_v32  ;;  %v5196_v57 = vand.u32 2147483648, %v6243_v32  ;;  %v5194_v27 = vand.u32 2147483647, %v6243_v32  ;;  %vm5190_vm6 = vweird.f32 %v6243_v32 }
0x190e   : > { %v6245_v7 = vpop.eup %6244 }
0x190f   : > { %v5103_v17 = vpop.xlane.xlu0 %5102  ;;  %v5150_v9 = vmul.f32 %v6245_v7, %v5147_v43  ;;  %v5197_v26 = vor.u32 1.1754944e-38, %v5196_v57  ;;  %vm5195_vm13 = vcmp.eq.f32.partialorder %v5194_v27, 8.507059e+37 }
0x1910   : > { %v8019_v37 = vmul.f32 %v5103_v17, %v7870_v58 }
0x1911   : > { %v5159_v11 = vmul.f32 %v5150_v9, %v5150_v9 }
0x1912   : > { %5125 = vst.msk [vmem:[%s8002_s15] sm:$0xff] %vm3178_vm15, %v8019_v37 }
0x1913   : > { %v6247_v33 = vpop.eup %6246  ;;  %v5162_v31 = vmul.f32 0.5, %v5159_v11 }
0x1914   : > { %v5186_v10 = vmul.f32 %v6247_v33, %v6243_v32  ;;  %vm5191_vm1 = vweird.f32 %v6247_v33 }
0x1915   : > { %vm5192_vm11 = vmor %vm5190_vm6, %vm5191_vm1  ;;  %vm5306_vm1 = vcmask 1031168   ;;  %vm5364_vm6 = vcmask 1041408  }
0x1916   : > { %v5187_v21 = vsub.f32 1.0, %v5186_v10 }
0x1918   : > { %v5188_v19 = vmul.f32 %v6247_v33, %v5187_v21 }
0x191a   : > { %v5189_v14 = vadd.f32 %v6247_v33, %v5188_v19 }
0x191c   : > { %v5193_v28 = vsel %vm5192_vm11, %v6247_v33, %v5189_v14  ;;  %v5224_v14 = vld [vmem:[#allocation3 + $0x18] sm:$0xff]  ;;  %vm5368_vm11 = vcmask 1042432  }
0x191d   : > { %v5198_v13 = vsel %vm5195_vm13, %v5197_v26, %v5193_v28  ;;  %v5223_v26 = vld [vmem:[#allocation3 + $0x10] sm:$0xff] }
0x191e   : > { %v5199_v38 = vmul.f32 %v5198_v13, %v5162_v31  ;;  %v5222_v31 = vld [vmem:[#allocation3 + $0x8] sm:$0xff] }
0x1920   : > { %v5216_v39 = vsub.f32 %v5156_v20, %v5199_v38  ;;  %v5221_v38 = vld [vmem:[#allocation3] sm:$0xff] }
0x1922   : > { %5219 = vst.msk [vmem:[%s8030_s21 + $0x8] sm:$0xff] %vm3178_vm15, %v5216_v39 }
0x192f   : > { %v5106_v40 = vpop.xlane.xlu2 %5105 }
0x1930   : > { %v5120_v41 = vmul.f32 %v5106_v40, %v7870_v58  ;;  %v5225_v40 = vld [vmem:[#allocation3 + $0x20] sm:$0xff] }
0x1932   : > { %5126 = vst.msk [vmem:[%s8002_s15 + $0x8] sm:$0xff] %vm3178_vm15, %v5120_v41  ;;  %v5153_v42 = vadd.f32 %v5150_v9, %v5120_v41 }
0x1934   : > { %5243 = vperm.xlu1 %6200, %v5153_v42  }
0x193a   : > { %v5118_v44 = vpop.xlane.xlu1 %5117 }
0x193b   : > { %v5124_v25 = vmul.f32 %v5118_v44, %v7870_v58 }
0x193d   : > { %5130 = vst.msk [vmem:[%s8002_s15 + $0x28] sm:$0xff] %vm3178_vm15, %v5124_v25  ;;  %v5687_v8 = vclamps-f32 %v5124_v25, 10.0 }
0x193f   : > { %v5139_v45 = vmul.f32 0.5, %v5687_v8  ;;  %v5168_v46 = vmul.f32 1.442695, %v5687_v8 }
0x1941   : > { %v5144_v16 = vmul.f32 1.442695, %v5139_v45  ;;  %6248 = vpow2.f32 %v5168_v46  ;;  %v5157_v47 = vsub.f32 -0.9189385, %v5139_v45 }
0x1942   : > { %v5112_v60 = vpop.xlane.xlu1 %5111 }
0x1943   : > { %6250 = vpow2.f32 %v5144_v16  ;;  %v5122_v48 = vmul.f32 %v5112_v60, %v7870_v58 }
0x1945   : > { %5128 = vst.msk [vmem:[%s8002_s15 + $0x18] sm:$0xff] %vm3178_vm15, %v5122_v48  ;;  %v5685_v50 = vclamps-f32 %v5122_v48, 10.0  ;;  %s5411_s15 = sshll.u32 %s5407_s1, 4  ;;  %s5412_s15 = int_to_ptr.hbm [resolvable:$true] %s5411_s15 }
0x1946   : > { %s6275_s2 = sshra.s32 %s5412_s15, 4  ;;  %s6276_s2 = int_to_ptr.hbm [resolvable:$true] %s6275_s2 }
0x1947   : > { %v6249_v53 = vpop.eup %6248  ;;  %v5137_v0 = vmul.f32 0.5, %v5685_v50  ;;  %v5164_v23 = vmul.f32 1.442695, %v5685_v50  ;;  %s6277_s22 = scalar_lea.hbm %s6276_s2, 4  ;;  %p6282_p0 = scmp.lt.s32.totalorder %s6276_s2, %s8203_s30 }
0x1948   : > { %6252 = vrcp.f32 %v6249_v53  ;;  %v5211_v49 = vand.u32 2147483648, %v6249_v53  ;;  %v5209_v24 = vand.u32 2147483647, %v6249_v53  ;;  %vm5205_vm4 = vweird.f32 %v6249_v53  ;;  %p6278_p11 = scmp.ne.s32.totalorder %s6276_s2, %s6277_s22  ;;  %p6283_p1 = scmp.lt.s32.totalorder %s6281_s29, %s6277_s22 }
0x1949   : > { %v6251_v3 = vpop.eup %6250  ;;  %v5140_v15 = vmul.f32 1.442695, %v5137_v0  ;;  %6254 = vpow2.f32 %v5164_v23  ;;  %v5155_v57 = vsub.f32 -0.9189385, %v5137_v0 }
0x194a   : > { %v5151_v59 = vmul.f32 %v6251_v3, %v5148_v51  ;;  %v5212_v34 = vor.u32 1.1754944e-38, %v5211_v49  ;;  %vm5210_vm5 = vcmp.eq.f32.partialorder %v5209_v24, 8.507059e+37  ;;  %p6279_p12 = pnand %p6278_p11, %p6486_p5  ;;  %p6284_p2 = por %p6283_p1, %p6282_p0 }
0x194b   : > { %6256 = vpow2.f32 %v5140_v15 }
0x194c   : > { %v5154_v35 = vadd.f32 %v5151_v59, %v5121_v5  ;;  %v5160_v54 = vmul.f32 %v5151_v59, %v5151_v59  ;;  %p6280_p13 = pneg %p6279_p12 }
0x194e   : > { %v6253_v36 = vpop.eup %6252  ;;  %5283 = vperm.xlu0 %6201, %v5154_v35   ;;  %v5163_v18 = vmul.f32 0.5, %v5160_v54  ;;  %p6285_p3 = pnand %p6284_p2, %p6280_p13 }
0x194f   : > { %v6255_v63 = vpop.eup %6254  ;;  %v5201_v58 = vmul.f32 %v6253_v36, %v6249_v53  ;;  %vm5206_vm14 = vweird.f32 %v6253_v36 }
0x1950   : > { %6258 = vrcp.f32 %v6255_v63  ;;  %vm5207_vm10 = vmor %vm5205_vm4, %vm5206_vm14  ;;  %v5179_v5 = vand.u32 2147483647, %v6255_v63  ;;  %v5181_v32 = vand.u32 2147483648, %v6255_v63  ;;  %vm5175_vm0 = vweird.f32 %v6255_v63 }
0x1951   : > { %v6257_v2 = vpop.eup %6256  ;;  %v5202_v4 = vsub.f32 1.0, %v5201_v58 }
0x1952   : > { %v5149_v6 = vmul.f32 %v6257_v2, %v5146_v1  ;;  %v5182_v33 = vor.u32 1.1754944e-38, %v5181_v32  ;;  %vm5180_vm8 = vcmp.eq.f32.partialorder %v5179_v5, 8.507059e+37 }
0x1953   : > { %v5203_v56 = vmul.f32 %v6253_v36, %v5202_v4 }
0x1954   : > { %v5152_v22 = vadd.f32 %v5149_v6, %v8019_v37  ;;  %v5158_v37 = vmul.f32 %v5149_v6, %v5149_v6 }
0x1955   : > { %v5204_v61 = vadd.f32 %v6253_v36, %v5203_v56 }
0x1956   : > { %v6259_v52 = vpop.eup %6258  ;;  %5228 = vperm.xlu1 %6200, %v5152_v22   ;;  %v5161_v9 = vmul.f32 0.5, %v5158_v37 }
0x1957   : > { %v5208_v12 = vsel %vm5207_vm10, %v6253_v36, %v5204_v61  ;;  %v5171_v55 = vmul.f32 %v6259_v52, %v6255_v63  ;;  %vm5176_vm2 = vweird.f32 %v6259_v52 }
0x1958   : > { %v5213_v62 = vsel %vm5210_vm5, %v5212_v34, %v5208_v12  ;;  %vm5177_vm3 = vmor %vm5175_vm0, %vm5176_vm2 }
0x1959   : > { %v5214_v29 = vmul.f32 %v5213_v62, %v5163_v18  ;;  %v5172_v30 = vsub.f32 1.0, %v5171_v55 }
0x195b   : > { %v5217_v17 = vsub.f32 %v5157_v47, %v5214_v29  ;;  %v5173_v7 = vmul.f32 %v6259_v52, %v5172_v30 }
0x195d   : > { %5220 = vst.msk [vmem:[%s8030_s21 + $0x10] sm:$0xff] %vm3178_vm15, %v5217_v17  ;;  %v5174_v43 = vadd.f32 %v6259_v52, %v5173_v7 }
0x195f   : > { %v5178_v10 = vsel %vm5177_vm3, %v6259_v52, %v5174_v43 }
0x1960   : > { %v5183_v21 = vsel %vm5180_vm8, %v5182_v33, %v5178_v10 }
0x1961   : > { %v5184_v11 = vmul.f32 %v5183_v21, %v5161_v9 }
0x1963   : > { %v5215_v19 = vsub.f32 %v5155_v57, %v5184_v11 }
0x1965   : > { %5218 = vst.msk [vmem:[%s8030_s21] sm:$0xff] %vm3178_vm15, %v5215_v19  ;;  %vm5266_vm15 = vcmask 1039360  }
0x19a6   : > { %v5244_v27 = vpop.permute.xlu1 %5243 }
0x19a7   : > { %v5249_v28 = vmul.f32 %v5244_v27, %v5224_v14  ;;  %v5248_v13 = vmul.f32 %v5244_v27, %v5223_v26  ;;  %v5247_v20 = vmul.f32 %v5244_v27, %v5222_v31  ;;  %v5246_v39 = vmul.f32 %v5244_v27, %v5221_v38 }
0x19a8   : > { %v5250_v41 = vmul.f32 %v5244_v27, %v5225_v40 }
0x19a9   : > { %5262 = vrot.lane.b32.xlu0 %v5249_v28, %s6357_s0  ;;  %5260 = vrot.lane.b32.xlu1 %v5248_v13, %s6357_s0 }
0x19aa   : > { %5258 = vrot.lane.b32.xlu2 %v5247_v20, %s6357_s0 }
0x19b1   : > { %5256 = vrot.lane.b32.xlu1 %v5246_v39, %s6357_s0 }
0x19b9   : > { %5264 = vrot.lane.b32.xlu1 %v5250_v41, %s6357_s0  ;;  %s8201_s0 = sld [smem:[#allocation11_spill]] }
0x19bf   : > { %s461_s4 = sand.u32 1, %s8201_s0  }
0x19c0   : > { %v5284_v42 = vpop.permute.xlu0 %5283  ;;  %s5537_s28 = sshll.u32 %s461_s4, 2 }
0x19c1   : > { %v5288_v44 = vmul.f32 %v5284_v42, %v5223_v26  ;;  %v5287_v25 = vmul.f32 %v5284_v42, %v5222_v31  ;;  %v5286_v8 = vmul.f32 %v5284_v42, %v5221_v38  ;;  %v5290_v45 = vmul.f32 %v5284_v42, %v5225_v40  ;;  %s463_s18 = scalar_lea.vmem [#allocation7], %s5537_s28 }
0x19c2   : > { %v5289_v46 = vmul.f32 %v5284_v42, %v5224_v14  ;;  %s5409_s14 = sshll.u32 %s463_s18, 4  ;;  %s5410_s14 = int_to_ptr.vmem [resolvable:$true] %s5409_s14 }
0x19c3   : > { %5300 = vrot.lane.b32.xlu0 %v5288_v44, %s6377_s20  ;;  %5298 = vrot.lane.b32.xlu2 %v5287_v25, %s6377_s20 }
0x19c4   : > { %5296 = vrot.lane.b32.xlu1 %v5286_v8, %s6377_s20 }
0x19c8   : > { %v5229_v16 = vpop.permute.xlu1 %5228 }
0x19c9   : > { %v5232_v15 = vmul.f32 %v5229_v16, %v5222_v31  ;;  %v5233_v59 = vmul.f32 %v5229_v16, %v5223_v26  ;;  %v5231_v36 = vmul.f32 %v5229_v16, %v5221_v38  ;;  %v5235_v18 = vmul.f32 %v5229_v16, %v5225_v40 }
0x19ca   : > { %v5234_v62 = vmul.f32 %v5229_v16, %v5224_v14 }
0x19cb   : > { %5304 = vrot.lane.b32.xlu0 %v5290_v45, %s6377_s20  ;;  %5302 = vrot.lane.b32.xlu2 %v5289_v46, %s6377_s20 }
0x1a04   : > { %v5259_v48 = vpop.permute.xlu2 %5258 }
0x1a1b   : > { %v5261_v60 = vpop.permute.xlu1 %5260  ;;  %v5263_v51 = vpop.permute.xlu0 %5262 }
0x1a1c   : > { %v5268_v23 = vsel %vm5266_vm15, %v5259_v48, %v5261_v60  ;;  %v5269_v3 = vsel %vm5266_vm15, %v5261_v60, %v5263_v51 }
0x1a1d   : > { %v5299_v53 = vpop.permute.xlu2 %5298  ;;  %v5277_v63 = vadd.f32 %v5268_v23, %v5232_v15  ;;  %v5278_v1 = vadd.f32 %v5269_v3, %v5233_v59  ;;  %v5375_v59 = vlaneseq }
0x1a1f   : > { %vm5377_vm13 = vcmp.lt.s32.totalorder %v5375_v59, 512 }
0x1a23   : > { %v5257_v50 = vpop.permute.xlu1 %5256 }
0x1a24   : > { %v5267_v35 = vsel %vm5266_vm15, %v5257_v50, %v5259_v48 }
0x1a25   : > { %v5303_v58 = vpop.permute.xlu2 %5302  ;;  %v5276_v4 = vadd.f32 %v5267_v35, %v5231_v36 }
0x1a2b   : > { %v5265_v0 = vpop.permute.xlu1 %5264 }
0x1a2c   : > { %v5270_v12 = vsel %vm5266_vm15, %v5263_v51, %v5265_v0  ;;  %v5280_v5 = vadd.f32 %v5265_v0, %v5235_v18 }
0x1a2d   : > { %v5279_v32 = vadd.f32 %v5270_v12, %v5234_v62 }
0x1a35   : > { %v5301_v2 = vpop.permute.xlu0 %5300 }
0x1a36   : > { %v5308_v49 = vsel %vm5306_vm1, %v5299_v53, %v5301_v2  ;;  %v5309_v6 = vsel %vm5306_vm1, %v5301_v2, %v5303_v58  ;;  %v5297_v54 = vpop.permute.xlu1 %5296 }
0x1a37   : > { %v5317_v56 = vadd.f32 %v5308_v49, %v5277_v63  ;;  %v5318_v24 = vadd.f32 %v5309_v6, %v5278_v1  ;;  %v5307_v22 = vsel %vm5306_vm1, %v5297_v54, %v5299_v53 }
0x1a38   : > { %v5316_v61 = vadd.f32 %v5307_v22, %v5276_v4 }
0x1a39   : > { %v5328_v52 = vrot.slane %v5317_v56, 4  ;;  %v5334_v34 = vrot.slane %v5318_v24, 4 }
0x1a3a   : > { %v5321_v55 = vsel %vm3050_vm7, %v5316_v61, 0.0  ;;  %vm5362_vm7 = vcmask 1040384  }
0x1a3b   : > { %v5329_v47 = vadd.f32 %v5328_v52, %v5317_v56  ;;  %v5335_v29 = vadd.f32 %v5334_v34, %v5318_v24  ;;  %v5322_v30 = vrot.slane %v5321_v55, 4 }
0x1a3d   : > { %v5330_v17 = vrot.slane %v5329_v47, 2  ;;  %v5336_v37 = vrot.slane %v5335_v29, 2  ;;  %v5323_v7 = vadd.f32 %v5322_v30, %v5321_v55  ;;  %v5305_v43 = vpop.permute.xlu0 %5304 }
0x1a3e   : > { %v5310_v33 = vsel %vm5306_vm1, %v5303_v58, %v5305_v43  ;;  %v5320_v9 = vadd.f32 %v5305_v43, %v5280_v5 }
0x1a3f   : > { %v5331_v10 = vadd.f32 %v5330_v17, %v5329_v47  ;;  %v5337_v21 = vadd.f32 %v5336_v37, %v5335_v29  ;;  %v5324_v57 = vrot.slane %v5323_v7, 2  ;;  %v5319_v11 = vadd.f32 %v5310_v33, %v5279_v32 }
0x1a40   : > { %v5346_v19 = vsel %vm3041_vm12, %v5320_v9, 0.0  ;;  %vm5366_vm12 = vcmask 1043459  }
0x1a41   : > { %v5332_v27 = vrot.slane %v5331_v10, 1  ;;  %v5338_v14 = vrot.slane %v5337_v21, 1  ;;  %v5325_v26 = vadd.f32 %v5324_v57, %v5323_v7  ;;  %v5340_v31 = vrot.slane %v5319_v11, 4 }
0x1a42   : > { %v5347_v28 = vrot.slane %v5346_v19, 4 }
0x1a43   : > { %v5333_v13 = vadd.f32 %v5332_v27, %v5331_v10  ;;  %v5339_v20 = vadd.f32 %v5338_v14, %v5337_v21  ;;  %v5326_v38 = vrot.slane %v5325_v26, 1  ;;  %v5341_v39 = vadd.f32 %v5340_v31, %v5319_v11 }
0x1a44   : > { %v5348_v40 = vadd.f32 %v5347_v28, %v5346_v19 }
0x1a45   : > { %v5358_v41 = vrot.slane %v5333_v13, 7  ;;  %v5359_v42 = vrot.slane %v5339_v20, 6  ;;  %v5327_v44 = vadd.f32 %v5326_v38, %v5325_v26  ;;  %v5342_v25 = vrot.slane %v5341_v39, 2 }
0x1a46   : > { %v5349_v8 = vrot.slane %v5348_v40, 2 }
0x1a47   : > { %v5343_v45 = vadd.f32 %v5342_v25, %v5341_v39  ;;  %v5363_v46 = vsel %vm5362_vm7, %v5327_v44, %v5358_v41 }
0x1a48   : > { %v5350_v16 = vadd.f32 %v5349_v8, %v5348_v40  ;;  %v5365_v60 = vsel %vm5364_vm6, %v5363_v46, %v5359_v42 }
0x1a49   : > { %v5344_v48 = vrot.slane %v5343_v45, 1 }
0x1a4a   : > { %v5351_v50 = vrot.slane %v5350_v16, 1 }
0x1a4b   : > { %v5345_v53 = vadd.f32 %v5344_v48, %v5343_v45 }
0x1a4c   : > { %v5352_v51 = vadd.f32 %v5351_v50, %v5350_v16 }
0x1a4d   : > { %v5360_v0 = vrot.slane %v5345_v53, 5 }
0x1a4e   : > { %v5361_v23 = vrot.slane %v5352_v51, 4 }
0x1a50   : > { %v5367_v3 = vsel %vm5366_vm12, %v5360_v0, %v5361_v23 }
0x1a51   : > { %v5369_v15 = vsel %vm5368_vm11, %v5365_v60, %v5367_v3 }
0x1a52   : > { %5370 = vrot.lane.b32.xlu1 %v5369_v15, %s8178_s23  ;;  %s5391_s23 = scalar_lea.sflag [#allocation8], %s461_s4 }
0x1ac4   : > { %v5371_v35 = vpop.permute.xlu1 %5370 }
0x1ac5   : > { %v5372_v36 = vrot.slane %v5371_v35, 1 }
0x1ac7   : > { %v5373_v63 = vsel %vm658_vm9, %v5371_v35, %v5372_v36 }
0x1ac8   : > { %5379 = vst.msk [vmem:[%s463_s18] sm:$0xf] %vm5377_vm13, %v5373_v63 }
0x1ac9   : > { %6288 = shalt.err (!%p6285_p3)
}
0x1aca   : > { %5711 = dma.vmem_to_hbm [thread:$0]  (%p6486_p5), %s5410_s14, 64, %s5412_s15, %s5391_s23  }
0x1acb PF: > { %s8205_s25 = sld [smem:[#allocation13_spill]] }
0x1acc   : > { %s8206_s21 = sld [smem:[#allocation10_spill]] }
0x1ad1   : > { %p5717_p4 = scmp.ge.s32.totalorder %s8205_s25, 2 }
0x1ad2   : > { %s5439_s0 = sand.u32 1, %s8206_s21  }
0x1ad3   : > { %p5714_p7 = pnand %p5717_p4, %p6490_p6  ;;  %s5440_s3 = scalar_lea.sflag [#allocation8], %s5439_s0 }
0x1ad5   : > { %p5715_p8 = pneg %p5714_p7 }
0x1ad7   : > { %6306 = dma.done.wait (%p5715_p8), %s5440_s3, 64  }
0x1ad8   : > { %6308 = vsyncadd (%p5715_p8), %s5440_s3, 4294967232  ;;  %s8208_s28 = sld [smem:[#allocation15_spill]] }
0x1ad9   : > { %s8209_s25 = sld [smem:[#allocation11_spill]] }
0x1ada   : > { %s8210_s26 = sld [smem:[#allocation12_spill]] }
0x1adb   : > { %s8211_s27 = sld [smem:[#allocation16_spill]] }
0x1ade   : > { %p24_p9 = scmp.ge.s32.totalorder %s8208_s28, 4  }
0x1ae0   :  { %26 = sbr.rel (!%p24_p9) target bundleno = 11 (0xb), region = 136 }
0x1ae5   :  { %5446 = vsyncpa [#allocation8], 1 }
0x1ae6   :  { %5448 = vsyncpa [#allocation8 + $0x1], 1 }

</bundles_post_ra>
